<compile_context>
chip_gen: v7x
topology: tpu7x:2x2x1
jax: 0.10.0
libtpu: 0.0.40
codegen_flags: <defaults>
</compile_context>

<pallas_src>
import jax
import jax.numpy as jnp
from jax.experimental import pallas as pl
from jax.experimental.pallas import tpu as pltpu


def _dcn_kernel(embt_ref,                      # (FD, Bt)  f32  — batch on lanes
                w1t_ref, b1_ref,               # (Hp, FD) mxu_dt, (Hp, 1) f32
                w2t_ref, b2_ref,               # (Hp, Hp),        (Hp, 1)
                w3t_ref, b3_ref,               # (Hp, Hp),        (Hp, 1)
                cwt_ref, cwb_ref, cbt_ref,     # (FD, L), (1, L), (FD, L) f32
                wfc_ref, wfd_ref, bf_ref,      # (FD, 1), (Hp, 1), (1, 1) f32
                out_ref):                      # (1, Bt) f32 — lane-dense store
    embt = embt_ref[...]                       # (FD, Bt) f32
    mxu_dt = w1t_ref.dtype

    # ---- Cross network (VPU, f32): per-row reductions land on sublanes ----
    cn_x0 = embt
    cn_x = embt
    n_cross = cwt_ref.shape[1]
    for i in range(n_cross):                   # L = 5, static unroll
        w_i = cwt_ref[:, pl.ds(i, 1)]                               # (FD, 1)
        s_i = jnp.sum(cn_x * w_i, axis=0, keepdims=True)            # (1, Bt)
        s_i = s_i + cwb_ref[:, pl.ds(i, 1)]                         # + Linear bias
        cn_x = cn_x0 * s_i + cbt_ref[:, pl.ds(i, 1)] + cn_x

    # ---- Deep network (MXU matmuls; optional bf16 operands, f32 accumulation) ----
    # TODO(synk): nn.Dropout(p=0.2) is inference-mode identity (training RNG not reproduced).
    h = jnp.dot(w1t_ref[...], embt.astype(mxu_dt),
                preferred_element_type=jnp.float32) + b1_ref[...]
    h = jnp.maximum(h, 0.0)
    h = jnp.dot(w2t_ref[...], h.astype(mxu_dt),
                preferred_element_type=jnp.float32) + b2_ref[...]
    h = jnp.maximum(h, 0.0)
    h = jnp.dot(w3t_ref[...], h.astype(mxu_dt),
                preferred_element_type=jnp.float32) + b3_ref[...]
    h = jnp.maximum(h, 0.0)                                         # (Hp, Bt) f32

    # ---- Final linear over concat([cn_x, h]) without materializing the concat ----
    logits = (jnp.sum(cn_x * wfc_ref[...], axis=0, keepdims=True)
              + jnp.sum(h * wfd_ref[...], axis=0, keepdims=True)
              + bf_ref[...])                                        # (1, Bt)
    out_ref[...] = 1.0 / (1.0 + jnp.exp(-logits))                   # sigmoid, lane-dense


def dcn_forward(x, table, deep_ws, deep_bs, cross_w, cross_wb, cross_b,
                final_w, final_b, *, batch_tile=128, mxu_bf16=False):
    """x: (B, F) int32; table: (V, D) f32; returns sigmoid output (B, 1) f32.

    batch_tile: rows per grid step. >=128 on v5e, >=256 recommended on v6e/v7x;
    sweep 256-1024 (VMEM is nowhere near the limit for this model).
    mxu_bf16:   cast MXU matmul operands to bf16 (f32 accumulation) — v6e/v7x fast path.
    """
    B, F = x.shape
    V, D = table.shape
    FD = F * D
    H = deep_ws[0].shape[1]
    L = cross_w.shape[0]
    f32 = jnp.float32
    mxu_dt = jnp.bfloat16 if mxu_bf16 else f32

    # Embedding gather hoisted to plain JAX (tiny table; XLA gather is cheap).
    emb = jnp.take(table.astype(f32), x.astype(jnp.int32), axis=0).reshape(B, FD)

    # Pad batch to a multiple of the tile; padded rows are computed and then dropped.
    Bpad = pl.cdiv(B, batch_tile) * batch_tile
    if Bpad != B:
        emb = jnp.pad(emb, ((0, Bpad - B), (0, 0)))
    nb = Bpad // batch_tile

    # Batch-on-lanes layout: activations (features, batch) -> lane-dense output row.
    embt = emb.T                                                    # (FD, Bpad)

    # Pad hidden width 300 -> 384 (multiple of 128); padded lanes stay exactly zero.
    Hp = pl.cdiv(H, 128) * 128

    def pad2(w, r, c):
        w = jnp.asarray(w, f32)
        return jnp.pad(w, ((0, r - w.shape[0]), (0, c - w.shape[1])))

    w1t = pad2(deep_ws[0].T, Hp, FD).astype(mxu_dt)                 # (Hp, FD)
    w2t = pad2(deep_ws[1].T, Hp, Hp).astype(mxu_dt)                 # (Hp, Hp)
    w3t = pad2(deep_ws[2].T, Hp, Hp).astype(mxu_dt)                 # (Hp, Hp)
    b1, b2, b3 = (jnp.pad(jnp.asarray(b, f32), (0, Hp - H)).reshape(Hp, 1)
                  for b in deep_bs)
    cwt = jnp.asarray(cross_w, f32).T                               # (FD, L)
    cwb = jnp.asarray(cross_wb, f32).reshape(1, L)
    cbt = jnp.asarray(cross_b, f32).T                               # (FD, L)
    fw = jnp.asarray(final_w, f32).reshape(-1)
    wfc = fw[:FD].reshape(FD, 1)
    wfd = jnp.pad(fw[FD:], (0, Hp - H)).reshape(Hp, 1)
    bf = jnp.asarray(final_b, f32).reshape(1, 1)

    weights = [w1t, b1, w2t, b2, w3t, b3, cwt, cwb, cbt, wfc, wfd, bf]

    def resident(a):                                                # VMEM-resident weight
        nd = a.ndim
        return pl.BlockSpec(a.shape, lambda i, _n=nd: (0,) * _n)

    grid_spec = pltpu.PrefetchScalarGridSpec(
        num_scalar_prefetch=0,
        grid=(nb,),
        in_specs=[pl.BlockSpec((FD, batch_tile), lambda i: (0, i))]
                 + [resident(w) for w in weights],
        out_specs=pl.BlockSpec((1, batch_tile), lambda i: (0, i)),
    )

    flops = Bpad * (2 * FD * Hp + 4 * Hp * Hp + L * 5 * FD + 2 * (FD + Hp))
    bytes_accessed = int(embt.size * 4
                         + sum(int(w.size) * w.dtype.itemsize for w in weights)
                         + Bpad * 4)

    out = pl.pallas_call(
        _dcn_kernel,
        out_shape=jax.ShapeDtypeStruct((1, Bpad), f32),
        grid_spec=grid_spec,
        compiler_params=pltpu.CompilerParams(dimension_semantics=("parallel",)),
        cost_estimate=pl.CostEstimate(flops=flops, transcendentals=Bpad,
                                      bytes_accessed=bytes_accessed),
    )(embt, *weights)

    return out.reshape(Bpad, 1)[:B]                                 # (B, 1)


def dcn_reference(x, table, deep_ws, deep_bs, cross_w, cross_wb, cross_b, final_w, final_b):
    """Plain-JAX reference of the PyTorch forward (dropout in eval mode)."""
    B = x.shape[0]
    emb = table[x].reshape(B, -1)
    cn_x0 = emb
    cn_x = emb
    for i in range(cross_w.shape[0]):
        s = cn_x @ cross_w[i][:, None] + cross_wb[i]
        cn_x = cn_x0 * s + cross_b[i][None, :] + cn_x
    h = emb
    for w, b in zip(deep_ws, deep_bs):
        h = jnp.maximum(h @ w + b[None, :], 0.0)
    stack = jnp.concatenate([cn_x, h], axis=1)
    return jax.nn.sigmoid(stack @ final_w + final_b)


if __name__ == "__main__":
    key = jax.random.PRNGKey(0)
    ks = jax.random.split(key, 12)

    batch = 200                # not a multiple of batch_tile -> exercises the pad path
    feature_nums = 128         # embedding vocabulary
    field_nums = 8
    latent_dims = 8
    H = 300                    # neural_nums = [300, 300, 300]
    L = 5                      # num_neural_layers (cross depth)
    FD = field_nums * latent_dims

    # Embedding: xavier_uniform; Linear layers: uniform(-1/sqrt(fan_in), +).
    lim_e = (6.0 / (feature_nums + latent_dims)) ** 0.5
    table = jax.random.uniform(ks[0], (feature_nums, latent_dims), jnp.float32, -lim_e, lim_e)

    def lin(k, fan_in, shape):
        y = 1.0 / (fan_in ** 0.5)
        return jax.random.uniform(k, shape, jnp.float32, -y, y)

    deep_ws = [lin(ks[1], FD, (FD, H)), lin(ks[2], H, (H, H)), lin(ks[3], H, (H, H))]
    deep_bs = [0.01 * jax.random.normal(ks[4], (H,)),
               0.01 * jax.random.normal(ks[5], (H,)),
               0.01 * jax.random.normal(ks[6], (H,))]
    cross_w = lin(ks[7], FD, (L, FD))
    cross_wb = 0.01 * jax.random.normal(ks[8], (L,))
    cross_b = 0.01 * jax.random.normal(ks[9], (L, FD))
    final_w = lin(ks[10], FD + H, (FD + H, 1))
    final_b = jnp.float32(0.05)

    x = jax.random.randint(ks[11], (batch, field_nums), 0, feature_nums, dtype=jnp.int32)

    ref = dcn_reference(x, table, deep_ws, deep_bs, cross_w, cross_wb, cross_b,
                        final_w, final_b)

    # f32 MXU operands (exact-mode check; default path, all generations).
    out = dcn_forward(x, table, deep_ws, deep_bs, cross_w, cross_wb, cross_b,
                      final_w, final_b, batch_tile=128, mxu_bf16=False)
    out = jax.block_until_ready(out)
    assert out.shape == (batch, 1)
    err = float(jnp.max(jnp.abs(out - ref)))
    assert jnp.allclose(out, ref, atol=1e-4, rtol=1e-4), f"f32 mismatch vs reference, max err {err}"

    # bf16 MXU operands, f32 accumulation (v6e / v7x fast path) — looser tolerance.
    out_bf = dcn_forward(x, table, deep_ws, deep_bs, cross_w, cross_wb, cross_b,
                         final_w, final_b, batch_tile=128, mxu_bf16=True)
    out_bf = jax.block_until_ready(out_bf)
    err_bf = float(jnp.max(jnp.abs(out_bf - ref)))
    assert jnp.allclose(out_bf, ref, atol=2e-2, rtol=2e-2), f"bf16 mismatch vs reference, max err {err_bf}"

    print("KERNEL_OK")
</pallas_src>

<mosaic_0001>
module attributes {stable_mosaic.version = 11 : i64} {
  func.func @_dcn_kernel(%arg0: i32, %arg1: memref<64x128xf32, #tpu.memory_space<vmem>>, %arg2: memref<384x64xf32, #tpu.memory_space<vmem>>, %arg3: memref<384x1xf32, #tpu.memory_space<vmem>>, %arg4: memref<384x384xf32, #tpu.memory_space<vmem>>, %arg5: memref<384x1xf32, #tpu.memory_space<vmem>>, %arg6: memref<384x384xf32, #tpu.memory_space<vmem>>, %arg7: memref<384x1xf32, #tpu.memory_space<vmem>>, %arg8: memref<64x5xf32, #tpu.memory_space<vmem>>, %arg9: memref<1x5xf32, #tpu.memory_space<vmem>>, %arg10: memref<64x5xf32, #tpu.memory_space<vmem>>, %arg11: memref<64x1xf32, #tpu.memory_space<vmem>>, %arg12: memref<384x1xf32, #tpu.memory_space<vmem>>, %arg13: memref<1x1xf32, #tpu.memory_space<vmem>>, %arg14: memref<1x128xf32, #tpu.memory_space<vmem>>) attributes {dimension_semantics = [#tpu.dimension_semantics<parallel>], iteration_bounds = array<i64: 2>, scalar_prefetch = 0 : i64, scratch_operands = 0 : i64, tpu.core_type = #tpu.core_type<tc>, window_params = [{transform_indices = @transform_0, window_bounds = array<i64: 64, 128>}, {pipeline_mode = #tpu.pipeline_mode<synchronous>, transform_indices = @transform_1, window_bounds = array<i64: 384, 64>}, {pipeline_mode = #tpu.pipeline_mode<synchronous>, transform_indices = @transform_2, window_bounds = array<i64: 384, 1>}, {pipeline_mode = #tpu.pipeline_mode<synchronous>, transform_indices = @transform_3, window_bounds = array<i64: 384, 384>}, {pipeline_mode = #tpu.pipeline_mode<synchronous>, transform_indices = @transform_4, window_bounds = array<i64: 384, 1>}, {pipeline_mode = #tpu.pipeline_mode<synchronous>, transform_indices = @transform_5, window_bounds = array<i64: 384, 384>}, {pipeline_mode = #tpu.pipeline_mode<synchronous>, transform_indices = @transform_6, window_bounds = array<i64: 384, 1>}, {pipeline_mode = #tpu.pipeline_mode<synchronous>, transform_indices = @transform_7, window_bounds = array<i64: 64, 5>}, {pipeline_mode = #tpu.pipeline_mode<synchronous>, transform_indices = @transform_8, window_bounds = array<i64: 1, 5>}, {pipeline_mode = #tpu.pipeline_mode<synchronous>, transform_indices = @transform_9, window_bounds = array<i64: 64, 5>}, {pipeline_mode = #tpu.pipeline_mode<synchronous>, transform_indices = @transform_10, window_bounds = array<i64: 64, 1>}, {pipeline_mode = #tpu.pipeline_mode<synchronous>, transform_indices = @transform_11, window_bounds = array<i64: 384, 1>}, {pipeline_mode = #tpu.pipeline_mode<synchronous>, transform_indices = @transform_12, window_bounds = array<i64: 1, 1>}, {transform_indices = @transform_13, window_bounds = array<i64: 1, 128>}]} {
    %c0 = arith.constant 0 : index
    %c0_0 = arith.constant 0 : index
    %0 = vector.load %arg1[%c0, %c0_0] : memref<64x128xf32, #tpu.memory_space<vmem>>, vector<64x128xf32>
    %c0_1 = arith.constant 0 : index
    %c0_2 = arith.constant 0 : index
    %1 = vector.load %arg8[%c0_1, %c0_2] : memref<64x5xf32, #tpu.memory_space<vmem>>, vector<64x1xf32>
    %2 = vector.broadcast %1 : vector<64x1xf32> to vector<64x128xf32>
    %3 = arith.mulf %0, %2 : vector<64x128xf32>
    %cst = arith.constant dense<0.000000e+00> : vector<128xf32>
    %4 = vector.multi_reduction <add>, %3, %cst [0] : vector<64x128xf32> to vector<128xf32>
    %5 = vector.shape_cast %4 : vector<128xf32> to vector<1x128xf32>
    %c0_3 = arith.constant 0 : index
    %c0_4 = arith.constant 0 : index
    %6 = vector.load %arg9[%c0_3, %c0_4] : memref<1x5xf32, #tpu.memory_space<vmem>>, vector<1x1xf32>
    %7 = vector.broadcast %6 : vector<1x1xf32> to vector<1x128xf32>
    %8 = arith.addf %5, %7 : vector<1x128xf32>
    %9 = vector.broadcast %8 : vector<1x128xf32> to vector<64x128xf32>
    %10 = arith.mulf %0, %9 : vector<64x128xf32>
    %c0_5 = arith.constant 0 : index
    %c0_6 = arith.constant 0 : index
    %11 = vector.load %arg10[%c0_5, %c0_6] : memref<64x5xf32, #tpu.memory_space<vmem>>, vector<64x1xf32>
    %12 = vector.broadcast %11 : vector<64x1xf32> to vector<64x128xf32>
    %13 = arith.addf %10, %12 : vector<64x128xf32>
    %14 = arith.addf %13, %0 : vector<64x128xf32>
    %c0_7 = arith.constant 0 : index
    %c1 = arith.constant 1 : index
    %15 = vector.load %arg8[%c0_7, %c1] : memref<64x5xf32, #tpu.memory_space<vmem>>, vector<64x1xf32>
    %16 = vector.broadcast %15 : vector<64x1xf32> to vector<64x128xf32>
    %17 = arith.mulf %14, %16 : vector<64x128xf32>
    %cst_8 = arith.constant dense<0.000000e+00> : vector<128xf32>
    %18 = vector.multi_reduction <add>, %17, %cst_8 [0] : vector<64x128xf32> to vector<128xf32>
    %19 = vector.shape_cast %18 : vector<128xf32> to vector<1x128xf32>
    %c0_9 = arith.constant 0 : index
    %c1_10 = arith.constant 1 : index
    %20 = vector.load %arg9[%c0_9, %c1_10] : memref<1x5xf32, #tpu.memory_space<vmem>>, vector<1x1xf32>
    %21 = vector.broadcast %20 : vector<1x1xf32> to vector<1x128xf32>
    %22 = arith.addf %19, %21 : vector<1x128xf32>
    %23 = vector.broadcast %22 : vector<1x128xf32> to vector<64x128xf32>
    %24 = arith.mulf %0, %23 : vector<64x128xf32>
    %c0_11 = arith.constant 0 : index
    %c1_12 = arith.constant 1 : index
    %25 = vector.load %arg10[%c0_11, %c1_12] : memref<64x5xf32, #tpu.memory_space<vmem>>, vector<64x1xf32>
    %26 = vector.broadcast %25 : vector<64x1xf32> to vector<64x128xf32>
    %27 = arith.addf %24, %26 : vector<64x128xf32>
    %28 = arith.addf %27, %14 : vector<64x128xf32>
    %c0_13 = arith.constant 0 : index
    %c2 = arith.constant 2 : index
    %29 = vector.load %arg8[%c0_13, %c2] : memref<64x5xf32, #tpu.memory_space<vmem>>, vector<64x1xf32>
    %30 = vector.broadcast %29 : vector<64x1xf32> to vector<64x128xf32>
    %31 = arith.mulf %28, %30 : vector<64x128xf32>
    %cst_14 = arith.constant dense<0.000000e+00> : vector<128xf32>
    %32 = vector.multi_reduction <add>, %31, %cst_14 [0] : vector<64x128xf32> to vector<128xf32>
    %33 = vector.shape_cast %32 : vector<128xf32> to vector<1x128xf32>
    %c0_15 = arith.constant 0 : index
    %c2_16 = arith.constant 2 : index
    %34 = vector.load %arg9[%c0_15, %c2_16] : memref<1x5xf32, #tpu.memory_space<vmem>>, vector<1x1xf32>
    %35 = vector.broadcast %34 : vector<1x1xf32> to vector<1x128xf32>
    %36 = arith.addf %33, %35 : vector<1x128xf32>
    %37 = vector.broadcast %36 : vector<1x128xf32> to vector<64x128xf32>
    %38 = arith.mulf %0, %37 : vector<64x128xf32>
    %c0_17 = arith.constant 0 : index
    %c2_18 = arith.constant 2 : index
    %39 = vector.load %arg10[%c0_17, %c2_18] : memref<64x5xf32, #tpu.memory_space<vmem>>, vector<64x1xf32>
    %40 = vector.broadcast %39 : vector<64x1xf32> to vector<64x128xf32>
    %41 = arith.addf %38, %40 : vector<64x128xf32>
    %42 = arith.addf %41, %28 : vector<64x128xf32>
    %c0_19 = arith.constant 0 : index
    %c3 = arith.constant 3 : index
    %43 = vector.load %arg8[%c0_19, %c3] : memref<64x5xf32, #tpu.memory_space<vmem>>, vector<64x1xf32>
    %44 = vector.broadcast %43 : vector<64x1xf32> to vector<64x128xf32>
    %45 = arith.mulf %42, %44 : vector<64x128xf32>
    %cst_20 = arith.constant dense<0.000000e+00> : vector<128xf32>
    %46 = vector.multi_reduction <add>, %45, %cst_20 [0] : vector<64x128xf32> to vector<128xf32>
    %47 = vector.shape_cast %46 : vector<128xf32> to vector<1x128xf32>
    %c0_21 = arith.constant 0 : index
    %c3_22 = arith.constant 3 : index
    %48 = vector.load %arg9[%c0_21, %c3_22] : memref<1x5xf32, #tpu.memory_space<vmem>>, vector<1x1xf32>
    %49 = vector.broadcast %48 : vector<1x1xf32> to vector<1x128xf32>
    %50 = arith.addf %47, %49 : vector<1x128xf32>
    %51 = vector.broadcast %50 : vector<1x128xf32> to vector<64x128xf32>
    %52 = arith.mulf %0, %51 : vector<64x128xf32>
    %c0_23 = arith.constant 0 : index
    %c3_24 = arith.constant 3 : index
    %53 = vector.load %arg10[%c0_23, %c3_24] : memref<64x5xf32, #tpu.memory_space<vmem>>, vector<64x1xf32>
    %54 = vector.broadcast %53 : vector<64x1xf32> to vector<64x128xf32>
    %55 = arith.addf %52, %54 : vector<64x128xf32>
    %56 = arith.addf %55, %42 : vector<64x128xf32>
    %c0_25 = arith.constant 0 : index
    %c4 = arith.constant 4 : index
    %57 = vector.load %arg8[%c0_25, %c4] : memref<64x5xf32, #tpu.memory_space<vmem>>, vector<64x1xf32>
    %58 = vector.broadcast %57 : vector<64x1xf32> to vector<64x128xf32>
    %59 = arith.mulf %56, %58 : vector<64x128xf32>
    %cst_26 = arith.constant dense<0.000000e+00> : vector<128xf32>
    %60 = vector.multi_reduction <add>, %59, %cst_26 [0] : vector<64x128xf32> to vector<128xf32>
    %61 = vector.shape_cast %60 : vector<128xf32> to vector<1x128xf32>
    %c0_27 = arith.constant 0 : index
    %c4_28 = arith.constant 4 : index
    %62 = vector.load %arg9[%c0_27, %c4_28] : memref<1x5xf32, #tpu.memory_space<vmem>>, vector<1x1xf32>
    %63 = vector.broadcast %62 : vector<1x1xf32> to vector<1x128xf32>
    %64 = arith.addf %61, %63 : vector<1x128xf32>
    %65 = vector.broadcast %64 : vector<1x128xf32> to vector<64x128xf32>
    %66 = arith.mulf %0, %65 : vector<64x128xf32>
    %c0_29 = arith.constant 0 : index
    %c4_30 = arith.constant 4 : index
    %67 = vector.load %arg10[%c0_29, %c4_30] : memref<64x5xf32, #tpu.memory_space<vmem>>, vector<64x1xf32>
    %68 = vector.broadcast %67 : vector<64x1xf32> to vector<64x128xf32>
    %69 = arith.addf %66, %68 : vector<64x128xf32>
    %70 = arith.addf %69, %56 : vector<64x128xf32>
    %c0_31 = arith.constant 0 : index
    %c0_32 = arith.constant 0 : index
    %71 = vector.load %arg2[%c0_31, %c0_32] : memref<384x64xf32, #tpu.memory_space<vmem>>, vector<384x64xf32>
    %cst_33 = arith.constant dense<0.000000e+00> : vector<384x128xf32>
    %72 = tpu.matmul %71, %0, %cst_33 {dimension_numbers = #tpu.dot_dimension_numbers<[1], [0], [0], [1], [0, 0, 1, 1], [], []>} : vector<384x64xf32>, vector<64x128xf32>, vector<384x128xf32> -> vector<384x128xf32>
    %c0_34 = arith.constant 0 : index
    %c0_35 = arith.constant 0 : index
    %73 = vector.load %arg3[%c0_34, %c0_35] : memref<384x1xf32, #tpu.memory_space<vmem>>, vector<384x1xf32>
    %74 = vector.broadcast %73 : vector<384x1xf32> to vector<384x128xf32>
    %75 = arith.addf %72, %74 : vector<384x128xf32>
    %cst_36 = arith.constant 0.000000e+00 : f32
    %76 = vector.broadcast %cst_36 : f32 to vector<384x128xf32>
    %77 = arith.maximumf %75, %76 : vector<384x128xf32>
    %c0_37 = arith.constant 0 : index
    %c0_38 = arith.constant 0 : index
    %78 = vector.load %arg4[%c0_37, %c0_38] : memref<384x384xf32, #tpu.memory_space<vmem>>, vector<384x384xf32>
    %cst_39 = arith.constant dense<0.000000e+00> : vector<384x128xf32>
    %79 = tpu.matmul %78, %77, %cst_39 {dimension_numbers = #tpu.dot_dimension_numbers<[1], [0], [0], [1], [0, 0, 1, 1], [], []>} : vector<384x384xf32>, vector<384x128xf32>, vector<384x128xf32> -> vector<384x128xf32>
    %c0_40 = arith.constant 0 : index
    %c0_41 = arith.constant 0 : index
    %80 = vector.load %arg5[%c0_40, %c0_41] : memref<384x1xf32, #tpu.memory_space<vmem>>, vector<384x1xf32>
    %81 = vector.broadcast %80 : vector<384x1xf32> to vector<384x128xf32>
    %82 = arith.addf %79, %81 : vector<384x128xf32>
    %cst_42 = arith.constant 0.000000e+00 : f32
    %83 = vector.broadcast %cst_42 : f32 to vector<384x128xf32>
    %84 = arith.maximumf %82, %83 : vector<384x128xf32>
    %c0_43 = arith.constant 0 : index
    %c0_44 = arith.constant 0 : index
    %85 = vector.load %arg6[%c0_43, %c0_44] : memref<384x384xf32, #tpu.memory_space<vmem>>, vector<384x384xf32>
    %cst_45 = arith.constant dense<0.000000e+00> : vector<384x128xf32>
    %86 = tpu.matmul %85, %84, %cst_45 {dimension_numbers = #tpu.dot_dimension_numbers<[1], [0], [0], [1], [0, 0, 1, 1], [], []>} : vector<384x384xf32>, vector<384x128xf32>, vector<384x128xf32> -> vector<384x128xf32>
    %c0_46 = arith.constant 0 : index
    %c0_47 = arith.constant 0 : index
    %87 = vector.load %arg7[%c0_46, %c0_47] : memref<384x1xf32, #tpu.memory_space<vmem>>, vector<384x1xf32>
    %88 = vector.broadcast %87 : vector<384x1xf32> to vector<384x128xf32>
    %89 = arith.addf %86, %88 : vector<384x128xf32>
    %cst_48 = arith.constant 0.000000e+00 : f32
    %90 = vector.broadcast %cst_48 : f32 to vector<384x128xf32>
    %91 = arith.maximumf %89, %90 : vector<384x128xf32>
    %c0_49 = arith.constant 0 : index
    %c0_50 = arith.constant 0 : index
    %92 = vector.load %arg11[%c0_49, %c0_50] : memref<64x1xf32, #tpu.memory_space<vmem>>, vector<64x1xf32>
    %93 = vector.broadcast %92 : vector<64x1xf32> to vector<64x128xf32>
    %94 = arith.mulf %70, %93 : vector<64x128xf32>
    %cst_51 = arith.constant dense<0.000000e+00> : vector<128xf32>
    %95 = vector.multi_reduction <add>, %94, %cst_51 [0] : vector<64x128xf32> to vector<128xf32>
    %96 = vector.shape_cast %95 : vector<128xf32> to vector<1x128xf32>
    %c0_52 = arith.constant 0 : index
    %c0_53 = arith.constant 0 : index
    %97 = vector.load %arg12[%c0_52, %c0_53] : memref<384x1xf32, #tpu.memory_space<vmem>>, vector<384x1xf32>
    %98 = vector.broadcast %97 : vector<384x1xf32> to vector<384x128xf32>
    %99 = arith.mulf %91, %98 : vector<384x128xf32>
    %cst_54 = arith.constant dense<0.000000e+00> : vector<128xf32>
    %100 = vector.multi_reduction <add>, %99, %cst_54 [0] : vector<384x128xf32> to vector<128xf32>
    %101 = vector.shape_cast %100 : vector<128xf32> to vector<1x128xf32>
    %102 = arith.addf %96, %101 : vector<1x128xf32>
    %c0_55 = arith.constant 0 : index
    %c0_56 = arith.constant 0 : index
    %103 = vector.load %arg13[%c0_55, %c0_56] : memref<1x1xf32, #tpu.memory_space<vmem>>, vector<1x1xf32>
    %104 = vector.broadcast %103 : vector<1x1xf32> to vector<1x128xf32>
    %105 = arith.addf %102, %104 : vector<1x128xf32>
    %cst_57 = arith.constant 0.000000e+00 : f32
    %106 = vector.broadcast %cst_57 : f32 to vector<1x128xf32>
    %107 = arith.subf %106, %105 : vector<1x128xf32>
    %108 = math.exp %107 : vector<1x128xf32>
    %cst_58 = arith.constant 1.000000e+00 : f32
    %109 = vector.broadcast %cst_58 : f32 to vector<1x128xf32>
    %110 = arith.addf %109, %108 : vector<1x128xf32>
    %cst_59 = arith.constant 1.000000e+00 : f32
    %111 = vector.broadcast %cst_59 : f32 to vector<1x128xf32>
    %112 = arith.divf %111, %110 : vector<1x128xf32>
    %c0_60 = arith.constant 0 : index
    %c0_61 = arith.constant 0 : index
    %113 = vector.load %arg14[%c0_60, %c0_61] : memref<1x128xf32, #tpu.memory_space<vmem>>, vector<1x128xf32>
    tpu.vector_store %arg14[%c0_60, %c0_61], %112 {strides = array<i32>} : memref<1x128xf32, #tpu.memory_space<vmem>>, vector<1x128xf32>,
    return
  }
  func.func @transform_0(%arg0: i32) -> (i32, i32) {
    %c0_i32 = arith.constant 0 : i32
    %c0_i32_0 = arith.constant 0 : i32
    return %c0_i32, %arg0 : i32, i32
  }
  func.func @transform_1(%arg0: i32) -> (i32, i32) {
    %c0_i32 = arith.constant 0 : i32
    %c0_i32_0 = arith.constant 0 : i32
    %c0_i32_1 = arith.constant 0 : i32
    return %c0_i32, %c0_i32_0 : i32, i32
  }
  func.func @transform_2(%arg0: i32) -> (i32, i32) {
    %c0_i32 = arith.constant 0 : i32
    %c0_i32_0 = arith.constant 0 : i32
    %c0_i32_1 = arith.constant 0 : i32
    return %c0_i32, %c0_i32_0 : i32, i32
  }
  func.func @transform_3(%arg0: i32) -> (i32, i32) {
    %c0_i32 = arith.constant 0 : i32
    %c0_i32_0 = arith.constant 0 : i32
    %c0_i32_1 = arith.constant 0 : i32
    return %c0_i32, %c0_i32_0 : i32, i32
  }
  func.func @transform_4(%arg0: i32) -> (i32, i32) {
    %c0_i32 = arith.constant 0 : i32
    %c0_i32_0 = arith.constant 0 : i32
    %c0_i32_1 = arith.constant 0 : i32
    return %c0_i32, %c0_i32_0 : i32, i32
  }
  func.func @transform_5(%arg0: i32) -> (i32, i32) {
    %c0_i32 = arith.constant 0 : i32
    %c0_i32_0 = arith.constant 0 : i32
    %c0_i32_1 = arith.constant 0 : i32
    return %c0_i32, %c0_i32_0 : i32, i32
  }
  func.func @transform_6(%arg0: i32) -> (i32, i32) {
    %c0_i32 = arith.constant 0 : i32
    %c0_i32_0 = arith.constant 0 : i32
    %c0_i32_1 = arith.constant 0 : i32
    return %c0_i32, %c0_i32_0 : i32, i32
  }
  func.func @transform_7(%arg0: i32) -> (i32, i32) {
    %c0_i32 = arith.constant 0 : i32
    %c0_i32_0 = arith.constant 0 : i32
    %c0_i32_1 = arith.constant 0 : i32
    return %c0_i32, %c0_i32_0 : i32, i32
  }
  func.func @transform_8(%arg0: i32) -> (i32, i32) {
    %c0_i32 = arith.constant 0 : i32
    %c0_i32_0 = arith.constant 0 : i32
    %c0_i32_1 = arith.constant 0 : i32
    return %c0_i32, %c0_i32_0 : i32, i32
  }
  func.func @transform_9(%arg0: i32) -> (i32, i32) {
    %c0_i32 = arith.constant 0 : i32
    %c0_i32_0 = arith.constant 0 : i32
    %c0_i32_1 = arith.constant 0 : i32
    return %c0_i32, %c0_i32_0 : i32, i32
  }
  func.func @transform_10(%arg0: i32) -> (i32, i32) {
    %c0_i32 = arith.constant 0 : i32
    %c0_i32_0 = arith.constant 0 : i32
    %c0_i32_1 = arith.constant 0 : i32
    return %c0_i32, %c0_i32_0 : i32, i32
  }
  func.func @transform_11(%arg0: i32) -> (i32, i32) {
    %c0_i32 = arith.constant 0 : i32
    %c0_i32_0 = arith.constant 0 : i32
    %c0_i32_1 = arith.constant 0 : i32
    return %c0_i32, %c0_i32_0 : i32, i32
  }
  func.func @transform_12(%arg0: i32) -> (i32, i32) {
    %c0_i32 = arith.constant 0 : i32
    %c0_i32_0 = arith.constant 0 : i32
    %c0_i32_1 = arith.constant 0 : i32
    return %c0_i32, %c0_i32_0 : i32, i32
  }
  func.func @transform_13(%arg0: i32) -> (i32, i32) {
    %c0_i32 = arith.constant 0 : i32
    %c0_i32_0 = arith.constant 0 : i32
    return %c0_i32, %arg0 : i32, i32
  }
}

</mosaic_0001>

<bundles_post_ra>
// kernel: tpu_custom_call.1
= control target key start
LH: loop header
LB: loop body
LE: loop exit
PB: predicated region body
PF: predicated region fallthrough
CT: control target
= control target key end

     0   :  { %s9101_s0 = inlined_call_operand.hbm [shape: f32[64,256], index: 0, kind: input, shape index: {}]   ;;  %s9102_s1 = inlined_call_operand.vmem [shape: f32[384,64], index: 1, kind: input, shape index: {}]   ;;  %s9103_s2 = inlined_call_operand.vmem [shape: f32[384,1], index: 2, kind: input, shape index: {}]   ;;  %s9104_s3 = inlined_call_operand.vmem [shape: f32[384,384], index: 3, kind: input, shape index: {}]   ;;  %s9105_s4 = inlined_call_operand.vmem [shape: f32[384,1], index: 4, kind: input, shape index: {}]   ;;  %s9106_s5 = inlined_call_operand.vmem [shape: f32[384,384], index: 5, kind: input, shape index: {}]   ;;  %s9107_s6 = inlined_call_operand.vmem [shape: f32[384,1], index: 6, kind: input, shape index: {}]   ;;  %s9108_s7 = inlined_call_operand.vmem [shape: f32[64,5], index: 7, kind: input, shape index: {}]   ;;  %s9109_s8 = inlined_call_operand.vmem [shape: f32[1,5], index: 8, kind: input, shape index: {}]   ;;  %s9110_s9 = inlined_call_operand.vmem [shape: f32[64,5], index: 9, kind: input, shape index: {}]   ;;  %s9111_s10 = inlined_call_operand.vmem [shape: f32[64,1], index: 10, kind: input, shape index: {}]   ;;  %s9112_s11 = inlined_call_operand.vmem [shape: f32[384,1], index: 11, kind: input, shape index: {}]   ;;  %s9113_s12 = inlined_call_operand.<no memory space> [shape: f32[1,1], index: 12, kind: input, shape index: {}]   ;;  %s9114_s13 = inlined_call_operand.hbm [shape: f32[1,256], index: 13, kind: output, shape index: {}]  }
   0x1   :  { %v18_v0 = vstv %s9113_s12 }
   0x2   :  { %19 = vst [vmem:[#allocation2] sm:$0x1] %v18_v0 }
   0x3   :  { %20 = vsyncpa [#allocation4], 0 }
   0x4   :  { %22 = vsyncpa [#allocation4 + $0x1], 0 }
   0x5   :  { %23 = vsyncpa [#allocation5], 0 }
   0x6   :  { %25 = vsyncpa [#allocation5 + $0x1], 0  ;;  %s5694_s27 = smov 0   ;;  %s5696_s28 = smov 0  }
   0x7   :  { %s5698_s29 = smov 0   ;;  %s5700_s30 = smov 0  }
   0x8 LB: > { %9132 = sst [smem:[#allocation9_spill]] %s5604_s29  ;;  %s5715_s12 = sadd.s32 4294967295, %s5608_s30   ;;  %s5608_s30 = sphi %s5700_s30, %s9410_s30   ;;  %s5604_s29 = sphi %s5698_s29, %s9412_s29   ;;  %s5600_s28 = sphi %s5696_s28, %s9414_s28   ;;  %s5596_s27 = sphi %s5694_s27, %s9413_s27  }
   0x9   : > { %s4661_s14 = sadd.s32 4294967294, %s5608_s30   ;;  %s5719_s15 = sadd.s32 1, %s5608_s30  }
   0xa   : > { %9133 = sst [smem:[#allocation10_spill]] %s5719_s15  ;;  %s38_s16 = sadd.s32 1, %s5604_s29 }
   0xb   : > { %s35_s17 = ssub.s32 %s5608_s30, %s5719_s15  ;;  %p45_p0 = scmp.ne.s32.totalorder %s5604_s29, %s5600_s28 }
   0xc   : > { %p36_p1 = scmp.eq.s32.totalorder %s35_s17, 0  ;;  %p46_p2 = scmp.eq.s32.totalorder %s5608_s30, 0 }
   0xd   : > { %p51_p3 = scmp.ne.s32.totalorder %s5600_s28, %s5596_s27  ;;  %p52_p4 = scmp.eq.s32.totalorder %s5715_s12, 0 }
   0xe   : > { %s5731_s18 = scalar_select %p36_p1, %s5604_s29, %s38_s16  }
   0xf   : > { %p5733_p5 = por %p46_p2, %p45_p0  ;;  %p5737_p6 = por %p52_p4, %p51_p3 }
  0x10   : > { %9134 = sst [smem:[#allocation11_spill]] %s5731_s18  ;;  %p327_p7 = scmp.eq.s32.totalorder %s5715_s12, 1 }
  0x11   : > { %p333_p8 = scmp.eq.s32.totalorder %s4661_s14, 1  ;;  %p5411_p10 = scmp.lt.s32.totalorder %s5608_s30, 2 }
  0x12   : > { %p5744_p11 = por %p327_p7, %p45_p0  ;;  %s389_s23 = sand.u32 1, %s5604_s29  }
  0x13   : > { %p5748_p12 = por %p333_p8, %p51_p3  ;;  %s4665_s24 = sshll.u32 %s5608_s30, 7 }
  0x14   : > { %s9137_s21 = scalar_select %p5744_p11, 1, 0 }
  0x15   : > { %s9138_s22 = scalar_select %p5748_p12, 1, 0 }
  0x16   : > { %s4664_s25 = sshll.u32 %s389_s23, 6  ;;  %s5757_s17 = scalar_lea.hbm %s9101_s0, %s4665_s24 }
  0x17   : > { %s393_s14 = scalar_lea.vmem [#allocation3], %s4664_s25  ;;  %p5761_p13 = pnand %p5411_p10, %p5733_p5 }
  0x18   : > { %s399_s18 = sshll.u32 %s393_s14, 4  ;;  %s5768_s29 = scalar_lea.sflag [#allocation4], %s389_s23  ;;  %s5765_s18 = int_to_ptr.vmem [resolvable:$true] %s399_s18 }
  0x19   : > { %s5512_s24 = scalar_lea.hbm %s5757_s17, 1024  ;;  %p5514_p2 = pneg %p5761_p13 }
  0x1a   : > { %p5513_p1 = scmp.ne.s32.totalorder %s5757_s17, %s5512_s24  ;;  %s5517_s26 = scalar_lea.hbm %s9101_s0, 2048 }
  0x1b   : > { %p5518_p5 = scmp.lt.u32.totalorder %s5757_s17, %s9101_s0  ;;  %p5519_p7 = scmp.lt.u32.totalorder %s5517_s26, %s5512_s24 }
  0x1c   : > { %p5515_p3 = pnand %p5514_p2, %p5513_p1  ;;  %p5521_p10 = scmp.lt.u32.totalorder %s5512_s24, %s5757_s17 }
  0x1d   : > { %p5520_p8 = por %p5519_p7, %p5518_p5 }
  0x1e   : > { %p5516_p4 = pneg %p5515_p3 }
  0x1f   : > { %p5522_p9 = por %p5521_p10, %p5520_p8 }
  0x21   : > { %p5523_p0 = pnand %p5522_p9, %p5516_p4 }
  0x23   : > { %5526 = shalt.err (!%p5523_p0)
}
  0x24   : > { %s5527_s23 = scalar_lea.vmem %s5765_s18, 1024  ;;  %s5610_s19 = smov [#allocation3]  }
  0x25   : > { %p5528_p1 = scmp.ne.s32.totalorder %s5765_s18, %s5527_s23  ;;  %s5532_s25 = sshll.u32 %s5610_s19, 4  ;;  %s5533_s25 = int_to_ptr.vmem [resolvable:$false] %s5532_s25 }
  0x26   : > { %s5534_s16 = scalar_lea.vmem %s5533_s25, 2048  ;;  %p5535_p11 = scmp.lt.s32.totalorder %s5765_s18, %s5533_s25 }
  0x27   : > { %p5530_p3 = pnand %p5528_p1, %p5514_p2  ;;  %p5536_p5 = scmp.lt.s32.totalorder %s5534_s16, %s5527_s23 }
  0x29   : > { %p5531_p12 = pneg %p5530_p3  ;;  %p5537_p7 = por %p5536_p5, %p5535_p11 }
  0x2b   : > { %p5538_p8 = pnand %p5537_p7, %p5531_p12 }
  0x2d   : > { %5541 = shalt.err (!%p5538_p8)
}
  0x2e   : > { %s5611_s24 = smov 256   ;;  %s5612_s26 = smov 128  }
  0x2f   : > { %s5613_s14 = smov 8   ;;  %p407_p9 = scmp.lt.s32.totalorder %s5608_s30, 3 }
  0x30   : > { %5406 = dma.hbm_to_vmem [thread:$0]  (!%p5761_p13), %s5757_s17, 1024, %s5765_s18, %s5768_s29, %s5611_s24, %s5612_s26, %s5613_s14  }
  0x31   : > { %p9140_p0 = scmp.ge.s32.totalorder %s5608_s30, 1 }
  0x33   : > { %p408_p2 = pnand %p9140_p0, %p407_p9 }
  0x35   : > { %411 = sbr.rel (%p408_p2) target bundleno = 1278 (0x4fe), region = 72 }
  0x3c   : > { %s5800_s23 = sand.u32 1, %s5600_s28  }
  0x3d   : > { %s4667_s19 = sshll.u32 %s5800_s23, 6  ;;  %s414_s25 = scalar_lea.sflag [#allocation4], %s5800_s23 }
  0x3e   : > { %s5804_s16 = scalar_lea.vmem [#allocation3], %s4667_s19 }
  0x3f   : > { %5587 = dma.done.wait (%p5737_p6), %s414_s25, 1024  }
  0x40   : > { %5589 = vsyncadd (%p5737_p6), %s414_s25, 4294966272  ;;  %v9121_v1 = vmov 0   ;;  %v5815_v2 = vld [vmem:[%s9108_s7 + $0x10] sm:$0xff]  ;;  %v5820_v3 = vld [vmem:[%s9108_s7] sm:$0xff]  ;;  %vm1427_vm0 = vcmask 523264   ;;  %v5615_v51 = vmov 1  }
  0x41   : > { %5455 = vset.pattern.permute.xlu1 %v9121_v1  ;;  %5454 = vset.pattern.permute.xlu0 %v9121_v1  ;;  %v459_v4 = vld [vmem:[%s5804_s16] sm:$0xff]  ;;  %v460_v5 = vld [vmem:[%s5804_s16 + $0x8] sm:$0xff]  ;;  %v461_v7 = vld [vmem:[%s5804_s16 + $0x10] sm:$0xff]  ;;  %s458_s29 = scalar_lea.vmem [#allocation6], %s5800_s23  ;;  %s4583_s24 = scalar_lea.sflag [#allocation5], %s5800_s23 }
  0x42   : > { %487 = vperm.xlu1 %5455, %v5815_v2   ;;  %477 = vperm.xlu0 %5454, %v5820_v3   ;;  %v5199_v6 = vpack.c.bf16 %v460_v5, %v459_v4  ;;  %v462_v8 = vld [vmem:[%s5804_s16 + $0x18] sm:$0xff]  ;;  %v5836_v10 = vld [vmem:[%s9108_s7 + $0x8] sm:$0xff]  ;;  %v465_v19 = vld [vmem:[%s5804_s16 + $0x30] sm:$0xff]  ;;  %s4595_s15 = sshll.u32 %s458_s29, 4  ;;  %p9407_p11 = scmp.ne.s32.totalorder %s9137_s21, 0  ;;  %s9059_s15 = int_to_ptr.vmem [resolvable:$true] %s4595_s15 }
  0x43   : > { %v5831_v9 = vld [vmem:[%s9108_s7 + $0x18] sm:$0xff]  ;;  %v5203_v11 = vpack.c.bf16 %v462_v8, %v461_v7  ;;  %v463_v12 = vld [vmem:[%s5804_s16 + $0x20] sm:$0xff]  ;;  %v464_v13 = vld [vmem:[%s5804_s16 + $0x28] sm:$0xff]  ;;  %s5542_s26 = scalar_lea.vmem %s9059_s15, 16 }
  0x44   : > { %5200 = vmatprep.subr.bf16.mxu0 %v5199_v6  ;;  %5375 = vmatprep.subr.bf16.mxu1 %v5199_v6  ;;  %v1091_v14 = vld [vmem:[%s9102_s1] sm:$0xff]  ;;  %v5851_v16 = vld [vmem:[%s9108_s7 + $0x28] sm:$0xff]  ;;  %v5207_v18 = vpack.c.bf16 %v464_v13, %v463_v12  ;;  %v5867_v21 = vld [vmem:[%s9108_s7 + $0x38] sm:$0xff]  ;;  %p5543_p6 = scmp.ne.s32.totalorder %s9059_s15, %s5542_s26 }
  0x45   : > { %5202 = vmatpush3.bf16.msra.mxu0 %v5199_v6  ;;  %5379 = vmatpush3.bf16.msra.mxu1 %v5199_v6  ;;  %v1107_v15 = vld [vmem:[%s9102_s1 + $0x80] sm:$0xff]  ;;  %v5872_v22 = vld [vmem:[%s9108_s7 + $0x30] sm:$0xff]  ;;  %v1092_v26 = vld [vmem:[%s9102_s1 + $0x8] sm:$0xff] }
  0x46   : > { %492 = vperm.xlu1 %5455, %v5831_v9   ;;  %482 = vperm.xlu0 %5454, %v5836_v10   ;;  %v5856_v17 = vld [vmem:[%s9108_s7 + $0x20] sm:$0xff]  ;;  %v1108_v27 = vld [vmem:[%s9102_s1 + $0x88] sm:$0xff]  ;;  %v1093_v28 = vld [vmem:[%s9102_s1 + $0x10] sm:$0xff]  ;;  %p5544_p12 = pnand %p5543_p6, %p9407_p11 }
  0x47   : > { %5204 = vmatprep.subr.bf16.mxu0 %v5203_v11  ;;  %5376 = vmatprep.subr.bf16.mxu1 %v5203_v11  ;;  %v466_v20 = vld [vmem:[%s5804_s16 + $0x38] sm:$0xff]  ;;  %v1109_v29 = vld [vmem:[%s9102_s1 + $0x90] sm:$0xff]  ;;  %v5908_v31 = vld [vmem:[%s9110_s9 + $0x8] sm:$0xff] }
  0x48   : > { %4919 = vmatprep.mubr.msk.f32.mxu0 %vm1427_vm0, %v1091_v14  ;;  %4943 = vmatprep.mubr.msk.f32.mxu1 %vm1427_vm0, %v1107_v15  ;;  %v5211_v23 = vpack.c.bf16 %v466_v20, %v465_v19  ;;  %v5879_v24 = vld [vmem:[%s9110_s9] sm:$0xff]  ;;  %v5903_v30 = vld [vmem:[%s9110_s9 + $0x10] sm:$0xff]  ;;  %v1094_v32 = vld [vmem:[%s9102_s1 + $0x18] sm:$0xff]  ;;  %p5545_p13 = pneg %p5544_p12 }
  0x49   : > { %5206 = vmatpush3.bf16.msra.mxu0 %v5203_v11  ;;  %5380 = vmatpush3.bf16.msra.mxu1 %v5203_v11  ;;  %v5884_v25 = vld [vmem:[%s9109_s8] sm:$0x1]  ;;  %v1110_v33 = vld [vmem:[%s9102_s1 + $0x98] sm:$0xff]  ;;  %v1096_v38 = vld [vmem:[%s9102_s1 + $0x28] sm:$0xff] }
  0x4a   : > { %502 = vperm.xlu1 %5455, %v5851_v16   ;;  %497 = vperm.xlu0 %5454, %v5856_v17   ;;  %v1095_v34 = vld [vmem:[%s9102_s1 + $0x20] sm:$0xff]  ;;  %v5936_v37 = vld [vmem:[%s9110_s9 + $0x18] sm:$0xff]  ;;  %v1112_v39 = vld [vmem:[%s9102_s1 + $0xa8] sm:$0xff] }
  0x4b   : > { %5208 = vmatprep.subr.bf16.mxu0 %v5207_v18  ;;  %5377 = vmatprep.subr.bf16.mxu1 %v5207_v18  ;;  %v1111_v35 = vld [vmem:[%s9102_s1 + $0xa0] sm:$0xff]  ;;  %v1097_v40 = vld [vmem:[%s9102_s1 + $0x30] sm:$0xff]  ;;  %v5964_v43 = vld [vmem:[%s9110_s9 + $0x28] sm:$0xff] }
  0x4c   : > { %v5931_v36 = vld [vmem:[%s9110_s9 + $0x20] sm:$0xff]  ;;  %v1113_v41 = vld [vmem:[%s9102_s1 + $0xb0] sm:$0xff]  ;;  %v1098_v44 = vld [vmem:[%s9102_s1 + $0x38] sm:$0xff] }
  0x4d   : > { %5210 = vmatpush3.bf16.msra.mxu0 %v5207_v18  ;;  %5381 = vmatpush3.bf16.msra.mxu1 %v5207_v18  ;;  %v5959_v42 = vld [vmem:[%s9110_s9 + $0x30] sm:$0xff]  ;;  %v1114_v45 = vld [vmem:[%s9102_s1 + $0xb8] sm:$0xff]  ;;  %v1099_v46 = vld [vmem:[%s9102_s1 + $0x40] sm:$0xff] }
  0x4e   : > { %512 = vperm.xlu1 %5455, %v5867_v21   ;;  %507 = vperm.xlu0 %5454, %v5872_v22   ;;  %v1115_v47 = vld [vmem:[%s9102_s1 + $0xc0] sm:$0xff]  ;;  %v5987_v48 = vld [vmem:[%s9110_s9 + $0x38] sm:$0xff]  ;;  %v1100_v49 = vld [vmem:[%s9102_s1 + $0x48] sm:$0xff] }
  0x4f   : > { %5212 = vmatprep.subr.bf16.mxu0 %v5211_v23  ;;  %5378 = vmatprep.subr.bf16.mxu1 %v5211_v23  ;;  %v1116_v50 = vld [vmem:[%s9102_s1 + $0xc8] sm:$0xff]  ;;  %v1101_v52 = vld [vmem:[%s9102_s1 + $0x50] sm:$0xff]  ;;  %v1102_v55 = vld [vmem:[%s9102_s1 + $0x58] sm:$0xff] }
  0x50   : > { %v1117_v53 = vld [vmem:[%s9102_s1 + $0xd0] sm:$0xff]  ;;  %v1140_v54 = vld [vmem:[%s9103_s2 + $0x8] sm:$0xff]  ;;  %v1118_v56 = vld [vmem:[%s9102_s1 + $0xd8] sm:$0xff] }
  0x51   : > { %5214 = vmatpush3.bf16.msra.mxu0 %v5211_v23  ;;  %5382 = vmatpush3.bf16.msra.mxu1 %v5211_v23  ;;  %v1103_v57 = vld [vmem:[%s9102_s1 + $0x60] sm:$0xff]  ;;  %v1104_v60 = vld [vmem:[%s9102_s1 + $0x68] sm:$0xff]  ;;  %v1105_v62 = vld [vmem:[%s9102_s1 + $0x70] sm:$0xff] }
  0x52   : > { %565 = vperm.xlu1 %5455, %v5879_v24   ;;  %539 = vperm.xlu0 %5454, %v5884_v25   ;;  %v1119_v58 = vld [vmem:[%s9102_s1 + $0xe0] sm:$0xff]  ;;  %v1120_v61 = vld [vmem:[%s9102_s1 + $0xe8] sm:$0xff]  ;;  %v1121_v63 = vld [vmem:[%s9102_s1 + $0xf0] sm:$0xff] }
  0x53   : > { %v1143_v59 = vld [vmem:[%s9103_s2 + $0x20] sm:$0xff]  ;;  %v1145_v0 = vld [vmem:[%s9103_s2 + $0x30] sm:$0xff]  ;;  %v1106_v4 = vld [vmem:[%s9102_s1 + $0x78] sm:$0xff] }
  0x54   : > { %4920 = vmatmul.mubr.msk.f32.vlgmr.msra.gmra.mrb[0].mxu0 %vm1427_vm0, %v1092_v26  ;;  %4944 = vmatmul.mubr.msk.f32.vlgmr.msra.gmra.mrb[0].mxu1 %vm1427_vm0, %v1108_v27  ;;  %v1122_v5 = vld [vmem:[%s9102_s1 + $0xf8] sm:$0xff]  ;;  %v1123_v6 = vld [vmem:[%s9102_s1 + $0x100] sm:$0xff]  ;;  %v1124_v8 = vld [vmem:[%s9102_s1 + $0x108] sm:$0xff] }
  0x55   : > { %4922 = vmatprep.mubr.msk.f32.mxu0 %vm1427_vm0, %v1093_v28  ;;  %4946 = vmatprep.mubr.msk.f32.mxu1 %vm1427_vm0, %v1109_v29  ;;  %v1147_v7 = vld [vmem:[%s9103_s2 + $0x40] sm:$0xff]  ;;  %v1125_v11 = vld [vmem:[%s9102_s1 + $0x110] sm:$0xff]  ;;  %v1126_v13 = vld [vmem:[%s9102_s1 + $0x118] sm:$0xff] }
  0x56   : > { %575 = vperm.xlu1 %5455, %v5903_v30   ;;  %570 = vperm.xlu0 %5454, %v5908_v31   ;;  %v1149_v12 = vld [vmem:[%s9103_s2 + $0x50] sm:$0xff]  ;;  %v1127_v14 = vld [vmem:[%s9102_s1 + $0x120] sm:$0xff]  ;;  %v1128_v19 = vld [vmem:[%s9102_s1 + $0x128] sm:$0xff] }
  0x57   : > { %v1151_v15 = vld [vmem:[%s9103_s2 + $0x60] sm:$0xff]  ;;  %v1129_v20 = vld [vmem:[%s9102_s1 + $0x130] sm:$0xff]  ;;  %v1130_v27 = vld [vmem:[%s9102_s1 + $0x138] sm:$0xff] }
  0x58   : > { %4923 = vmatmul.mubr.msk.f32.gmra.mrb[2].mxu0 %vm1427_vm0, %v1094_v32  ;;  %4947 = vmatmul.mubr.msk.f32.gmra.mrb[2].mxu1 %vm1427_vm0, %v1110_v33  ;;  %v1139_v18 = vld [vmem:[%s9103_s2] sm:$0xff]  ;;  %v1153_v23 = vld [vmem:[%s9103_s2 + $0x70] sm:$0xff]  ;;  %v1142_v32 = vld [vmem:[%s9103_s2 + $0x18] sm:$0xff] }
  0x59   : > { %4925 = vmatprep.mubr.msk.f32.mxu0 %vm1427_vm0, %v1095_v34  ;;  %4949 = vmatprep.mubr.msk.f32.mxu1 %vm1427_vm0, %v1111_v35  ;;  %v1141_v26 = vld [vmem:[%s9103_s2 + $0x10] sm:$0xff]  ;;  %v1131_v28 = vld [vmem:[%s9102_s1 + $0x140] sm:$0xff]  ;;  %v1132_v33 = vld [vmem:[%s9102_s1 + $0x148] sm:$0xff] }
  0x5a   : > { %585 = vperm.xlu1 %5455, %v5931_v36   ;;  %580 = vperm.xlu0 %5454, %v5936_v37   ;;  %v1155_v29 = vld [vmem:[%s9103_s2 + $0x80] sm:$0xff]  ;;  %v1133_v34 = vld [vmem:[%s9102_s1 + $0x150] sm:$0xff] }
  0x5b   : > { %v1157_v35 = vld [vmem:[%s9103_s2 + $0x90] sm:$0xff] }
  0x5c   : > { %4926 = vmatmul.mubr.msk.f32.gmra.mrb[4].mxu0 %vm1427_vm0, %v1096_v38  ;;  %4950 = vmatmul.mubr.msk.f32.gmra.mrb[4].mxu1 %vm1427_vm0, %v1112_v39  ;;  %v1144_v38 = vld [vmem:[%s9103_s2 + $0x28] sm:$0xff]  ;;  %v1134_v39 = vld [vmem:[%s9102_s1 + $0x158] sm:$0xff] }
  0x5d   : > { %4928 = vmatprep.mubr.msk.f32.mxu0 %vm1427_vm0, %v1097_v40  ;;  %4952 = vmatprep.mubr.msk.f32.mxu1 %vm1427_vm0, %v1113_v41  ;;  %v1135_v40 = vld [vmem:[%s9102_s1 + $0x160] sm:$0xff] }
  0x5e   : > { %595 = vperm.xlu1 %5455, %v5959_v42   ;;  %590 = vperm.xlu0 %5454, %v5964_v43   ;;  %v1159_v41 = vld [vmem:[%s9103_s2 + $0xa0] sm:$0xff] }
  0x60   : > { %4929 = vmatmul.mubr.msk.f32.gmra.mrb[6].mxu0 %vm1427_vm0, %v1098_v44  ;;  %4953 = vmatmul.mubr.msk.f32.gmra.mrb[6].mxu1 %vm1427_vm0, %v1114_v45  ;;  %v1146_v44 = vld [vmem:[%s9103_s2 + $0x38] sm:$0xff]  ;;  %v1136_v45 = vld [vmem:[%s9102_s1 + $0x168] sm:$0xff] }
  0x61   : > { %4931 = vmatprep.mubr.msk.f32.mxu0 %vm1427_vm0, %v1099_v46  ;;  %4955 = vmatprep.mubr.msk.f32.mxu1 %vm1427_vm0, %v1115_v47  ;;  %v1137_v46 = vld [vmem:[%s9102_s1 + $0x170] sm:$0xff] }
  0x62   : > { %5456 = vset.pattern.permute.xlu1 %v5615_v51  ;;  %600 = vperm.xlu0 %5454, %v5987_v48   ;;  %v1161_v47 = vld [vmem:[%s9103_s2 + $0xb0] sm:$0xff] }
  0x63   : > { %620 = vperm.xlu1 %5456, %v5820_v3  }
  0x64   : > { %4932 = vmatmul.mubr.msk.f32.gmra.mrb[8].mxu0 %vm1427_vm0, %v1100_v49  ;;  %4956 = vmatmul.mubr.msk.f32.gmra.mrb[8].mxu1 %vm1427_vm0, %v1116_v50  ;;  %v1148_v49 = vld [vmem:[%s9103_s2 + $0x48] sm:$0xff]  ;;  %v1138_v50 = vld [vmem:[%s9102_s1 + $0x178] sm:$0xff] }
  0x65   : > { %4934 = vmatprep.mubr.msk.f32.mxu0 %vm1427_vm0, %v1101_v52  ;;  %4958 = vmatprep.mubr.msk.f32.mxu1 %vm1427_vm0, %v1117_v53  ;;  %v1163_v52 = vld [vmem:[%s9103_s2 + $0xc0] sm:$0xff]  ;;  %v1150_v53 = vld [vmem:[%s9103_s2 + $0x58] sm:$0xff] }
  0x66   : > { %1194 = vperm.xlu0 %5454, %v1140_v54   ;;  %v1165_v54 = vld [vmem:[%s9103_s2 + $0xd0] sm:$0xff] }
  0x67   : > { %628 = vperm.xlu1 %5456, %v5815_v2  }
  0x68   : > { %4935 = vmatmul.mubr.msk.f32.gmra.mrb[10].mxu0 %vm1427_vm0, %v1102_v55  ;;  %4959 = vmatmul.mubr.msk.f32.gmra.mrb[10].mxu1 %vm1427_vm0, %v1118_v56  ;;  %v1152_v55 = vld [vmem:[%s9103_s2 + $0x68] sm:$0xff]  ;;  %v1167_v56 = vld [vmem:[%s9103_s2 + $0xe0] sm:$0xff] }
  0x69   : > { %4937 = vmatprep.mubr.msk.f32.mxu0 %vm1427_vm0, %v1103_v57  ;;  %4961 = vmatprep.mubr.msk.f32.mxu1 %vm1427_vm0, %v1119_v58  ;;  %v1154_v57 = vld [vmem:[%s9103_s2 + $0x78] sm:$0xff]  ;;  %v1169_v58 = vld [vmem:[%s9103_s2 + $0xf0] sm:$0xff] }
  0x6a   : > { %1209 = vperm.xlu0 %5454, %v1143_v59   ;;  %v1156_v59 = vld [vmem:[%s9103_s2 + $0x88] sm:$0xff] }
  0x6b   : > { %632 = vperm.xlu1 %5456, %v5831_v9  }
  0x6c   : > { %4938 = vmatmul.mubr.msk.f32.gmra.mrb[12].mxu0 %vm1427_vm0, %v1104_v60  ;;  %4962 = vmatmul.mubr.msk.f32.gmra.mrb[12].mxu1 %vm1427_vm0, %v1120_v61  ;;  %v1171_v60 = vld [vmem:[%s9103_s2 + $0x100] sm:$0xff]  ;;  %v1158_v61 = vld [vmem:[%s9103_s2 + $0x98] sm:$0xff] }
  0x6d   : > { %4940 = vmatprep.mubr.msk.f32.mxu0 %vm1427_vm0, %v1105_v62  ;;  %4964 = vmatprep.mubr.msk.f32.mxu1 %vm1427_vm0, %v1121_v63  ;;  %v1173_v62 = vld [vmem:[%s9103_s2 + $0x110] sm:$0xff]  ;;  %v1160_v63 = vld [vmem:[%s9103_s2 + $0xa8] sm:$0xff] }
  0x6e   : > { %1219 = vperm.xlu0 %5454, %v1145_v0   ;;  %v1175_v0 = vld [vmem:[%s9103_s2 + $0x120] sm:$0xff] }
  0x6f   : > { %640 = vperm.xlu1 %5456, %v5851_v16  }
  0x70   : > { %4941 = vmatmul.mubr.msk.f32.gmra.mrb[14].mxu0 %vm1427_vm0, %v1106_v4  ;;  %4965 = vmatmul.mubr.msk.f32.gmra.mrb[14].mxu1 %vm1427_vm0, %v1122_v5  ;;  %v1162_v4 = vld [vmem:[%s9103_s2 + $0xb8] sm:$0xff]  ;;  %v1177_v5 = vld [vmem:[%s9103_s2 + $0x130] sm:$0xff] }
  0x71   : > { %4967 = vmatprep.mubr.msk.f32.mxu1 %vm1427_vm0, %v1123_v6  ;;  %v1164_v6 = vld [vmem:[%s9103_s2 + $0xc8] sm:$0xff] }
  0x72   : > { %1229 = vperm.xlu0 %5454, %v1147_v7   ;;  %v1179_v7 = vld [vmem:[%s9103_s2 + $0x140] sm:$0xff] }
  0x73   : > { %648 = vperm.xlu1 %5456, %v5867_v21  }
  0x74   : > { %4968 = vmatmul.mubr.msk.f32.gmra.mrb[16].mxu1 %vm1427_vm0, %v1124_v8  ;;  %v9123_v8 = vmov 0.0|0.0  }
  0x75   : > { %4970 = vmatprep.mubr.msk.f32.mxu1 %vm1427_vm0, %v1125_v11  ;;  %5215 = vmatprep.subr.bf16.mxu1 %v9123_v8  ;;  %v1166_v11 = vld [vmem:[%s9103_s2 + $0xd8] sm:$0xff] }
  0x76   : > { %1239 = vperm.xlu0 %5454, %v1149_v12   ;;  %v1181_v12 = vld [vmem:[%s9103_s2 + $0x150] sm:$0xff] }
  0x77   : > { %690 = vperm.xlu1 %5456, %v5879_v24  }
  0x78   : > { %4971 = vmatmul.mubr.msk.f32.gmra.mrb[18].mxu1 %vm1427_vm0, %v1126_v13  ;;  %v1168_v13 = vld [vmem:[%s9103_s2 + $0xe8] sm:$0xff] }
  0x79   : > { %4973 = vmatprep.mubr.msk.f32.mxu1 %vm1427_vm0, %v1127_v14  ;;  %v1183_v14 = vld [vmem:[%s9103_s2 + $0x160] sm:$0xff] }
  0x7a   : > { %1249 = vperm.xlu0 %5454, %v1151_v15   ;;  %v1170_v15 = vld [vmem:[%s9103_s2 + $0xf8] sm:$0xff] }
  0x7b   : > { %5457 = vset.pattern.permute.xlu1 %v9121_v1 }
  0x7c   : > { %1189 = vperm.xlu1 %5457, %v1139_v18   ;;  %4974 = vmatmul.mubr.msk.f32.gmra.mrb[20].mxu1 %vm1427_vm0, %v1128_v19  ;;  %v1185_v18 = vld [vmem:[%s9103_s2 + $0x170] sm:$0xff]  ;;  %v1172_v19 = vld [vmem:[%s9103_s2 + $0x108] sm:$0xff] }
  0x7d   : > { %4976 = vmatprep.mubr.msk.f32.mxu1 %vm1427_vm0, %v1129_v20 }
  0x7e   : > { %1259 = vperm.xlu0 %5454, %v1153_v23  }
  0x80   : > { %1199 = vperm.xlu1 %5457, %v1141_v26   ;;  %4977 = vmatmul.mubr.msk.f32.gmra.mrb[22].mxu1 %vm1427_vm0, %v1130_v27  ;;  %v1174_v26 = vld [vmem:[%s9103_s2 + $0x118] sm:$0xff] }
  0x81   : > { %4979 = vmatprep.mubr.msk.f32.mxu1 %vm1427_vm0, %v1131_v28 }
  0x82   : > { %1269 = vperm.xlu0 %5454, %v1155_v29   ;;  %v1176_v29 = vld [vmem:[%s9103_s2 + $0x128] sm:$0xff] }
  0x84   : > { %1204 = vperm.xlu1 %5457, %v1142_v32   ;;  %4980 = vmatmul.mubr.msk.f32.gmra.mrb[24].mxu1 %vm1427_vm0, %v1132_v33 }
  0x85   : > { %4982 = vmatprep.mubr.msk.f32.mxu1 %vm1427_vm0, %v1133_v34  ;;  %v1178_v34 = vld [vmem:[%s9103_s2 + $0x138] sm:$0xff] }
  0x86   : > { %1279 = vperm.xlu0 %5454, %v1157_v35  }
  0x88   : > { %1214 = vperm.xlu1 %5457, %v1144_v38   ;;  %4983 = vmatmul.mubr.msk.f32.gmra.mrb[26].mxu1 %vm1427_vm0, %v1134_v39  ;;  %v1180_v39 = vld [vmem:[%s9103_s2 + $0x148] sm:$0xff] }
  0x89   : > { %4985 = vmatprep.mubr.msk.f32.mxu1 %vm1427_vm0, %v1135_v40 }
  0x8a   : > { %1289 = vperm.xlu0 %5454, %v1159_v41  }
  0x8c   : > { %1224 = vperm.xlu1 %5457, %v1146_v44   ;;  %4986 = vmatmul.mubr.msk.f32.gmra.mrb[28].mxu1 %vm1427_vm0, %v1136_v45  ;;  %v1182_v44 = vld [vmem:[%s9103_s2 + $0x158] sm:$0xff] }
  0x8d   : > { %4988 = vmatprep.mubr.msk.f32.mxu1 %vm1427_vm0, %v1137_v46 }
  0x8e   : > { %1299 = vperm.xlu0 %5454, %v1161_v47   ;;  %v1184_v47 = vld [vmem:[%s9103_s2 + $0x168] sm:$0xff] }
  0x90   : > { %1234 = vperm.xlu1 %5457, %v1148_v49   ;;  %4989 = vmatmul.mubr.msk.f32.gmra.mrb[30].mxu1 %vm1427_vm0, %v1138_v50 }
  0x92   : > { %1309 = vperm.xlu0 %5454, %v1163_v52   ;;  %v1186_v52 = vld [vmem:[%s9103_s2 + $0x178] sm:$0xff] }
  0x94   : > { %1244 = vperm.xlu1 %5457, %v1150_v53  }
  0x96   : > { %1319 = vperm.xlu0 %5454, %v1165_v54  }
  0x98   : > { %1254 = vperm.xlu1 %5457, %v1152_v55  }
  0x9a   : > { %1329 = vperm.xlu0 %5454, %v1167_v56  }
  0x9c   : > { %1264 = vperm.xlu1 %5457, %v1154_v57   ;;  %v5617_v57 = vmov 2  }
  0x9e   : > { %1339 = vperm.xlu0 %5454, %v1169_v58  }
  0xa0   : > { %1274 = vperm.xlu1 %5457, %v1156_v59  }
  0xa2   : > { %1349 = vperm.xlu0 %5454, %v1171_v60  }
  0xa4   : > { %1284 = vperm.xlu1 %5457, %v1158_v61  }
  0xa6   : > { %1359 = vperm.xlu0 %5454, %v1173_v62   ;;  %v1927_v62 = vld [vmem:[%s9104_s3 + $0x10] sm:$0xff] }
  0xa7   : > { %5023 = vmatprep.mubr.f32.mxu0 %v1927_v62 }
  0xa8   : > { %1294 = vperm.xlu1 %5457, %v1160_v63  }
  0xaa   : > { %1369 = vperm.xlu0 %5454, %v1175_v0  }
  0xac   : > { %1304 = vperm.xlu1 %5457, %v1162_v4  }
  0xae   : > { %1379 = vperm.xlu0 %5454, %v1177_v5  }
  0xb0   : > { %1314 = vperm.xlu1 %5457, %v1164_v6  }
  0xb2   : > { %1389 = vperm.xlu0 %5454, %v1179_v7  }
  0xb4   : > { %1324 = vperm.xlu1 %5457, %v1166_v11  }
  0xb6   : > { %1399 = vperm.xlu0 %5454, %v1181_v12  }
  0xb8   : > { %1334 = vperm.xlu1 %5457, %v1168_v13  }
  0xba   : > { %1409 = vperm.xlu0 %5454, %v1183_v14   ;;  %v2075_v14 = vld [vmem:[%s9105_s4 + $0x30] sm:$0xff] }
  0xbc   : > { %1344 = vperm.xlu1 %5457, %v1170_v15  }
  0xbe   : > { %1419 = vperm.xlu0 %5454, %v1185_v18  }
  0xc0   : > { %1354 = vperm.xlu1 %5457, %v1172_v19   ;;  %v2077_v19 = vld [vmem:[%s9105_s4 + $0x40] sm:$0xff] }
  0xc1   : > { %v6246_v20 = vpop.permute.xlu0 %477  ;;  %v6248_v23 = vpop.permute.xlu1 %487 }
  0xc2   : > { %5458 = vset.pattern.permute.xlu0 %v5615_v51 }
  0xc3   : > { %624 = vperm.xlu0 %5458, %v5836_v10  }
  0xc4   : > { %1364 = vperm.xlu1 %5457, %v1174_v26  }
  0xc5   : > { %v6255_v27 = vpop.permute.xlu0 %482  ;;  %v6257_v28 = vpop.permute.xlu1 %492 }
  0xc7   : > { %636 = vperm.xlu0 %5458, %v5856_v17  }
  0xc8   : > { %1374 = vperm.xlu1 %5457, %v1176_v29  }
  0xc9   : > { %v6263_v32 = vpop.permute.xlu0 %497  ;;  %v6265_v33 = vpop.permute.xlu1 %502 }
  0xcb   : > { %644 = vperm.xlu0 %5458, %v5872_v22  }
  0xcc   : > { %1384 = vperm.xlu1 %5457, %v1178_v34   ;;  %v9119_v34 = vmov 3  }
  0xcd   : > { %v6271_v35 = vpop.permute.xlu0 %507  ;;  %v6273_v38 = vpop.permute.xlu1 %512 }
  0xcf   : > { %673 = vperm.xlu0 %5458, %v5884_v25  }
  0xd0   : > { %1394 = vperm.xlu1 %5457, %v1180_v39   ;;  %v2079_v39 = vld [vmem:[%s9105_s4 + $0x50] sm:$0xff] }
  0xd1   : > { %v6279_v40 = vpop.permute.xlu0 %539  ;;  %v6281_v41 = vpop.permute.xlu1 %565 }
  0xd3   : > { %694 = vperm.xlu0 %5458, %v5908_v31  }
  0xd4   : > { %1404 = vperm.xlu1 %5457, %v1182_v44  }
  0xd5   : > { %v6287_v45 = vpop.permute.xlu0 %570  ;;  %v6289_v46 = vpop.permute.xlu1 %575 }
  0xd7   : > { %698 = vperm.xlu0 %5458, %v5903_v30  }
  0xd8   : > { %1414 = vperm.xlu1 %5457, %v1184_v47   ;;  %v2081_v47 = vld [vmem:[%s9105_s4 + $0x60] sm:$0xff] }
  0xd9   : > { %v6295_v49 = vpop.permute.xlu0 %580  ;;  %v6297_v50 = vpop.permute.xlu1 %585 }
  0xdb   : > { %710 = vperm.xlu0 %5458, %v5964_v43  }
  0xdc   : > { %1424 = vperm.xlu1 %5457, %v1186_v52  }
  0xdd   : > { %v6303_v53 = vpop.permute.xlu0 %590  ;;  %v6305_v54 = vpop.permute.xlu1 %595 }
  0xde   : > { %9141 = vst [vmem:[#allocation12_spill] sm:$0xff] %v6305_v54 }
  0xdf   : > { %718 = vperm.xlu0 %5458, %v5987_v48  }
  0xe0   : > { %5459 = vset.pattern.permute.xlu1 %v5615_v51 }
  0xe1   : > { %702 = vperm.xlu1 %5459, %v5936_v37   ;;  %v6310_v55 = vpop.permute.xlu0 %600 }
  0xe2   : > { %9142 = vst [vmem:[#allocation13_spill] sm:$0xff] %v6310_v55  ;;  %v6312_v56 = vpop.permute.xlu1 %620 }
  0xe3   : > { %5461 = vset.pattern.permute.xlu0 %v5617_v57 }
  0xe4   : > { %742 = vperm.xlu0 %5461, %v5836_v10  }
  0xe5   : > { %706 = vperm.xlu1 %5459, %v5931_v36   ;;  %v6316_v58 = vpop.permute.xlu0 %1194 }
  0xe6   : > { %v6318_v59 = vpop.permute.xlu1 %628 }
  0xe8   : > { %754 = vperm.xlu0 %5461, %v5856_v17   ;;  %v1926_v17 = vld [vmem:[%s9104_s3 + $0x8] sm:$0xff] }
  0xe9   : > { %714 = vperm.xlu1 %5459, %v5959_v42   ;;  %v6322_v51 = vpop.permute.xlu0 %1209  ;;  %2421 = vmatprep.mubr.f32.mxu1 %v1926_v17 }
  0xea   : > { %v6324_v60 = vpop.permute.xlu1 %632 }
  0xeb   : > { %9143 = vst [vmem:[#allocation14_spill] sm:$0xff] %v6324_v60 }
  0xec   : > { %762 = vperm.xlu0 %5461, %v5872_v22  }
  0xed   : > { %5460 = vset.pattern.permute.xlu1 %v5617_v57  ;;  %v6327_v61 = vpop.permute.xlu0 %1219 }
  0xee   : > { %738 = vperm.xlu1 %5460, %v5820_v3   ;;  %v6330_v10 = vpop.permute.xlu1 %640 }
  0xef   : > { %9144 = vst [vmem:[#allocation15_spill] sm:$0xff] %v6330_v10  ;;  %v2091_v10 = vld [vmem:[%s9105_s4 + $0xb0] sm:$0xff] }
  0xf0   : > { %791 = vperm.xlu0 %5461, %v5884_v25  }
  0xf1   : > { %v6339_v63 = vpop.permute.xlu0 %1229 }
  0xf2   : > { %746 = vperm.xlu1 %5460, %v5815_v2   ;;  %v6342_v22 = vpop.permute.xlu1 %648 }
  0xf3   : > { %9145 = vst [vmem:[#allocation16_spill] sm:$0xff] %v6342_v22 }
  0xf4   : > { %812 = vperm.xlu0 %5461, %v5908_v31  }
  0xf5   : > { %v6345_v0 = vpop.permute.xlu0 %1239 }
  0xf6   : > { %750 = vperm.xlu1 %5460, %v5831_v9   ;;  %v6348_v25 = vpop.permute.xlu1 %690 }
  0xf7   : > { %9146 = vst [vmem:[#allocation17_spill] sm:$0xff] %v6348_v25 }
  0xf8   : > { %820 = vperm.xlu0 %5461, %v5936_v37   ;;  %v2070_v37 = vld [vmem:[%s9105_s4 + $0x8] sm:$0xff] }
  0xf9   : > { %v6351_v4 = vpop.permute.xlu0 %1249 }
  0xfa   : > { %758 = vperm.xlu1 %5460, %v5851_v16  }
  0xfb   : > { %v6354_v5 = vpop.permute.xlu1 %1189 }
  0xfc   : > { %828 = vperm.xlu0 %5461, %v5964_v43  }
  0xfd   : > { %v6357_v6 = vpop.permute.xlu0 %1259 }
  0xfe   : > { %766 = vperm.xlu1 %5460, %v5867_v21  }
  0xff   : > { %v6360_v31 = vpop.permute.xlu1 %1199 }
 0x100   : > { %836 = vperm.xlu0 %5461, %v5987_v48   ;;  %v2073_v48 = vld [vmem:[%s9105_s4 + $0x20] sm:$0xff] }
 0x101   : > { %v1270_v7 = vpop.permute.xlu0 %1269 }
 0x102   : > { %808 = vperm.xlu1 %5460, %v5879_v24  }
 0x103   : > { %v6367_v11 = vpop.permute.xlu1 %1204 }
 0x104   : > { %5464 = vset.pattern.permute.xlu0 %v9121_v1 }
 0x105   : > { %2124 = vperm.xlu0 %5464, %v2070_v37   ;;  %v6370_v43 = vpop.permute.xlu0 %1279 }
 0x106   : > { %816 = vperm.xlu1 %5460, %v5903_v30  }
 0x107   : > { %v6376_v12 = vpop.permute.xlu1 %1214 }
 0x109   : > { %2139 = vperm.xlu0 %5464, %v2073_v48   ;;  %v6378_v13 = vpop.permute.xlu0 %1289 }
 0x10a   : > { %824 = vperm.xlu1 %5460, %v5931_v36  }
 0x10b   : > { %v6384_v15 = vpop.permute.xlu1 %1224 }
 0x10d   : > { %2149 = vperm.xlu0 %5464, %v2075_v14   ;;  %v6386_v18 = vpop.permute.xlu0 %1299  ;;  %v2087_v14 = vld [vmem:[%s9105_s4 + $0x90] sm:$0xff] }
 0x10e   : > { %832 = vperm.xlu1 %5460, %v5959_v42  }
 0x10f   : > { %v6392_v26 = vpop.permute.xlu1 %1234 }
 0x111   : > { %2159 = vperm.xlu0 %5464, %v2077_v19   ;;  %v6394_v29 = vpop.permute.xlu0 %1309 }
 0x112   : > { %5462 = vset.pattern.permute.xlu1 %v9119_v34 }
 0x113   : > { %856 = vperm.xlu1 %5462, %v5820_v3   ;;  %v6401_v44 = vpop.permute.xlu1 %1244  ;;  %v2083_v3 = vld [vmem:[%s9105_s4 + $0x70] sm:$0xff] }
 0x115   : > { %2169 = vperm.xlu0 %5464, %v2079_v39   ;;  %v6403_v42 = vpop.permute.xlu0 %1319  ;;  %v2089_v39 = vld [vmem:[%s9105_s4 + $0xa0] sm:$0xff] }
 0x117   : > { %864 = vperm.xlu1 %5462, %v5815_v2   ;;  %v6409_v52 = vpop.permute.xlu1 %1254  ;;  %v2085_v2 = vld [vmem:[%s9105_s4 + $0x80] sm:$0xff] }
 0x119   : > { %2179 = vperm.xlu0 %5464, %v2081_v47   ;;  %v6411_v57 = vpop.permute.xlu0 %1329 }
 0x11b   : > { %868 = vperm.xlu1 %5462, %v5831_v9   ;;  %v6417_v17 = vpop.permute.xlu1 %1264 }
 0x11d   : > { %2189 = vperm.xlu0 %5464, %v2083_v3   ;;  %v6419_v62 = vpop.permute.xlu0 %1339 }
 0x11f   : > { %876 = vperm.xlu1 %5462, %v5851_v16   ;;  %v1275_v37 = vpop.permute.xlu1 %1274 }
 0x121   : > { %2199 = vperm.xlu0 %5464, %v2085_v2   ;;  %v6425_v48 = vpop.permute.xlu0 %1349 }
 0x123   : > { %884 = vperm.xlu1 %5462, %v5867_v21   ;;  %v1285_v9 = vpop.permute.xlu1 %1284 }
 0x125   : > { %2209 = vperm.xlu0 %5464, %v2087_v14   ;;  %v6431_v19 = vpop.permute.xlu0 %1359 }
 0x127   : > { %926 = vperm.xlu1 %5462, %v5879_v24   ;;  %v1295_v16 = vpop.permute.xlu1 %1294  ;;  %v4921_v47 = vpop.f32.mrb[0].mxu0 }
 0x128   : > { %v1644_v3 = vadd.f32 %v4921_v47, %v6316_v58  ;;  %v4945_v2 = vpop.f32.mrb[0].mxu1  ;;  %v1638_v34 = vpop.f32.mrb[1].mxu0 }
 0x129   : > { %v1724_v1 = vadd.f32 %v4945_v2, %v1275_v37  ;;  %v1639_v8 = vadd.f32 %v1638_v34, %v6354_v5  ;;  %v1718_v21 = vpop.f32.mrb[1].mxu1  ;;  %2219 = vperm.xlu0 %5464, %v2089_v39   ;;  %v6439_v14 = vpop.permute.xlu0 %1369 }
 0x12a   : > { %v1878_v25 = vmax.f32 %v1644_v3, 0.0  ;;  %v1719_v22 = vadd.f32 %v1718_v21, %v1270_v7 }
 0x12b   : > { %v1894_v24 = vmax.f32 %v1724_v1, 0.0  ;;  %v1877_v55 = vmax.f32 %v1639_v8, 0.0  ;;  %934 = vperm.xlu1 %5462, %v5903_v30   ;;  %v1305_v58 = vpop.permute.xlu1 %1304  ;;  %v4924_v47 = vpop.f32.mrb[2].mxu0  ;;  %v2093_v8 = vld [vmem:[%s9105_s4 + $0xc0] sm:$0xff] }
 0x12c   : > { %v1893_v54 = vmax.f32 %v1719_v22, 0.0  ;;  %v1654_v37 = vadd.f32 %v4924_v47, %v6367_v11  ;;  %v4948_v5 = vpop.f32.mrb[2].mxu1  ;;  %v1648_v34 = vpop.f32.mrb[3].mxu0 }
 0x12d   : > { %v5216_v39 = vpack.c.bf16 %v1878_v25, %v1877_v55  ;;  %v1734_v2 = vadd.f32 %v4948_v5, %v1285_v9  ;;  %v1649_v3 = vadd.f32 %v1648_v34, %v6360_v31  ;;  %v1728_v7 = vpop.f32.mrb[3].mxu1  ;;  %2229 = vperm.xlu0 %5464, %v2091_v10   ;;  %v6447_v21 = vpop.permute.xlu0 %1379 }
 0x12e   : > { %v6449_v60 = vpack.c.bf16 %v1894_v24, %v1893_v54  ;;  %v1880_v1 = vmax.f32 %v1654_v37, 0.0  ;;  %v1729_v30 = vadd.f32 %v1728_v7, %v6370_v43  ;;  %v9147_v24 = vmov 0.0|0.0  }
 0x12f   : > { %v1896_v22 = vmax.f32 %v1734_v2, 0.0  ;;  %v1879_v11 = vmax.f32 %v1649_v3, 0.0  ;;  %942 = vperm.xlu1 %5462, %v5931_v36   ;;  %v1315_v55 = vpop.permute.xlu1 %1314  ;;  %v4927_v25 = vpop.f32.mrb[4].mxu0  ;;  %5217 = vmatpush1.bf16.msra.mxu1 %v5216_v39  ;;  %v2069_v36 = vld [vmem:[%s9105_s4] sm:$0xff]  ;;  %v2095_v3 = vld [vmem:[%s9105_s4 + $0xd0] sm:$0xff] }
 0x130   : > { %v1895_v31 = vmax.f32 %v1729_v30, 0.0  ;;  %v1664_v10 = vadd.f32 %v4927_v25, %v6376_v12  ;;  %v4951_v9 = vpop.f32.mrb[4].mxu1  ;;  %v1658_v54 = vpop.f32.mrb[5].mxu0  ;;  %5218 = vmatprep.subr.bf16.mxu1 %v9147_v24 }
 0x131   : > { %v5219_v47 = vpack.c.bf16 %v1880_v1, %v1879_v11  ;;  %v1744_v43 = vadd.f32 %v4951_v9, %v1295_v16  ;;  %v1659_v37 = vadd.f32 %v1658_v54, %v6322_v51  ;;  %v1738_v5 = vpop.f32.mrb[5].mxu1  ;;  %2239 = vperm.xlu0 %5464, %v2093_v8   ;;  %v6459_v34 = vpop.permute.xlu0 %1389  ;;  %v9148_v51 = vmov 0  }
 0x132   : > { %v6464_v39 = vpack.c.bf16 %v1896_v22, %v1895_v31  ;;  %v1882_v2 = vmax.f32 %v1664_v10, 0.0  ;;  %v1739_v12 = vadd.f32 %v1738_v5, %v6378_v13  ;;  %v2097_v5 = vld [vmem:[%s9105_s4 + $0xe0] sm:$0xff] }
 0x133   : > { %v1898_v16 = vmax.f32 %v1744_v43, 0.0  ;;  %v1881_v7 = vmax.f32 %v1659_v37, 0.0  ;;  %5463 = vset.pattern.permute.xlu1 %v9148_v51  ;;  %v1325_v1 = vpop.permute.xlu1 %1324  ;;  %v4930_v30 = vpop.f32.mrb[6].mxu0  ;;  %5220 = vmatpush1.bf16.msra.mxu1 %v5219_v47  ;;  %v2071_v47 = vld [vmem:[%s9105_s4 + $0x10] sm:$0xff] }
 0x134   : > { %v1897_v8 = vmax.f32 %v1739_v12, 0.0  ;;  %v1674_v11 = vadd.f32 %v4930_v30, %v6384_v15  ;;  %v4954_v25 = vpop.f32.mrb[6].mxu1  ;;  %2119 = vperm.xlu1 %5463, %v2069_v36   ;;  %v1668_v22 = vpop.f32.mrb[7].mxu0  ;;  %5221 = vmatprep.subr.bf16.mxu1 %v9147_v24 }
 0x135   : > { %v5222_v13 = vpack.c.bf16 %v1882_v2, %v1881_v7  ;;  %v1754_v31 = vadd.f32 %v4954_v25, %v1305_v58  ;;  %v1669_v10 = vadd.f32 %v1668_v22, %v6327_v61  ;;  %v1748_v9 = vpop.f32.mrb[7].mxu1  ;;  %2249 = vperm.xlu0 %5464, %v2095_v3   ;;  %v6474_v54 = vpop.permute.xlu0 %1399  ;;  %v2072_v22 = vld [vmem:[%s9105_s4 + $0x18] sm:$0xff] }
 0x136   : > { %v6479_v43 = vpack.c.bf16 %v1898_v16, %v1897_v8  ;;  %v1884_v15 = vmax.f32 %v1674_v11, 0.0  ;;  %v1749_v37 = vadd.f32 %v1748_v9, %v6386_v18 }
 0x137   : > { %v1900_v58 = vmax.f32 %v1754_v31, 0.0  ;;  %v1883_v36 = vmax.f32 %v1669_v10, 0.0  ;;  %v1335_v61 = vpop.permute.xlu1 %1334  ;;  %v4933_v2 = vpop.f32.mrb[8].mxu0  ;;  %5223 = vmatpush1.bf16.msra.mxu1 %v5222_v13  ;;  %v2099_v10 = vld [vmem:[%s9105_s4 + $0xf0] sm:$0xff] }
 0x138   : > { %v1899_v12 = vmax.f32 %v1749_v37, 0.0  ;;  %v1684_v3 = vadd.f32 %v4933_v2, %v6392_v26  ;;  %v4957_v7 = vpop.f32.mrb[8].mxu1  ;;  %2129 = vperm.xlu1 %5463, %v2071_v47   ;;  %v1678_v30 = vpop.f32.mrb[9].mxu0  ;;  %5224 = vmatprep.subr.bf16.mxu1 %v9147_v24 }
 0x139   : > { %v5225_v16 = vpack.c.bf16 %v1884_v15, %v1883_v36  ;;  %v1764_v8 = vadd.f32 %v4957_v7, %v1315_v55  ;;  %v1679_v18 = vadd.f32 %v1678_v30, %v6339_v63  ;;  %v1758_v11 = vpop.f32.mrb[9].mxu1  ;;  %2259 = vperm.xlu0 %5464, %v2097_v5   ;;  %v6488_v25 = vpop.permute.xlu0 %1409  ;;  %v2074_v7 = vld [vmem:[%s9105_s4 + $0x28] sm:$0xff] }
 0x13a   : > { %v6493_v13 = vpack.c.bf16 %v1900_v58, %v1899_v12  ;;  %v1886_v26 = vmax.f32 %v1684_v3, 0.0  ;;  %v1759_v31 = vadd.f32 %v1758_v11, %v6394_v29 }
 0x13b   : > { %v1902_v55 = vmax.f32 %v1764_v8, 0.0  ;;  %v1885_v9 = vmax.f32 %v1679_v18, 0.0  ;;  %v1345_v63 = vpop.permute.xlu1 %1344  ;;  %v4936_v47 = vpop.f32.mrb[10].mxu0  ;;  %5226 = vmatpush1.bf16.msra.mxu1 %v5225_v16 }
 0x13c   : > { %v1901_v15 = vmax.f32 %v1759_v31, 0.0  ;;  %v1694_v37 = vadd.f32 %v4936_v47, %v6401_v44  ;;  %v4960_v5 = vpop.f32.mrb[10].mxu1  ;;  %2134 = vperm.xlu1 %5463, %v2072_v22   ;;  %v1688_v36 = vpop.f32.mrb[11].mxu0  ;;  %5227 = vmatprep.subr.bf16.mxu1 %v9147_v24 }
 0x13d   : > { %v5228_v58 = vpack.c.bf16 %v1886_v26, %v1885_v9  ;;  %v1774_v2 = vadd.f32 %v4960_v5, %v1325_v1  ;;  %v1689_v29 = vadd.f32 %v1688_v36, %v6345_v0  ;;  %v1768_v12 = vpop.f32.mrb[11].mxu1  ;;  %2269 = vperm.xlu0 %5464, %v2099_v10   ;;  %v6502_v3 = vpop.permute.xlu0 %1419  ;;  %v6523_v36 = vld [vmem:[%s9108_s7 + $0x8] sm:$0xff] }
 0x13e   : > { %v6507_v30 = vpack.c.bf16 %v1902_v55, %v1901_v15  ;;  %v1888_v44 = vmax.f32 %v1694_v37, 0.0  ;;  %v1769_v16 = vadd.f32 %v1768_v12, %v6403_v42  ;;  %v9149_v15 = vmov 3   ;;  %v2076_v42 = vld [vmem:[%s9105_s4 + $0x38] sm:$0xff] }
 0x13f   : > { %v1904_v8 = vmax.f32 %v1774_v2, 0.0  ;;  %v1887_v18 = vmax.f32 %v1689_v29, 0.0  ;;  %v1355_v11 = vpop.permute.xlu1 %1354  ;;  %v4939_v22 = vpop.f32.mrb[12].mxu0  ;;  %5229 = vmatpush1.bf16.msra.mxu1 %v5228_v58 }
 0x140   : > { %v1903_v1 = vmax.f32 %v1769_v16, 0.0  ;;  %v1704_v0 = vadd.f32 %v4939_v22, %v6409_v52  ;;  %v4963_v26 = vpop.f32.mrb[12].mxu1  ;;  %2144 = vperm.xlu1 %5463, %v2074_v7   ;;  %v1698_v31 = vpop.f32.mrb[13].mxu0  ;;  %5230 = vmatprep.subr.bf16.mxu1 %v9147_v24 }
 0x141   : > { %v5231_v10 = vpack.c.bf16 %v1888_v44, %v1887_v18  ;;  %v1784_v9 = vadd.f32 %v4963_v26, %v1335_v61  ;;  %v1699_v55 = vadd.f32 %v1698_v31, %v6351_v4  ;;  %v1778_v47 = vpop.f32.mrb[13].mxu1  ;;  %5465 = vset.pattern.permute.xlu0 %v9149_v15 }
 0x142   : > { %v6517_v37 = vpack.c.bf16 %v1904_v8, %v1903_v1  ;;  %v1890_v5 = vmax.f32 %v1704_v0, 0.0  ;;  %v1779_v52 = vadd.f32 %v1778_v47, %v6411_v57  ;;  %860 = vperm.xlu0 %5465, %v6523_v36   ;;  %v6526_v4 = vpop.permute.xlu0 %624  ;;  %v2078_v1 = vld [vmem:[%s9105_s4 + $0x48] sm:$0xff] }
 0x143   : > { %v1906_v61 = vmax.f32 %v1784_v9, 0.0  ;;  %v1889_v58 = vmax.f32 %v1699_v55, 0.0  ;;  %v1365_v2 = vpop.permute.xlu1 %1364  ;;  %v4942_v29 = vpop.f32.mrb[14].mxu0  ;;  %5232 = vmatpush1.bf16.msra.mxu1 %v5231_v10 }
 0x144   : > { %v1905_v12 = vmax.f32 %v1779_v52, 0.0  ;;  %v1714_v7 = vadd.f32 %v4942_v29, %v6417_v17  ;;  %v4966_v44 = vpop.f32.mrb[14].mxu1  ;;  %2154 = vperm.xlu1 %5463, %v2076_v42   ;;  %v1708_v57 = vpop.f32.mrb[15].mxu0  ;;  %5233 = vmatprep.subr.bf16.mxu1 %v9147_v24  ;;  %v6540_v17 = vld [vmem:[%s9108_s7 + $0x20] sm:$0xff] }
 0x145   : > { %v5234_v16 = vpack.c.bf16 %v1890_v5, %v1889_v58  ;;  %v1794_v8 = vadd.f32 %v4966_v44, %v1345_v63  ;;  %v1709_v18 = vadd.f32 %v1708_v57, %v6357_v6  ;;  %v1788_v22 = vpop.f32.mrb[15].mxu1 }
 0x146   : > { %v6534_v0 = vpack.c.bf16 %v1906_v61, %v1905_v12  ;;  %v1892_v26 = vmax.f32 %v1714_v7, 0.0  ;;  %v1789_v31 = vadd.f32 %v1788_v22, %v6419_v62  ;;  %872 = vperm.xlu0 %5465, %v6540_v17   ;;  %v6543_v63 = vpop.permute.xlu0 %636  ;;  %v2080_v61 = vld [vmem:[%s9105_s4 + $0x58] sm:$0xff]  ;;  %v6555_v12 = vld [vmem:[%s9108_s7 + $0x30] sm:$0xff]  ;;  %v2082_v22 = vld [vmem:[%s9105_s4 + $0x68] sm:$0xff] }
 0x147   : > { %v1908_v6 = vmax.f32 %v1794_v8, 0.0  ;;  %v1891_v10 = vmax.f32 %v1709_v18, 0.0  ;;  %v1375_v9 = vpop.permute.xlu1 %1374  ;;  %v4969_v55 = vpop.f32.mrb[16].mxu1  ;;  %5235 = vmatpush1.bf16.msra.mxu1 %v5234_v16 }
 0x148   : > { %v1907_v47 = vmax.f32 %v1789_v31, 0.0  ;;  %v1804_v42 = vadd.f32 %v4969_v55, %v1355_v11  ;;  %2164 = vperm.xlu1 %5463, %v2078_v1   ;;  %v1798_v5 = vpop.f32.mrb[17].mxu1  ;;  %5236 = vmatprep.subr.bf16.mxu1 %v9147_v24 }
 0x149   : > { %v5237_v62 = vpack.c.bf16 %v1892_v26, %v1891_v10  ;;  %v1799_v52 = vadd.f32 %v1798_v5, %v6425_v48  ;;  %v6568_v26 = vld [vmem:[%s9109_s8] sm:$0x1]  ;;  %v6580_v5 = vld [vmem:[%s5804_s16 + $0x8] sm:$0xff] }
 0x14a   : > { %v6550_v58 = vpack.c.bf16 %v1908_v6, %v1907_v47  ;;  %v1910_v29 = vmax.f32 %v1804_v42, 0.0  ;;  %880 = vperm.xlu0 %5465, %v6555_v12   ;;  %v6558_v11 = vpop.permute.xlu0 %644  ;;  %v6575_v47 = vld [vmem:[%s5804_s16] sm:$0xff] }
 0x14b   : > { %v1909_v7 = vmax.f32 %v1799_v52, 0.0  ;;  %v1385_v44 = vpop.permute.xlu1 %1384  ;;  %v4972_v57 = vpop.f32.mrb[18].mxu1  ;;  %5238 = vmatpush1.bf16.msra.mxu1 %v5237_v62  ;;  %v515_v42 = vmul.f32 %v6575_v47, %v6246_v20  ;;  %v516_v62 = vmul.f32 %v6580_v5, %v6255_v27  ;;  %v6592_v20 = vld [vmem:[%s9110_s9 + $0x8] sm:$0xff] }
 0x14c   : > { %v1814_v48 = vadd.f32 %v4972_v57, %v1365_v2  ;;  %2174 = vperm.xlu1 %5463, %v2080_v61   ;;  %v1808_v16 = vpop.f32.mrb[19].mxu1  ;;  %5239 = vmatprep.subr.bf16.mxu1 %v9147_v24 }
 0x14d   : > { %v5263_v8 = vpack.c.bf16 %v1910_v29, %v1909_v7  ;;  %v1809_v18 = vadd.f32 %v1808_v16, %v6431_v19  ;;  %v6599_v16 = vld [vmem:[%s5804_s16 + $0x10] sm:$0xff] }
 0x14e   : > { %v1912_v1 = vmax.f32 %v1814_v48, 0.0  ;;  %909 = vperm.xlu0 %5465, %v6568_v26   ;;  %v6571_v2 = vpop.permute.xlu0 %673 }
 0x14f   : > { %v1911_v31 = vmax.f32 %v1809_v18, 0.0  ;;  %v1395_v6 = vpop.permute.xlu1 %1394  ;;  %v4975_v10 = vpop.f32.mrb[20].mxu1  ;;  %5241 = vmatpush1.bf16.msra.mxu1 %v6449_v60  ;;  %5264 = vmatprep.subr.bf16.mxu0 %v5263_v8  ;;  %v2084_v60 = vld [vmem:[%s9105_s4 + $0x78] sm:$0xff]  ;;  %v523_v18 = vadd.f32 %v516_v62, %v515_v42 }
 0x150   : > { %v1824_v19 = vadd.f32 %v4975_v10, %v1375_v9  ;;  %2184 = vperm.xlu1 %5463, %v2082_v22   ;;  %v1818_v55 = vpop.f32.mrb[21].mxu1  ;;  %5266 = vmatpush3.bf16.msra.mxu0 %v5263_v8  ;;  %v517_v8 = vmul.f32 %v6599_v16, %v6248_v23  ;;  %v6618_v62 = vld [vmem:[%s5804_s16 + $0x18] sm:$0xff] }
 0x151   : > { %v5267_v52 = vpack.c.bf16 %v1912_v1, %v1911_v31  ;;  %v1819_v61 = vadd.f32 %v1818_v55, %v6439_v14  ;;  %5242 = vmatprep.subr.bf16.mxu1 %v9147_v24  ;;  %v6611_v31 = vld [vmem:[%s9110_s9 + $0x18] sm:$0xff] }
 0x152   : > { %v1914_v9 = vmax.f32 %v1824_v19, 0.0  ;;  %930 = vperm.xlu0 %5465, %v6592_v20   ;;  %v6595_v29 = vpop.permute.xlu0 %694 }
 0x153   : > { %v1913_v27 = vmax.f32 %v1819_v61, 0.0  ;;  %v1405_v7 = vpop.permute.xlu1 %1404  ;;  %v4978_v14 = vpop.f32.mrb[22].mxu1  ;;  %5244 = vmatpush1.bf16.msra.mxu1 %v6464_v39  ;;  %5268 = vmatprep.subr.bf16.mxu0 %v5267_v52  ;;  %v2086_v39 = vld [vmem:[%s9105_s4 + $0x88] sm:$0xff]  ;;  %v524_v61 = vadd.f32 %v523_v18, %v517_v8 }
 0x154   : > { %v1834_v57 = vadd.f32 %v4978_v14, %v1385_v44  ;;  %2194 = vperm.xlu1 %5463, %v2084_v60   ;;  %v1828_v48 = vpop.f32.mrb[23].mxu1  ;;  %5270 = vmatpush3.bf16.msra.mxu0 %v5267_v52  ;;  %v518_v52 = vmul.f32 %v6618_v62, %v6257_v28 }
 0x155   : > { %v5271_v22 = vpack.c.bf16 %v1914_v9, %v1913_v27  ;;  %v1829_v1 = vadd.f32 %v1828_v48, %v6447_v21  ;;  %5245 = vmatprep.subr.bf16.mxu1 %v9147_v24  ;;  %v6630_v27 = vld [vmem:[%s9110_s9 + $0x28] sm:$0xff] }
 0x156   : > { %v1916_v44 = vmax.f32 %v1834_v57, 0.0  ;;  %938 = vperm.xlu0 %5465, %v6611_v31   ;;  %v6614_v23 = vpop.permute.xlu0 %698  ;;  %v525_v18 = vadd.f32 %v524_v61, %v518_v52 }
 0x157   : > { %v1915_v10 = vmax.f32 %v1829_v1, 0.0  ;;  %v1415_v19 = vpop.permute.xlu1 %1414  ;;  %v4981_v21 = vpop.f32.mrb[24].mxu1  ;;  %5247 = vmatpush1.bf16.msra.mxu1 %v6479_v43  ;;  %5272 = vmatprep.subr.bf16.mxu0 %v5271_v22  ;;  %v2088_v43 = vld [vmem:[%s9105_s4 + $0x98] sm:$0xff] }
 0x158   : > { %v1844_v55 = vadd.f32 %v4981_v21, %v1395_v6  ;;  %2204 = vperm.xlu1 %5463, %v2086_v39   ;;  %v1838_v42 = vpop.f32.mrb[25].mxu1  ;;  %5274 = vmatpush3.bf16.msra.mxu0 %v5271_v22  ;;  %v6637_v22 = vld [vmem:[%s5804_s16 + $0x20] sm:$0xff] }
 0x159   : > { %v5275_v60 = vpack.c.bf16 %v1916_v44, %v1915_v10  ;;  %v1839_v9 = vadd.f32 %v1838_v42, %v6459_v34  ;;  %5248 = vmatprep.subr.bf16.mxu1 %v9147_v24  ;;  %v519_v1 = vmul.f32 %v6637_v22, %v6263_v32  ;;  %v6649_v10 = vld [vmem:[%s9110_s9 + $0x30] sm:$0xff] }
 0x15a   : > { %v1918_v6 = vmax.f32 %v1844_v55, 0.0  ;;  %946 = vperm.xlu0 %5465, %v6630_v27   ;;  %v6633_v28 = vpop.permute.xlu0 %710 }
 0x15b   : > { %v1917_v14 = vmax.f32 %v1839_v9, 0.0  ;;  %v1425_v57 = vpop.permute.xlu1 %1424  ;;  %v4984_v34 = vpop.f32.mrb[26].mxu1  ;;  %5250 = vmatpush1.bf16.msra.mxu1 %v6493_v13  ;;  %5276 = vmatprep.subr.bf16.mxu0 %v5275_v60  ;;  %v2090_v13 = vld [vmem:[%s9105_s4 + $0xa8] sm:$0xff]  ;;  %v526_v61 = vadd.f32 %v525_v18, %v519_v1 }
 0x15c   : > { %v1854_v48 = vadd.f32 %v4984_v34, %v1405_v7  ;;  %2214 = vperm.xlu1 %5463, %v2088_v43   ;;  %v1848_v8 = vpop.f32.mrb[27].mxu1  ;;  %5278 = vmatpush3.bf16.msra.mxu0 %v5275_v60  ;;  %v6658_v60 = vld [vmem:[%s5804_s16 + $0x28] sm:$0xff] }
 0x15d   : > { %v5279_v39 = vpack.c.bf16 %v1918_v6, %v1917_v14  ;;  %v1849_v44 = vadd.f32 %v1848_v8, %v6474_v54  ;;  %5251 = vmatprep.subr.bf16.mxu1 %v9147_v24  ;;  %v520_v9 = vmul.f32 %v6658_v60, %v6265_v33  ;;  %v5619_v14 = vmov 4  }
 0x15e   : > { %v1920_v7 = vmax.f32 %v1854_v48, 0.0  ;;  %950 = vperm.xlu0 %5465, %v6649_v10   ;;  %v6652_v21 = vpop.permute.xlu0 %718 }
 0x15f   : > { %v1919_v32 = vmax.f32 %v1849_v44, 0.0  ;;  %v4987_v55 = vpop.f32.mrb[28].mxu1  ;;  %5253 = vmatpush1.bf16.msra.mxu1 %v6507_v30  ;;  %5280 = vmatprep.subr.bf16.mxu0 %v5279_v39  ;;  %v2092_v30 = vld [vmem:[%s9105_s4 + $0xb8] sm:$0xff] }
 0x160   : > { %v1864_v54 = vadd.f32 %v4987_v55, %v1415_v19  ;;  %2224 = vperm.xlu1 %5463, %v2090_v13   ;;  %v6655_v42 = vpop.permute.xlu1 %702  ;;  %v1858_v52 = vpop.f32.mrb[29].mxu1  ;;  %5282 = vmatpush3.bf16.msra.mxu0 %v5279_v39  ;;  %v527_v39 = vadd.f32 %v526_v61, %v520_v9  ;;  %v6675_v44 = vld [vmem:[%s5804_s16 + $0x30] sm:$0xff]  ;;  %v6691_v55 = vld [vmem:[%s5804_s16 + $0x38] sm:$0xff] }
 0x161   : > { %v5283_v43 = vpack.c.bf16 %v1920_v7, %v1919_v32  ;;  %5254 = vmatprep.subr.bf16.mxu1 %v9147_v24  ;;  %v1859_v6 = vadd.f32 %v1858_v52, %v6488_v25  ;;  %v521_v25 = vmul.f32 %v6675_v44, %v6271_v35  ;;  %v1925_v61 = vld [vmem:[%s9104_s3] sm:$0xff] }
 0x162   : > { %v1922_v19 = vmax.f32 %v1864_v54, 0.0  ;;  %5468 = vset.pattern.permute.xlu0 %v5619_v14  ;;  %v522_v54 = vmul.f32 %v6691_v55, %v6273_v38  ;;  %v1929_v38 = vld [vmem:[%s9104_s3 + $0x20] sm:$0xff] }
 0x163   : > { %978 = vperm.xlu0 %5468, %v6523_v36   ;;  %v4990_v34 = vpop.f32.mrb[30].mxu1  ;;  %5256 = vmatpush1.bf16.msra.mxu1 %v6517_v37  ;;  %v6670_v33 = vpop.permute.xlu0 %742  ;;  %v1921_v48 = vmax.f32 %v1859_v6, 0.0  ;;  %v2094_v37 = vld [vmem:[%s9105_s4 + $0xc8] sm:$0xff]  ;;  %v1928_v6 = vld [vmem:[%s9104_s3 + $0x18] sm:$0xff] }
 0x164   : > { %v1874_v8 = vadd.f32 %v4990_v34, %v1425_v57  ;;  %5284 = vmatprep.subr.bf16.mxu0 %v5283_v43  ;;  %2234 = vperm.xlu1 %5463, %v2092_v30   ;;  %v6672_v18 = vpop.permute.xlu1 %706  ;;  %v1868_v1 = vpop.f32.mrb[31].mxu1  ;;  %v1933_v30 = vld [vmem:[%s9104_s3 + $0x40] sm:$0xff]  ;;  %v1932_v34 = vld [vmem:[%s9104_s3 + $0x38] sm:$0xff] }
 0x165   : > { %v1869_v36 = vadd.f32 %v1868_v1, %v6502_v3  ;;  %5286 = vmatpush3.bf16.msra.mxu0 %v5283_v43  ;;  %5257 = vmatprep.subr.bf16.mxu1 %v9147_v24  ;;  %v5287_v57 = vpack.c.bf16 %v1922_v19, %v1921_v48  ;;  %v528_v3 = vadd.f32 %v527_v39, %v521_v25  ;;  %v1936_v1 = vld [vmem:[%s9104_s3 + $0x58] sm:$0xff]  ;;  %v1939_v39 = vld [vmem:[%s9104_s3 + $0x70] sm:$0xff] }
 0x166   : > { %v1924_v13 = vmax.f32 %v1874_v8, 0.0 }
 0x167   : > { %v1923_v7 = vmax.f32 %v1869_v36, 0.0  ;;  %990 = vperm.xlu0 %5468, %v6540_v17   ;;  %5259 = vmatpush1.bf16.msra.mxu1 %v6534_v0  ;;  %v6686_v32 = vpop.permute.xlu0 %754  ;;  %v2096_v0 = vld [vmem:[%s9105_s4 + $0xd8] sm:$0xff]  ;;  %v529_v9 = vadd.f32 %v528_v3, %v522_v54  ;;  %v1931_v36 = vld [vmem:[%s9104_s3 + $0x30] sm:$0xff]  ;;  %v1934_v54 = vld [vmem:[%s9104_s3 + $0x48] sm:$0xff] }
 0x168   : > { %5288 = vmatprep.subr.bf16.mxu0 %v5287_v57  ;;  %2244 = vperm.xlu1 %5463, %v2094_v37   ;;  %v6688_v35 = vpop.permute.xlu1 %714  ;;  %v1935_v37 = vld [vmem:[%s9104_s3 + $0x50] sm:$0xff] }
 0x169   : > { %v5291_v52 = vpack.c.bf16 %v1924_v13, %v1923_v7  ;;  %5290 = vmatpush3.bf16.msra.mxu0 %v5287_v57  ;;  %5260 = vmatprep.subr.bf16.mxu1 %v9147_v24  ;;  %v530_v48 = vrot.slane %v529_v9, 4  ;;  %v1945_v7 = vld [vmem:[%s9104_s3 + $0xa0] sm:$0xff] }
 0x16b   : > { %998 = vperm.xlu0 %5468, %v6555_v12   ;;  %5262 = vmatpush1.bf16.msra.mxu1 %v6550_v58  ;;  %v6701_v17 = vpop.permute.xlu0 %762  ;;  %v1930_v58 = vld [vmem:[%s9104_s3 + $0x28] sm:$0xff]  ;;  %v531_v57 = vadd.f32 %v530_v48, %v529_v9  ;;  %v1948_v9 = vld [vmem:[%s9104_s3 + $0xb8] sm:$0xff] }
 0x16c   : > { %5292 = vmatprep.subr.bf16.mxu0 %v5291_v52  ;;  %2254 = vperm.xlu1 %5463, %v2096_v0   ;;  %v2098_v12 = vld [vmem:[%s9105_s4 + $0xe8] sm:$0xff] }
 0x16d   : > { %5294 = vmatpush3.bf16.msra.mxu0 %v5291_v52  ;;  %v6709_v43 = vpop.permute.xlu1 %738  ;;  %v1938_v52 = vld [vmem:[%s9104_s3 + $0x68] sm:$0xff]  ;;  %v532_v0 = vrot.slane %v531_v57, 2 }
 0x16e   : > { %2422 = vmatmul.mubr.f32.vlgmr.msra.gmra.mrb[32].mxu1 %v1925_v61  ;;  %5295 = vmatprep.subr.bf16.mxu0 %v9147_v24  ;;  %v542_v61 = vlaneseq }
 0x16f   : > { %1027 = vperm.xlu0 %5468, %v6568_v26   ;;  %v6722_v19 = vpop.permute.xlu0 %791  ;;  %2426 = vmatprep.mubr.f32.mxu1 %v1929_v38  ;;  %v2100_v26 = vld [vmem:[%s9105_s4 + $0xf8] sm:$0xff] }
 0x170   : > { %5024 = vmatmul.mubr.f32.vlgmr.msra.gmra.mrb[16].mxu0 %v1930_v58  ;;  %2264 = vperm.xlu1 %5463, %v2098_v12   ;;  %v1937_v12 = vld [vmem:[%s9104_s3 + $0x60] sm:$0xff] }
 0x171   : > { %v6730_v8 = vpop.permute.xlu1 %746  ;;  %5026 = vmatprep.mubr.f32.mxu0 %v1933_v30  ;;  %v1941_v30 = vld [vmem:[%s9104_s3 + $0x80] sm:$0xff] }
 0x172   : > { %2427 = vmatmul.mubr.f32.gmra.mrb[34].mxu1 %v1928_v6  ;;  %v533_v6 = vadd.f32 %v532_v0, %v531_v57  ;;  %v1963_v0 = vld [vmem:[%s9104_s3 + $0x130] sm:$0xff] }
 0x173   : > { %1048 = vperm.xlu0 %5468, %v6592_v20   ;;  %v6742_v25 = vpop.permute.xlu0 %812  ;;  %2431 = vmatprep.mubr.f32.mxu1 %v1932_v34  ;;  %v1942_v20 = vld [vmem:[%s9104_s3 + $0x88] sm:$0xff]  ;;  %v543_v34 = vshrl.u32 %v542_v61, 7  ;;  %v1943_v61 = vld [vmem:[%s9104_s3 + $0x90] sm:$0xff] }
 0x174   : > { %2274 = vperm.xlu1 %5463, %v2100_v26   ;;  %5027 = vmatmul.mubr.f32.gmra.mrb[18].mxu0 %v1936_v1  ;;  %v5492_v26 = vld [vmem:[%s9108_s7] sm:$0xff] }
 0x175   : > { %v6750_v13 = vpop.permute.xlu1 %750  ;;  %5029 = vmatprep.mubr.f32.mxu0 %v1939_v39  ;;  %v1957_v1 = vld [vmem:[%s9104_s3 + $0x100] sm:$0xff]  ;;  %v6808_v57 = vsub.s32 0, %v543_v34 }
 0x176   : > { %2432 = vmatmul.mubr.f32.gmra.mrb[36].mxu1 %v1931_v36  ;;  %v1944_v36 = vld [vmem:[%s9104_s3 + $0x98] sm:$0xff]  ;;  %v2105_v34 = vld [vmem:[%s9105_s4 + $0x120] sm:$0xff] }
 0x177   : > { %1056 = vperm.xlu0 %5468, %v6611_v31   ;;  %v6759_v3 = vpop.permute.xlu0 %820  ;;  %2436 = vmatprep.mubr.f32.mxu1 %v1935_v37  ;;  %v5491_v31 = vld [vmem:[%s9110_s9 + $0x38] sm:$0xff]  ;;  %v534_v37 = vrot.slane %v533_v6, 1  ;;  %9150 = vst [vmem:[#allocation18_spill] sm:$0xff] %v6808_v57 }
 0x178   : > { %5466 = vset.pattern.permute.xlu1 %v9149_v15  ;;  %5030 = vmatmul.mubr.f32.gmra.mrb[20].mxu0 %v1942_v20  ;;  %v1951_v15 = vld [vmem:[%s9104_s3 + $0xd0] sm:$0xff] }
 0x179   : > { %954 = vperm.xlu1 %5466, %v5491_v31   ;;  %v6771_v38 = vpop.permute.xlu1 %758  ;;  %5032 = vmatprep.mubr.f32.mxu0 %v1945_v7  ;;  %v2102_v7 = vld [vmem:[%s9105_s4 + $0x108] sm:$0xff] }
 0x17a   : > { %2437 = vmatmul.mubr.f32.gmra.mrb[38].mxu1 %v1934_v54  ;;  %v1960_v54 = vld [vmem:[%s9104_s3 + $0x118] sm:$0xff] }
 0x17b   : > { %1064 = vperm.xlu0 %5468, %v6630_v27   ;;  %v6780_v58 = vpop.permute.xlu0 %828  ;;  %2441 = vmatprep.mubr.f32.mxu1 %v1938_v52  ;;  %v1954_v27 = vld [vmem:[%s9104_s3 + $0xe8] sm:$0xff]  ;;  %v5493_v52 = vld [vmem:[%s9108_s7 + $0x10] sm:$0xff] }
 0x17c   : > { %5033 = vmatmul.mubr.f32.gmra.mrb[22].mxu0 %v1948_v9  ;;  %v1947_v9 = vld [vmem:[%s9104_s3 + $0xb0] sm:$0xff] }
 0x17d   : > { %5467 = vset.pattern.permute.xlu1 %v5619_v14  ;;  %v6789_v48 = vpop.permute.xlu1 %766  ;;  %5035 = vmatprep.mubr.f32.mxu0 %v1951_v15  ;;  %v1940_v14 = vld [vmem:[%s9104_s3 + $0x78] sm:$0xff]  ;;  %v535_v15 = vadd.f32 %v534_v37, %v533_v6  ;;  %v1946_v6 = vld [vmem:[%s9104_s3 + $0xa8] sm:$0xff] }
 0x17e   : > { %974 = vperm.xlu1 %5467, %v5492_v26   ;;  %2442 = vmatmul.mubr.f32.gmra.mrb[40].mxu1 %v1937_v12  ;;  %v545_v12 = vrot.slane %v6279_v40, %v6808_v57  ;;  %v5494_v26 = vld [vmem:[%s9108_s7 + $0x18] sm:$0xff]  ;;  %v1969_v40 = vld [vmem:[%s9104_s3 + $0x160] sm:$0xff] }
 0x17f   : > { %1072 = vperm.xlu0 %5468, %v5491_v31   ;;  %v6800_v39 = vpop.permute.xlu0 %836  ;;  %2446 = vmatprep.mubr.f32.mxu1 %v1941_v30 }
 0x180   : > { %5036 = vmatmul.mubr.f32.gmra.mrb[24].mxu0 %v1954_v27  ;;  %v1966_v27 = vld [vmem:[%s9104_s3 + $0x148] sm:$0xff] }
 0x181   : > { %v6810_v20 = vpop.permute.xlu1 %808  ;;  %5038 = vmatprep.mubr.f32.mxu0 %v1957_v1 }
 0x182   : > { %982 = vperm.xlu1 %5467, %v5493_v52   ;;  %2447 = vmatmul.mubr.f32.gmra.mrb[42].mxu1 %v1940_v14  ;;  %v1950_v14 = vld [vmem:[%s9104_s3 + $0xc8] sm:$0xff] }
 0x183   : > { %5470 = vset.pattern.permute.xlu0 %v9148_v51  ;;  %2451 = vmatprep.mubr.f32.mxu1 %v1944_v36  ;;  %v6857_v36 = vadd.f32 %v545_v12, %v535_v15  ;;  %v5495_v52 = vld [vmem:[%s9108_s7 + $0x28] sm:$0xff]  ;;  %v1953_v15 = vld [vmem:[%s9104_s3 + $0xe0] sm:$0xff] }
 0x184   : > { %2284 = vperm.xlu0 %5470, %v2102_v7   ;;  %v6828_v31 = vpop.permute.xlu0 %2124  ;;  %5039 = vmatmul.mubr.f32.gmra.mrb[26].mxu0 %v1960_v54  ;;  %v2107_v7 = vld [vmem:[%s9105_s4 + $0x130] sm:$0xff]  ;;  %v1972_v54 = vld [vmem:[%s9104_s3 + $0x178] sm:$0xff] }
 0x185   : > { %9151 = vst [vmem:[#allocation19_spill] sm:$0xff] %v6828_v31  ;;  %v6835_v30 = vpop.permute.xlu1 %816  ;;  %5041 = vmatprep.mubr.f32.mxu0 %v1963_v0  ;;  %v1975_v0 = vld [vmem:[%s9104_s3 + $0x190] sm:$0xff]  ;;  %v547_v12 = vmul.f32 %v6575_v47, %v6857_v36  ;;  %v3170_v31 = vld [vmem:[%s9107_s6 + $0x58] sm:$0xff] }
 0x186   : > { %986 = vperm.xlu1 %5467, %v5494_v26   ;;  %2452 = vmatmul.mubr.f32.gmra.mrb[44].mxu1 %v1943_v61  ;;  %v1949_v61 = vld [vmem:[%s9104_s3 + $0xc0] sm:$0xff] }
 0x187   : > { %2456 = vmatprep.mubr.f32.mxu1 %v1947_v9  ;;  %v2109_v26 = vld [vmem:[%s9105_s4 + $0x140] sm:$0xff] }
 0x188   : > { %2299 = vperm.xlu0 %5470, %v2105_v34   ;;  %v6852_v1 = vpop.permute.xlu0 %2139  ;;  %5042 = vmatmul.mubr.f32.gmra.mrb[28].mxu0 %v1966_v27  ;;  %v548_v34 = vmul.f32 %v6580_v5, %v6857_v36 }
 0x189   : > { %9152 = vst [vmem:[#allocation20_spill] sm:$0xff] %v6852_v1  ;;  %v6859_v37 = vpop.permute.xlu1 %824  ;;  %5044 = vmatprep.mubr.f32.mxu0 %v1969_v40  ;;  %v5496_v40 = vld [vmem:[%s9108_s7 + $0x38] sm:$0xff] }
 0x18a   : > { %994 = vperm.xlu1 %5467, %v5495_v52   ;;  %2457 = vmatmul.mubr.f32.gmra.mrb[46].mxu1 %v1946_v6  ;;  %v1978_v6 = vld [vmem:[%s9104_s3 + $0x1a8] sm:$0xff]  ;;  %v603_v52 = vadd.f32 %v6281_v41, %v547_v12  ;;  %v1987_v12 = vld [vmem:[%s9104_s3 + $0x1f0] sm:$0xff] }
 0x18b   : > { %2461 = vmatprep.mubr.f32.mxu1 %v1950_v14 }
 0x18c   : > { %2309 = vperm.xlu0 %5470, %v2107_v7   ;;  %v6876_v9 = vpop.permute.xlu0 %2149  ;;  %5045 = vmatmul.mubr.f32.gmra.mrb[30].mxu0 %v1972_v54  ;;  %v1952_v7 = vld [vmem:[%s9104_s3 + $0xd8] sm:$0xff]  ;;  %v1981_v54 = vld [vmem:[%s9104_s3 + $0x1c0] sm:$0xff] }
 0x18d   : > { %9153 = vst [vmem:[#allocation21_spill] sm:$0xff] %v6876_v9  ;;  %v6885_v27 = vpop.permute.xlu1 %832  ;;  %5047 = vmatprep.mubr.f32.mxu0 %v1975_v0  ;;  %v604_v0 = vadd.f32 %v6287_v45, %v548_v34  ;;  %v1984_v45 = vld [vmem:[%s9104_s3 + $0x1d8] sm:$0xff] }
 0x18e   : > { %1002 = vperm.xlu1 %5467, %v5496_v40   ;;  %2462 = vmatmul.mubr.f32.gmra.mrb[48].mxu1 %v1949_v61  ;;  %v549_v61 = vmul.f32 %v6599_v16, %v6857_v36  ;;  %v5497_v40 = vld [vmem:[%s9110_s9] sm:$0xff] }
 0x18f   : > { %2466 = vmatprep.mubr.f32.mxu1 %v1953_v15  ;;  %v2111_v15 = vld [vmem:[%s9105_s4 + $0x150] sm:$0xff] }
 0x190   : > { %2319 = vperm.xlu0 %5470, %v2109_v26   ;;  %v6896_v14 = vpop.permute.xlu0 %2159  ;;  %v1956_v26 = vld [vmem:[%s9104_s3 + $0xf8] sm:$0xff]  ;;  %5048 = vmatmul.mubr.f32.gmra.mrb[32].mxu0 %v1978_v6  ;;  %v1955_v6 = vld [vmem:[%s9104_s3 + $0xf0] sm:$0xff] }
 0x191   : > { %9154 = vst [vmem:[#allocation22_spill] sm:$0xff] %v6896_v14  ;;  %5050 = vmatprep.mubr.f32.mxu0 %v1981_v54  ;;  %v550_v14 = vmul.f32 %v6618_v62, %v6857_v36  ;;  %v6937_v54 = vadd.f32 %v6580_v5, %v604_v0 }
 0x192   : > { %1044 = vperm.xlu1 %5467, %v5497_v40   ;;  %v6917_v41 = vpop.permute.xlu1 %856  ;;  %2467 = vmatmul.mubr.f32.gmra.mrb[50].mxu1 %v1952_v7  ;;  %v605_v40 = vadd.f32 %v6289_v46, %v549_v61  ;;  %v6934_v7 = vadd.f32 %v6575_v47, %v603_v52  ;;  %v5498_v46 = vld [vmem:[%s9110_s9 + $0x10] sm:$0xff]  ;;  %v1990_v47 = vld [vmem:[%s9104_s3 + $0x208] sm:$0xff]  ;;  %v1993_v52 = vld [vmem:[%s9104_s3 + $0x220] sm:$0xff] }
 0x193   : > { %2471 = vmatprep.mubr.f32.mxu1 %v1956_v26  ;;  %v1959_v26 = vld [vmem:[%s9104_s3 + $0x110] sm:$0xff]  ;;  %v652_v5 = vmul.f32 %v6526_v4, %v6937_v54 }
 0x194   : > { %2329 = vperm.xlu0 %5470, %v2111_v15   ;;  %v6925_v34 = vpop.permute.xlu0 %2169  ;;  %v2113_v15 = vld [vmem:[%s9105_s4 + $0x160] sm:$0xff]  ;;  %5051 = vmatmul.mubr.f32.gmra.mrb[34].mxu0 %v1984_v45  ;;  %v1958_v45 = vld [vmem:[%s9104_s3 + $0x108] sm:$0xff]  ;;  %v6967_v4 = vadd.f32 %v6599_v16, %v605_v40 }
 0x195   : > { %9155 = vst [vmem:[#allocation23_spill] sm:$0xff] %v6925_v34  ;;  %5053 = vmatprep.mubr.f32.mxu0 %v1987_v12  ;;  %v606_v12 = vadd.f32 %v6295_v49, %v550_v14  ;;  %v551_v14 = vmul.f32 %v6637_v22, %v6857_v36 }
 0x196   : > { %1052 = vperm.xlu1 %5467, %v5498_v46   ;;  %v6948_v61 = vpop.permute.xlu1 %864  ;;  %2472 = vmatmul.mubr.f32.gmra.mrb[52].mxu1 %v1955_v6  ;;  %v651_v46 = vmul.f32 %v6312_v56, %v6934_v7  ;;  %v2115_v6 = vld [vmem:[%s9105_s4 + $0x170] sm:$0xff]  ;;  %v1996_v56 = vld [vmem:[%s9104_s3 + $0x238] sm:$0xff]  ;;  %v653_v34 = vmul.f32 %v6318_v59, %v6967_v4  ;;  %v2002_v59 = vld [vmem:[%s9104_s3 + $0x268] sm:$0xff] }
 0x197   : > { %2476 = vmatprep.mubr.f32.mxu1 %v1959_v26  ;;  %v5499_v26 = vld [vmem:[%s9110_s9 + $0x20] sm:$0xff] }
 0x198   : > { %2339 = vperm.xlu0 %5470, %v2113_v15   ;;  %v6958_v0 = vpop.permute.xlu0 %2179  ;;  %v1962_v15 = vld [vmem:[%s9104_s3 + $0x128] sm:$0xff]  ;;  %5054 = vmatmul.mubr.f32.gmra.mrb[36].mxu0 %v1990_v47  ;;  %v659_v40 = vadd.f32 %v652_v5, %v651_v46  ;;  %v1999_v47 = vld [vmem:[%s9104_s3 + $0x250] sm:$0xff]  ;;  %v6998_v5 = vadd.f32 %v6618_v62, %v606_v12  ;;  %v1965_v46 = vld [vmem:[%s9104_s3 + $0x140] sm:$0xff]  ;;  %v607_v12 = vadd.f32 %v6297_v50, %v551_v14 }
 0x199   : > { %9156 = vst [vmem:[#allocation24_spill] sm:$0xff] %v6958_v0  ;;  %5056 = vmatprep.mubr.f32.mxu0 %v1993_v52  ;;  %v1961_v52 = vld [vmem:[%s9104_s3 + $0x120] sm:$0xff] }
 0x19a   : > { %1060 = vperm.xlu1 %5467, %v5499_v26   ;;  %v6978_v49 = vpop.permute.xlu1 %868  ;;  %2477 = vmatmul.mubr.f32.gmra.mrb[54].mxu1 %v1958_v45  ;;  %v552_v26 = vmul.f32 %v6658_v60, %v6857_v36  ;;  %v3159_v45 = vld [vmem:[%s9107_s6] sm:$0xff] }
 0x19b   : > { %2481 = vmatprep.mubr.f32.mxu1 %v1962_v15  ;;  %v660_v15 = vadd.f32 %v659_v40, %v653_v34  ;;  %v9159_v34 = vld [vmem:[#allocation14_spill] sm:$0xff] }
 0x19c   : > { %2349 = vperm.xlu0 %5470, %v2115_v6   ;;  %v6988_v0 = vpop.permute.xlu0 %2189  ;;  %5057 = vmatmul.mubr.f32.gmra.mrb[38].mxu0 %v1996_v56  ;;  %v2101_v56 = vld [vmem:[%s9105_s4 + $0x100] sm:$0xff]  ;;  %v608_v50 = vadd.f32 %v6303_v53, %v552_v26  ;;  %v654_v14 = vmul.f32 %v9159_v34, %v6998_v5  ;;  %v3161_v40 = vld [vmem:[%s9107_s6 + $0x10] sm:$0xff]  ;;  %v2008_v53 = vld [vmem:[%s9104_s3 + $0x298] sm:$0xff]  ;;  %v553_v26 = vmul.f32 %v6675_v44, %v6857_v36 }
 0x19d   : > { %9157 = vst [vmem:[#allocation25_spill] sm:$0xff] %v6988_v0  ;;  %5059 = vmatprep.mubr.f32.mxu0 %v1999_v47  ;;  %v2005_v0 = vld [vmem:[%s9104_s3 + $0x280] sm:$0xff]  ;;  %v1968_v47 = vld [vmem:[%s9104_s3 + $0x158] sm:$0xff] }
 0x19e   : > { %1068 = vperm.xlu1 %5467, %v6649_v10   ;;  %v7007_v6 = vpop.permute.xlu1 %876  ;;  %2482 = vmatmul.mubr.f32.gmra.mrb[56].mxu1 %v1961_v52  ;;  %v1964_v10 = vld [vmem:[%s9104_s3 + $0x138] sm:$0xff]  ;;  %v3163_v34 = vld [vmem:[%s9107_s6 + $0x20] sm:$0xff] }
 0x19f   : > { %2486 = vmatprep.mubr.f32.mxu1 %v1965_v46  ;;  %v661_v46 = vadd.f32 %v660_v15, %v654_v14  ;;  %v554_v15 = vmul.f32 %v6691_v55, %v6857_v36  ;;  %v1971_v14 = vld [vmem:[%s9104_s3 + $0x170] sm:$0xff]  ;;  %v2014_v36 = vld [vmem:[%s9104_s3 + $0x2c8] sm:$0xff] }
 0x1a0   : > { %3209 = vperm.xlu0 %5470, %v3159_v45   ;;  %v7016_v9 = vpop.permute.xlu0 %2199  ;;  %5060 = vmatmul.mubr.f32.gmra.mrb[40].mxu0 %v2002_v59  ;;  %v7042_v45 = vadd.f32 %v6637_v22, %v607_v12  ;;  %v2103_v12 = vld [vmem:[%s9105_s4 + $0x110] sm:$0xff] }
 0x1a1   : > { %9158 = vst [vmem:[#allocation26_spill] sm:$0xff] %v7016_v9  ;;  %5062 = vmatprep.mubr.f32.mxu0 %v2005_v0  ;;  %v1967_v0 = vld [vmem:[%s9104_s3 + $0x150] sm:$0xff] }
 0x1a2   : > { %5469 = vset.pattern.permute.xlu1 %v9148_v51  ;;  %v7034_v52 = vpop.permute.xlu1 %884  ;;  %2487 = vmatmul.mubr.f32.gmra.mrb[58].mxu1 %v1964_v10  ;;  %v2011_v51 = vld [vmem:[%s9104_s3 + $0x2b0] sm:$0xff]  ;;  %v7058_v10 = vadd.f32 %v6658_v60, %v608_v50  ;;  %v9162_v50 = vld [vmem:[#allocation12_spill] sm:$0xff] }
 0x1a3   : > { %2279 = vperm.xlu1 %5469, %v2101_v56   ;;  %2491 = vmatprep.mubr.f32.mxu1 %v1968_v47  ;;  %v655_v56 = vmul.f32 %v6543_v63, %v7042_v45  ;;  %v609_v47 = vadd.f32 %v9162_v50, %v553_v26  ;;  %v2017_v63 = vld [vmem:[%s9104_s3 + $0x2e0] sm:$0xff]  ;;  %v9164_v26 = vld [vmem:[#allocation13_spill] sm:$0xff]  ;;  %v2020_v50 = vld [vmem:[%s9104_s3 + $0x2f8] sm:$0xff] }
 0x1a4   : > { %3219 = vperm.xlu0 %5470, %v3161_v40   ;;  %v7047_v59 = vpop.permute.xlu0 %2209  ;;  %5063 = vmatmul.mubr.f32.gmra.mrb[42].mxu0 %v2008_v53  ;;  %v1970_v53 = vld [vmem:[%s9104_s3 + $0x168] sm:$0xff] }
 0x1a5   : > { %9160 = vst [vmem:[#allocation14_spill] sm:$0xff] %v7047_v59  ;;  %5065 = vmatprep.mubr.f32.mxu0 %v2011_v51  ;;  %v662_v59 = vadd.f32 %v661_v46, %v655_v56  ;;  %v2104_v51 = vld [vmem:[%s9105_s4 + $0x118] sm:$0xff]  ;;  %v610_v46 = vadd.f32 %v9164_v26, %v554_v15  ;;  %v3165_v56 = vld [vmem:[%s9107_s6 + $0x30] sm:$0xff]  ;;  %v7100_v15 = vadd.f32 %v6675_v44, %v609_v47  ;;  %v2106_v47 = vld [vmem:[%s9105_s4 + $0x128] sm:$0xff] }
 0x1a6   : > { %v7068_v40 = vpop.permute.xlu1 %926  ;;  %2492 = vmatmul.mubr.f32.gmra.mrb[60].mxu1 %v1967_v0  ;;  %v9165_v0 = vld [vmem:[#allocation15_spill] sm:$0xff] }
 0x1a7   : > { %9161 = vst [vmem:[#allocation27_spill] sm:$0xff] %v7068_v40  ;;  %2289 = vperm.xlu1 %5469, %v2103_v12   ;;  %2496 = vmatprep.mubr.f32.mxu1 %v1971_v14  ;;  %v656_v12 = vmul.f32 %v9165_v0, %v7058_v10  ;;  %v2023_v0 = vld [vmem:[%s9104_s3 + $0x310] sm:$0xff] }
 0x1a8   : > { %3229 = vperm.xlu0 %5470, %v3163_v34   ;;  %v7077_v9 = vpop.permute.xlu0 %2219  ;;  %v1974_v34 = vld [vmem:[%s9104_s3 + $0x188] sm:$0xff]  ;;  %5066 = vmatmul.mubr.f32.gmra.mrb[44].mxu0 %v2014_v36  ;;  %v1973_v36 = vld [vmem:[%s9104_s3 + $0x180] sm:$0xff] }
 0x1a9   : > { %9163 = vst [vmem:[#allocation12_spill] sm:$0xff] %v7077_v9  ;;  %5068 = vmatprep.mubr.f32.mxu0 %v2017_v63  ;;  %v663_v26 = vadd.f32 %v662_v59, %v656_v12  ;;  %v7114_v59 = vadd.f32 %v6691_v55, %v610_v46  ;;  %v657_v63 = vmul.f32 %v6558_v11, %v7100_v15  ;;  %v2026_v46 = vld [vmem:[%s9104_s3 + $0x328] sm:$0xff]  ;;  %v2029_v11 = vld [vmem:[%s9104_s3 + $0x340] sm:$0xff] }
 0x1aa   : > { %v7094_v14 = vpop.permute.xlu1 %934  ;;  %2497 = vmatmul.mubr.f32.gmra.mrb[62].mxu1 %v1970_v53  ;;  %v3167_v53 = vld [vmem:[%s9107_s6 + $0x40] sm:$0xff] }
 0x1ab   : > { %9166 = vst [vmem:[#allocation13_spill] sm:$0xff] %v7094_v14  ;;  %2294 = vperm.xlu1 %5469, %v2104_v51   ;;  %2501 = vmatprep.mubr.f32.mxu1 %v1974_v34  ;;  %v1977_v51 = vld [vmem:[%s9104_s3 + $0x1a0] sm:$0xff] }
 0x1ac   : > { %3239 = vperm.xlu0 %5470, %v3165_v56   ;;  %v7105_v9 = vpop.permute.xlu0 %2229  ;;  %5069 = vmatmul.mubr.f32.gmra.mrb[46].mxu0 %v2020_v50  ;;  %v664_v56 = vadd.f32 %v663_v26, %v657_v63  ;;  %v1976_v50 = vld [vmem:[%s9104_s3 + $0x198] sm:$0xff]  ;;  %v9170_v26 = vld [vmem:[#allocation16_spill] sm:$0xff] }
 0x1ad   : > { %9167 = vst [vmem:[#allocation15_spill] sm:$0xff] %v7105_v9  ;;  %5071 = vmatprep.mubr.f32.mxu0 %v2023_v0  ;;  %v2108_v0 = vld [vmem:[%s9105_s4 + $0x138] sm:$0xff] }
 0x1ae   : > { %v7124_v12 = vpop.permute.xlu1 %942  ;;  %2502 = vmatmul.mubr.f32.gmra.mrb[64].mxu1 %v1973_v36  ;;  %v658_v36 = vmul.f32 %v9170_v26, %v7114_v59  ;;  %v1980_v63 = vld [vmem:[%s9104_s3 + $0x1b8] sm:$0xff]  ;;  %v2035_v26 = vld [vmem:[%s9104_s3 + $0x370] sm:$0xff] }
 0x1af   : > { %9168 = vst [vmem:[#allocation28_spill] sm:$0xff] %v7124_v12  ;;  %2304 = vperm.xlu1 %5469, %v2106_v47   ;;  %2506 = vmatprep.mubr.f32.mxu1 %v1977_v51  ;;  %v3169_v47 = vld [vmem:[%s9107_s6 + $0x50] sm:$0xff] }
 0x1b0   : > { %3249 = vperm.xlu0 %5470, %v3167_v53   ;;  %v7132_v34 = vpop.permute.xlu0 %2239  ;;  %5072 = vmatmul.mubr.f32.gmra.mrb[48].mxu0 %v2026_v46  ;;  %v2032_v53 = vld [vmem:[%s9104_s3 + $0x358] sm:$0xff]  ;;  %v665_v51 = vadd.f32 %v664_v56, %v658_v36  ;;  %v1979_v46 = vld [vmem:[%s9104_s3 + $0x1b0] sm:$0xff]  ;;  %v2110_v56 = vld [vmem:[%s9105_s4 + $0x148] sm:$0xff] }
 0x1b1   : > { %9169 = vst [vmem:[#allocation29_spill] sm:$0xff] %v7132_v34  ;;  %5074 = vmatprep.mubr.f32.mxu0 %v2029_v11  ;;  %v3171_v11 = vld [vmem:[%s9107_s6 + $0x60] sm:$0xff]  ;;  %v2047_v12 = vld [vmem:[%s9104_s3 + $0x3d0] sm:$0xff] }
 0x1b2   : > { %2507 = vmatmul.mubr.f32.gmra.mrb[66].mxu1 %v1976_v50  ;;  %v1983_v50 = vld [vmem:[%s9104_s3 + $0x1d0] sm:$0xff]  ;;  %v666_v36 = vrot.slane %v665_v51, 4 }
 0x1b3   : > { %2314 = vperm.xlu1 %5469, %v2108_v0   ;;  %v7151_v34 = vpop.permute.xlu1 %2119  ;;  %2511 = vmatprep.mubr.f32.mxu1 %v1980_v63  ;;  %v2038_v0 = vld [vmem:[%s9104_s3 + $0x388] sm:$0xff]  ;;  %v2041_v63 = vld [vmem:[%s9104_s3 + $0x3a0] sm:$0xff] }
 0x1b4   : > { %3259 = vperm.xlu0 %5470, %v3169_v47   ;;  %v7156_v9 = vpop.permute.xlu0 %2249  ;;  %5075 = vmatmul.mubr.f32.gmra.mrb[50].mxu0 %v2032_v53  ;;  %v1982_v53 = vld [vmem:[%s9104_s3 + $0x1c8] sm:$0xff] }
 0x1b5   : > { %9171 = vst [vmem:[#allocation16_spill] sm:$0xff] %v7156_v9  ;;  %5077 = vmatprep.mubr.f32.mxu0 %v2035_v26  ;;  %v2112_v26 = vld [vmem:[%s9105_s4 + $0x158] sm:$0xff] }
 0x1b6   : > { %2512 = vmatmul.mubr.f32.gmra.mrb[68].mxu1 %v1979_v46  ;;  %v3173_v46 = vld [vmem:[%s9107_s6 + $0x70] sm:$0xff] }
 0x1b7   : > { %2324 = vperm.xlu1 %5469, %v2110_v56   ;;  %v7173_v47 = vpop.permute.xlu1 %2129  ;;  %2516 = vmatprep.mubr.f32.mxu1 %v1983_v50  ;;  %v1986_v56 = vld [vmem:[%s9104_s3 + $0x1e8] sm:$0xff]  ;;  %v667_v50 = vadd.f32 %v666_v36, %v665_v51  ;;  %v3175_v36 = vld [vmem:[%s9107_s6 + $0x80] sm:$0xff] }
 0x1b8   : > { %9172 = vst [vmem:[#allocation30_spill] sm:$0xff] %v7173_v47  ;;  %3269 = vperm.xlu0 %5470, %v3171_v11   ;;  %v7178_v9 = vpop.permute.xlu0 %2259  ;;  %5078 = vmatmul.mubr.f32.gmra.mrb[52].mxu0 %v2038_v0  ;;  %v2044_v11 = vld [vmem:[%s9104_s3 + $0x3b8] sm:$0xff]  ;;  %v1985_v0 = vld [vmem:[%s9104_s3 + $0x1e0] sm:$0xff]  ;;  %v2114_v51 = vld [vmem:[%s9105_s4 + $0x168] sm:$0xff] }
 0x1b9   : > { %9173 = vst [vmem:[#allocation31_spill] sm:$0xff] %v7178_v9  ;;  %5080 = vmatprep.mubr.f32.mxu0 %v2041_v63  ;;  %v1989_v63 = vld [vmem:[%s9104_s3 + $0x200] sm:$0xff] }
 0x1ba   : > { %2517 = vmatmul.mubr.f32.gmra.mrb[70].mxu1 %v1982_v53  ;;  %v2050_v53 = vld [vmem:[%s9104_s3 + $0x3e8] sm:$0xff] }
 0x1bb   : > { %2334 = vperm.xlu1 %5469, %v2112_v26   ;;  %v7195_v9 = vpop.permute.xlu1 %2134  ;;  %2521 = vmatprep.mubr.f32.mxu1 %v1986_v56  ;;  %v668_v26 = vrot.slane %v667_v50, 2  ;;  %v2053_v56 = vld [vmem:[%s9104_s3 + $0x400] sm:$0xff] }
 0x1bc   : > { %9174 = vst [vmem:[#allocation32_spill] sm:$0xff] %v7195_v9  ;;  %3279 = vperm.xlu0 %5470, %v3173_v46   ;;  %v7200_v14 = vpop.permute.xlu0 %2269  ;;  %5081 = vmatmul.mubr.f32.gmra.mrb[54].mxu0 %v2044_v11  ;;  %v1988_v11 = vld [vmem:[%s9104_s3 + $0x1f8] sm:$0xff]  ;;  %v1997_v9 = vld [vmem:[%s9104_s3 + $0x240] sm:$0xff] }
 0x1bd   : > { %9175 = vst [vmem:[#allocation33_spill] sm:$0xff] %v7200_v14  ;;  %5083 = vmatprep.mubr.f32.mxu0 %v2047_v12  ;;  %v2116_v12 = vld [vmem:[%s9105_s4 + $0x178] sm:$0xff] }
 0x1be   : > { %2522 = vmatmul.mubr.f32.gmra.mrb[72].mxu1 %v1985_v0  ;;  %v3177_v0 = vld [vmem:[%s9107_s6 + $0x90] sm:$0xff] }
 0x1bf   : > { %2344 = vperm.xlu1 %5469, %v2114_v51   ;;  %v7217_v46 = vpop.permute.xlu1 %2144  ;;  %2526 = vmatprep.mubr.f32.mxu1 %v1989_v63  ;;  %v1992_v51 = vld [vmem:[%s9104_s3 + $0x218] sm:$0xff]  ;;  %v669_v63 = vadd.f32 %v668_v26, %v667_v50  ;;  %v3179_v50 = vld [vmem:[%s9107_s6 + $0xa0] sm:$0xff]  ;;  %v1995_v26 = vld [vmem:[%s9104_s3 + $0x230] sm:$0xff] }
 0x1c0   : > { %9176 = vst [vmem:[#allocation34_spill] sm:$0xff] %v7217_v46  ;;  %3289 = vperm.xlu0 %5470, %v3175_v36   ;;  %5084 = vmatmul.mubr.f32.gmra.mrb[56].mxu0 %v2050_v53  ;;  %v2056_v36 = vld [vmem:[%s9104_s3 + $0x418] sm:$0xff]  ;;  %v2059_v46 = vld [vmem:[%s9104_s3 + $0x430] sm:$0xff] }
 0x1c1   : > { %v7228_v14 = vpop.permute.xlu0 %860  ;;  %5086 = vmatprep.mubr.f32.mxu0 %v2053_v56  ;;  %v1991_v53 = vld [vmem:[%s9104_s3 + $0x210] sm:$0xff]  ;;  %v3160_v56 = vld [vmem:[%s9107_s6 + $0x8] sm:$0xff] }
 0x1c2   : > { %2527 = vmatmul.mubr.f32.gmra.mrb[74].mxu1 %v1988_v11  ;;  %v2062_v11 = vld [vmem:[%s9104_s3 + $0x448] sm:$0xff] }
 0x1c3   : > { %2354 = vperm.xlu1 %5469, %v2116_v12   ;;  %v7239_v40 = vpop.permute.xlu1 %2154  ;;  %2531 = vmatprep.mubr.f32.mxu1 %v1992_v51  ;;  %v670_v12 = vrot.slane %v669_v63, 1  ;;  %v2065_v51 = vld [vmem:[%s9104_s3 + $0x460] sm:$0xff] }
 0x1c4   : > { %9177 = vst [vmem:[#allocation35_spill] sm:$0xff] %v7239_v40  ;;  %3299 = vperm.xlu0 %5470, %v3177_v0   ;;  %5087 = vmatmul.mubr.f32.gmra.mrb[58].mxu0 %v2056_v36  ;;  %v1994_v36 = vld [vmem:[%s9104_s3 + $0x228] sm:$0xff] }
 0x1c5   : > { %v7250_v1 = vpop.permute.xlu0 %872  ;;  %5089 = vmatprep.mubr.f32.mxu0 %v2059_v46  ;;  %v3162_v46 = vld [vmem:[%s9107_s6 + $0x18] sm:$0xff] }
 0x1c6   : > { %2532 = vmatmul.mubr.f32.gmra.mrb[76].mxu1 %v1991_v53  ;;  %v3181_v53 = vld [vmem:[%s9107_s6 + $0xb0] sm:$0xff] }
 0x1c7   : > { %3214 = vperm.xlu1 %5469, %v3160_v56   ;;  %v7261_v0 = vpop.permute.xlu1 %2164  ;;  %2536 = vmatprep.mubr.f32.mxu1 %v1995_v26  ;;  %v1998_v56 = vld [vmem:[%s9104_s3 + $0x248] sm:$0xff]  ;;  %v671_v26 = vadd.f32 %v670_v12, %v669_v63  ;;  %v2001_v63 = vld [vmem:[%s9104_s3 + $0x260] sm:$0xff] }
 0x1c8   : > { %9178 = vst [vmem:[#allocation36_spill] sm:$0xff] %v7261_v0  ;;  %3309 = vperm.xlu0 %5470, %v3179_v50   ;;  %5090 = vmatmul.mubr.f32.gmra.mrb[60].mxu0 %v2062_v11  ;;  %v2068_v50 = vld [vmem:[%s9104_s3 + $0x478] sm:$0xff]  ;;  %v679_v0 = vrot.slane %v6571_v2, %v6808_v57  ;;  %v3164_v11 = vld [vmem:[%s9107_s6 + $0x28] sm:$0xff]  ;;  %v3183_v2 = vld [vmem:[%s9107_s6 + $0xc0] sm:$0xff] }
 0x1c9   : > { %v7272_v40 = vpop.permute.xlu0 %880  ;;  %5092 = vmatprep.mubr.f32.mxu0 %v2065_v51 }
 0x1ca   : > { %2537 = vmatmul.mubr.f32.gmra.mrb[78].mxu1 %v1994_v36  ;;  %v7301_v12 = vadd.f32 %v679_v0, %v671_v26  ;;  %v3185_v0 = vld [vmem:[%s9107_s6 + $0xd0] sm:$0xff] }
 0x1cb   : > { %3224 = vperm.xlu1 %5469, %v3162_v46   ;;  %v7285_v24 = vpop.permute.xlu1 %2174  ;;  %2541 = vmatprep.mubr.f32.mxu1 %v1998_v56  ;;  %v2000_v46 = vld [vmem:[%s9104_s3 + $0x258] sm:$0xff] }
 0x1cc   : > { %9179 = vst [vmem:[#allocation37_spill] sm:$0xff] %v7285_v24  ;;  %3319 = vperm.xlu0 %5470, %v3181_v53   ;;  %5093 = vmatmul.mubr.f32.gmra.mrb[62].mxu0 %v2068_v50  ;;  %v3166_v53 = vld [vmem:[%s9107_s6 + $0x38] sm:$0xff]  ;;  %v7320_v50 = vld [vmem:[%s5804_s16 + $0x8] sm:$0xff] }
 0x1cd   : > { %v7293_v51 = vpop.permute.xlu0 %909  ;;  %v682_v26 = vmul.f32 %v7320_v50, %v7301_v12  ;;  %v3168_v24 = vld [vmem:[%s9107_s6 + $0x48] sm:$0xff] }
 0x1ce   : > { %9180 = vst [vmem:[#allocation38_spill] sm:$0xff] %v7293_v51  ;;  %2542 = vmatmul.mubr.f32.gmra.mrb[80].mxu1 %v1997_v9  ;;  %v2004_v9 = vld [vmem:[%s9104_s3 + $0x278] sm:$0xff] }
 0x1cf   : > { %3234 = vperm.xlu1 %5469, %v3164_v11   ;;  %v7303_v36 = vpop.permute.xlu1 %2184  ;;  %2546 = vmatprep.mubr.f32.mxu1 %v2001_v63  ;;  %v7325_v11 = vld [vmem:[%s5804_s16] sm:$0xff] }
 0x1d0   : > { %9181 = vst [vmem:[#allocation39_spill] sm:$0xff] %v7303_v36  ;;  %3329 = vperm.xlu0 %5470, %v3183_v2   ;;  %v681_v2 = vmul.f32 %v7325_v11, %v7301_v12  ;;  %v2003_v36 = vld [vmem:[%s9104_s3 + $0x270] sm:$0xff] }
 0x1d1   : > { %v7311_v56 = vpop.permute.xlu0 %930 }
 0x1d2   : > { %9182 = vst [vmem:[#allocation40_spill] sm:$0xff] %v7311_v56  ;;  %2547 = vmatmul.mubr.f32.gmra.mrb[82].mxu1 %v2000_v46  ;;  %v683_v56 = vmul.f32 %v6599_v16, %v7301_v12  ;;  %v3187_v46 = vld [vmem:[%s9107_s6 + $0xe0] sm:$0xff] }
 0x1d3   : > { %3244 = vperm.xlu1 %5469, %v3166_v53   ;;  %v7329_v63 = vpop.permute.xlu1 %2194  ;;  %2551 = vmatprep.mubr.f32.mxu1 %v2004_v9  ;;  %v2007_v53 = vld [vmem:[%s9104_s3 + $0x290] sm:$0xff]  ;;  %v684_v9 = vmul.f32 %v6618_v62, %v7301_v12  ;;  %v2010_v62 = vld [vmem:[%s9104_s3 + $0x2a8] sm:$0xff] }
 0x1d4   : > { %9183 = vst [vmem:[#allocation41_spill] sm:$0xff] %v7329_v63  ;;  %3339 = vperm.xlu0 %5470, %v3185_v0   ;;  %v722_v0 = vadd.f32 %v6595_v29, %v682_v26  ;;  %v9185_v63 = vld [vmem:[#allocation17_spill] sm:$0xff]  ;;  %v723_v29 = vadd.f32 %v6614_v23, %v683_v56  ;;  %v685_v56 = vmul.f32 %v6637_v22, %v7301_v12  ;;  %v3191_v22 = vld [vmem:[%s9107_s6 + $0x100] sm:$0xff] }
 0x1d5   : > { %v7339_v51 = vpop.permute.xlu0 %938  ;;  %v721_v47 = vadd.f32 %v9185_v63, %v681_v2 }
 0x1d6   : > { %9184 = vst [vmem:[#allocation42_spill] sm:$0xff] %v7339_v51  ;;  %2552 = vmatmul.mubr.f32.gmra.mrb[84].mxu1 %v2003_v36  ;;  %v2006_v51 = vld [vmem:[%s9104_s3 + $0x288] sm:$0xff]  ;;  %v724_v36 = vadd.f32 %v6655_v42, %v684_v9  ;;  %v7370_v2 = vadd.f32 %v722_v0, %v6937_v54 }
 0x1d7   : > { %3254 = vperm.xlu1 %5469, %v3168_v24   ;;  %v7351_v16 = vpop.permute.xlu1 %2204  ;;  %2556 = vmatprep.mubr.f32.mxu1 %v2007_v53  ;;  %v3189_v24 = vld [vmem:[%s9107_s6 + $0xf0] sm:$0xff]  ;;  %v7373_v63 = vadd.f32 %v721_v47, %v6934_v7  ;;  %v3172_v42 = vld [vmem:[%s9107_s6 + $0x68] sm:$0xff]  ;;  %v686_v47 = vmul.f32 %v6658_v60, %v7301_v12  ;;  %v2013_v53 = vld [vmem:[%s9104_s3 + $0x2c0] sm:$0xff] }
 0x1d8   : > { %3349 = vperm.xlu0 %5470, %v3187_v46   ;;  %v2009_v46 = vld [vmem:[%s9104_s3 + $0x2a0] sm:$0xff]  ;;  %v7406_v0 = vadd.f32 %v724_v36, %v6998_v5  ;;  %v2012_v60 = vld [vmem:[%s9104_s3 + $0x2b8] sm:$0xff]  ;;  %v3193_v5 = vld [vmem:[%s9107_s6 + $0x110] sm:$0xff] }
 0x1d9   : > { %v7360_v26 = vpop.permute.xlu0 %946  ;;  %v769_v7 = vmul.f32 %v6709_v43, %v7373_v63  ;;  %v770_v43 = vmul.f32 %v6670_v33, %v7370_v2 }
 0x1da   : > { %2557 = vmatmul.mubr.f32.gmra.mrb[86].mxu1 %v2006_v51  ;;  %v725_v51 = vadd.f32 %v6672_v18, %v685_v56  ;;  %v3174_v18 = vld [vmem:[%s9107_s6 + $0x78] sm:$0xff] }
 0x1db   : > { %3264 = vperm.xlu1 %5469, %v3170_v31   ;;  %v7375_v23 = vpop.permute.xlu1 %2214  ;;  %2561 = vmatprep.mubr.f32.mxu1 %v2010_v62  ;;  %v7388_v31 = vadd.f32 %v723_v29, %v6967_v4  ;;  %v777_v33 = vadd.f32 %v770_v43, %v769_v7  ;;  %v2016_v29 = vld [vmem:[%s9104_s3 + $0x2d8] sm:$0xff]  ;;  %v726_v62 = vadd.f32 %v6633_v28, %v686_v47  ;;  %v3195_v7 = vld [vmem:[%s9107_s6 + $0x120] sm:$0xff] }
 0x1dc   : > { %3359 = vperm.xlu0 %5470, %v3189_v24   ;;  %v7428_v36 = vadd.f32 %v725_v51, %v7042_v45  ;;  %v687_v28 = vmul.f32 %v6675_v44, %v7301_v12  ;;  %v688_v47 = vmul.f32 %v6691_v55, %v7301_v12  ;;  %v2018_v55 = vld [vmem:[%s9104_s3 + $0x2e8] sm:$0xff] }
 0x1dd   : > { %v7390_v54 = vpop.permute.xlu0 %950  ;;  %v771_v4 = vmul.f32 %v6730_v8, %v7388_v31  ;;  %v772_v8 = vmul.f32 %v6750_v13, %v7406_v0  ;;  %v7454_v44 = vadd.f32 %v726_v62, %v7058_v10  ;;  %v3197_v10 = vld [vmem:[%s9107_s6 + $0x130] sm:$0xff] }
 0x1de   : > { %2562 = vmatmul.mubr.f32.gmra.mrb[88].mxu1 %v2009_v46  ;;  %v2015_v46 = vld [vmem:[%s9104_s3 + $0x2d0] sm:$0xff]  ;;  %v773_v43 = vmul.f32 %v6686_v32, %v7428_v36 }
 0x1df   : > { %3274 = vperm.xlu1 %5469, %v3172_v42   ;;  %v7408_v9 = vpop.permute.xlu1 %2224  ;;  %2566 = vmatprep.mubr.f32.mxu1 %v2013_v53  ;;  %v778_v56 = vadd.f32 %v777_v33, %v771_v4  ;;  %v3176_v42 = vld [vmem:[%s9107_s6 + $0x88] sm:$0xff]  ;;  %v727_v53 = vadd.f32 %v6688_v35, %v687_v28  ;;  %v3178_v35 = vld [vmem:[%s9107_s6 + $0x98] sm:$0xff]  ;;  %v774_v32 = vmul.f32 %v6771_v38, %v7454_v44  ;;  %v2021_v38 = vld [vmem:[%s9104_s3 + $0x300] sm:$0xff] }
 0x1e0   : > { %3369 = vperm.xlu0 %5470, %v3191_v22   ;;  %v2019_v22 = vld [vmem:[%s9104_s3 + $0x2f0] sm:$0xff]  ;;  %v728_v33 = vadd.f32 %v6652_v21, %v688_v47  ;;  %v3199_v21 = vld [vmem:[%s9107_s6 + $0x140] sm:$0xff]  ;;  %v2028_v47 = vld [vmem:[%s9104_s3 + $0x338] sm:$0xff] }
 0x1e1   : > { %v779_v45 = vadd.f32 %v778_v56, %v772_v8  ;;  %v7476_v8 = vadd.f32 %v727_v53, %v7100_v15  ;;  %v2025_v15 = vld [vmem:[%s9104_s3 + $0x320] sm:$0xff] }
 0x1e2   : > { %v7424_v24 = vpop.permute.xlu0 %978  ;;  %2567 = vmatmul.mubr.f32.gmra.mrb[90].mxu1 %v2012_v60  ;;  %v2022_v60 = vld [vmem:[%s9104_s3 + $0x308] sm:$0xff] }
 0x1e3   : > { %3284 = vperm.xlu1 %5469, %v3174_v18   ;;  %v7430_v13 = vpop.permute.xlu1 %2234  ;;  %2571 = vmatprep.mubr.f32.mxu1 %v2016_v29  ;;  %v780_v12 = vadd.f32 %v779_v45, %v773_v43  ;;  %v3180_v29 = vld [vmem:[%s9107_s6 + $0xa8] sm:$0xff]  ;;  %v2024_v45 = vld [vmem:[%s9104_s3 + $0x318] sm:$0xff] }
 0x1e4   : > { %3379 = vperm.xlu0 %5470, %v3193_v5  }
 0x1e5   : > { %v781_v62 = vadd.f32 %v780_v12, %v774_v32  ;;  %v3203_v32 = vld [vmem:[%s9107_s6 + $0x160] sm:$0xff]  ;;  %v2031_v12 = vld [vmem:[%s9104_s3 + $0x350] sm:$0xff] }
 0x1e6   : > { %v7448_v51 = vpop.permute.xlu0 %990  ;;  %2572 = vmatmul.mubr.f32.gmra.mrb[92].mxu1 %v2015_v46  ;;  %v775_v46 = vmul.f32 %v6701_v17, %v7476_v8 }
 0x1e7   : > { %3294 = vperm.xlu1 %5469, %v3176_v42   ;;  %v7456_v4 = vpop.permute.xlu1 %2244  ;;  %2576 = vmatprep.mubr.f32.mxu1 %v2019_v22  ;;  %v7497_v42 = vadd.f32 %v728_v33, %v7114_v59  ;;  %v3201_v59 = vld [vmem:[%s9107_s6 + $0x150] sm:$0xff]  ;;  %v2030_v33 = vld [vmem:[%s9104_s3 + $0x348] sm:$0xff] }
 0x1e8   : > { %9186 = vst [vmem:[#allocation17_spill] sm:$0xff] %v7456_v4  ;;  %3389 = vperm.xlu0 %5470, %v3195_v7   ;;  %v3182_v7 = vld [vmem:[%s9107_s6 + $0xb8] sm:$0xff]  ;;  %v782_v22 = vadd.f32 %v781_v62, %v775_v46  ;;  %v3205_v62 = vld [vmem:[%s9107_s6 + $0x170] sm:$0xff]  ;;  %v2033_v46 = vld [vmem:[%s9104_s3 + $0x360] sm:$0xff] }
 0x1e9   : > { %v776_v17 = vmul.f32 %v6789_v48, %v7497_v42  ;;  %v2027_v48 = vld [vmem:[%s9104_s3 + $0x330] sm:$0xff] }
 0x1ea   : > { %v7472_v18 = vpop.permute.xlu0 %998  ;;  %2577 = vmatmul.mubr.f32.gmra.mrb[94].mxu1 %v2018_v55  ;;  %v3184_v55 = vld [vmem:[%s9107_s6 + $0xc8] sm:$0xff] }
 0x1eb   : > { %3304 = vperm.xlu1 %5469, %v3178_v35   ;;  %v7478_v5 = vpop.permute.xlu1 %2254  ;;  %2581 = vmatprep.mubr.f32.mxu1 %v2022_v60  ;;  %v783_v35 = vadd.f32 %v782_v22, %v776_v17  ;;  %v4105_v22 = vld [vmem:[%s9111_s10] sm:$0xff] }
 0x1ec   : > { %9187 = vst [vmem:[#allocation43_spill] sm:$0xff] %v7478_v5  ;;  %3399 = vperm.xlu0 %5470, %v3197_v10  }
 0x1ee   : > { %v7492_v56 = vpop.permute.xlu0 %1027  ;;  %2582 = vmatmul.mubr.f32.gmra.mrb[96].mxu1 %v2021_v38  ;;  %v3186_v38 = vld [vmem:[%s9107_s6 + $0xd8] sm:$0xff] }
 0x1ef   : > { %3314 = vperm.xlu1 %5469, %v3180_v29   ;;  %v7499_v28 = vpop.permute.xlu1 %2264  ;;  %2586 = vmatprep.mubr.f32.mxu1 %v2025_v15  ;;  %v784_v29 = vrot.slane %v783_v35, 4 }
 0x1f0   : > { %9188 = vst [vmem:[#allocation44_spill] sm:$0xff] %v7499_v28  ;;  %3409 = vperm.xlu0 %5470, %v3199_v21   ;;  %v2034_v21 = vld [vmem:[%s9104_s3 + $0x368] sm:$0xff] }
 0x1f2   : > { %v7515_v53 = vpop.permute.xlu0 %1048  ;;  %2587 = vmatmul.mubr.f32.gmra.mrb[98].mxu1 %v2024_v45  ;;  %v3188_v45 = vld [vmem:[%s9107_s6 + $0xe8] sm:$0xff] }
 0x1f3   : > { %3324 = vperm.xlu1 %5469, %v3182_v7   ;;  %v7517_v43 = vpop.permute.xlu1 %2274  ;;  %2591 = vmatprep.mubr.f32.mxu1 %v2028_v47  ;;  %v785_v7 = vadd.f32 %v784_v29, %v783_v35  ;;  %v2039_v29 = vld [vmem:[%s9104_s3 + $0x390] sm:$0xff] }
 0x1f4   : > { %9189 = vst [vmem:[#allocation45_spill] sm:$0xff] %v7517_v43  ;;  %3419 = vperm.xlu0 %5470, %v3201_v59   ;;  %v2037_v59 = vld [vmem:[%s9104_s3 + $0x380] sm:$0xff]  ;;  %v7677_v43 = vld [vmem:[%s5804_s16 + $0x10] sm:$0xff] }
 0x1f5   : > { %v786_v35 = vrot.slane %v785_v7, 2 }
 0x1f6   : > { %v7531_v10 = vpop.permute.xlu0 %1056  ;;  %2592 = vmatmul.mubr.f32.gmra.mrb[100].mxu1 %v2027_v48  ;;  %v2036_v48 = vld [vmem:[%s9104_s3 + $0x378] sm:$0xff] }
 0x1f7   : > { %9190 = vst [vmem:[#allocation46_spill] sm:$0xff] %v7531_v10  ;;  %3334 = vperm.xlu1 %5469, %v3184_v55   ;;  %2596 = vmatprep.mubr.f32.mxu1 %v2031_v12  ;;  %v3190_v55 = vld [vmem:[%s9107_s6 + $0xf8] sm:$0xff]  ;;  %v4107_v12 = vld [vmem:[%s9111_s10 + $0x10] sm:$0xff] }
 0x1f8   : > { %v7533_v60 = vpop.permute.xlu1 %954  ;;  %3429 = vperm.xlu0 %5470, %v3203_v32  }
 0x1fa   : > { %v7547_v15 = vpop.permute.xlu0 %1064  ;;  %2597 = vmatmul.mubr.f32.gmra.mrb[102].mxu1 %v2030_v33  ;;  %v2040_v33 = vld [vmem:[%s9104_s3 + $0x398] sm:$0xff] }
 0x1fb   : > { %9191 = vst [vmem:[#allocation47_spill] sm:$0xff] %v7547_v15  ;;  %3344 = vperm.xlu1 %5469, %v3186_v38   ;;  %2601 = vmatprep.mubr.f32.mxu1 %v2034_v21  ;;  %v787_v21 = vadd.f32 %v786_v35, %v785_v7  ;;  %v2042_v7 = vld [vmem:[%s9104_s3 + $0x3a8] sm:$0xff] }
 0x1fc   : > { %3439 = vperm.xlu0 %5470, %v3205_v62   ;;  %v3192_v62 = vld [vmem:[%s9107_s6 + $0x108] sm:$0xff] }
 0x1fd   : > { %v7555_v17 = vpop.permute.xlu1 %974 }
 0x1fe   : > { %v7563_v47 = vpop.permute.xlu0 %1072  ;;  %2602 = vmatmul.mubr.f32.gmra.mrb[104].mxu1 %v2033_v46 }
 0x1ff   : > { %9192 = vst [vmem:[#allocation48_spill] sm:$0xff] %v7563_v47  ;;  %3354 = vperm.xlu1 %5469, %v3188_v45   ;;  %2606 = vmatprep.mubr.f32.mxu1 %v2037_v59  ;;  %v4109_v45 = vld [vmem:[%s9111_s10 + $0x20] sm:$0xff] }
 0x200   : > { %4115 = vperm.xlu0 %5470, %v4105_v22   ;;  %v2043_v22 = vld [vmem:[%s9104_s3 + $0x3b0] sm:$0xff] }
 0x201   : > { %v7571_v32 = vpop.permute.xlu1 %982 }
 0x202   : > { %2607 = vmatmul.mubr.f32.gmra.mrb[106].mxu1 %v2036_v48  ;;  %v3194_v48 = vld [vmem:[%s9107_s6 + $0x118] sm:$0xff] }
 0x203   : > { %3364 = vperm.xlu1 %5469, %v3190_v55   ;;  %v7579_v38 = vpop.permute.xlu0 %2284  ;;  %2611 = vmatprep.mubr.f32.mxu1 %v2040_v33  ;;  %v788_v55 = vrot.slane %v787_v21, 1  ;;  %v2046_v33 = vld [vmem:[%s9104_s3 + $0x3c8] sm:$0xff] }
 0x204   : > { %9193 = vst [vmem:[#allocation49_spill] sm:$0xff] %v7579_v38  ;;  %4125 = vperm.xlu0 %5470, %v4107_v12   ;;  %v4174_v12 = vld [vmem:[%s9112_s11] sm:$0xff] }
 0x205   : > { %v7587_v46 = vpop.permute.xlu1 %986  ;;  %v789_v47 = vadd.f32 %v788_v55, %v787_v21  ;;  %v3198_v21 = vld [vmem:[%s9107_s6 + $0x138] sm:$0xff] }
 0x206   : > { %2612 = vmatmul.mubr.f32.gmra.mrb[108].mxu1 %v2039_v29 }
 0x207   : > { %3374 = vperm.xlu1 %5469, %v3192_v62   ;;  %v7595_v59 = vpop.permute.xlu0 %2299  ;;  %2616 = vmatprep.mubr.f32.mxu1 %v2043_v22  ;;  %v2045_v62 = vld [vmem:[%s9104_s3 + $0x3c0] sm:$0xff]  ;;  %v797_v22 = vrot.slane %v6722_v19, %v6808_v57  ;;  %v2048_v19 = vld [vmem:[%s9104_s3 + $0x3d8] sm:$0xff] }
 0x208   : > { %9194 = vst [vmem:[#allocation50_spill] sm:$0xff] %v7595_v59  ;;  %4135 = vperm.xlu0 %5470, %v4109_v45   ;;  %v3196_v45 = vld [vmem:[%s9107_s6 + $0x128] sm:$0xff] }
 0x209   : > { %v7603_v35 = vpop.permute.xlu1 %994  ;;  %v7637_v55 = vadd.f32 %v797_v22, %v789_v47  ;;  %v2051_v47 = vld [vmem:[%s9104_s3 + $0x3f0] sm:$0xff]  ;;  %v3200_v22 = vld [vmem:[%s9107_s6 + $0x148] sm:$0xff] }
 0x20a   : > { %2617 = vmatmul.mubr.f32.gmra.mrb[110].mxu1 %v2042_v7  ;;  %v4176_v7 = vld [vmem:[%s9112_s11 + $0x10] sm:$0xff] }
 0x20b   : > { %3384 = vperm.xlu1 %5469, %v3194_v48   ;;  %v7611_v29 = vpop.permute.xlu0 %2309  ;;  %2621 = vmatprep.mubr.f32.mxu1 %v2046_v33  ;;  %v2049_v48 = vld [vmem:[%s9104_s3 + $0x3e0] sm:$0xff] }
 0x20c   : > { %9195 = vst [vmem:[#allocation51_spill] sm:$0xff] %v7611_v29  ;;  %4224 = vperm.xlu0 %5470, %v4174_v12   ;;  %v3202_v29 = vld [vmem:[%s9107_s6 + $0x158] sm:$0xff] }
 0x20d   : > { %v7621_v59 = vpop.permute.xlu1 %1002 }
 0x20e   : > { %2622 = vmatmul.mubr.f32.gmra.mrb[112].mxu1 %v2045_v62  ;;  %v4178_v62 = vld [vmem:[%s9112_s11 + $0x20] sm:$0xff] }
 0x20f   : > { %3394 = vperm.xlu1 %5469, %v3196_v45   ;;  %v7629_v12 = vpop.permute.xlu0 %2319  ;;  %2626 = vmatprep.mubr.f32.mxu1 %v2049_v48  ;;  %v2052_v45 = vld [vmem:[%s9104_s3 + $0x3f8] sm:$0xff]  ;;  %v799_v48 = vmul.f32 %v7325_v11, %v7637_v55 }
 0x210   : > { %9196 = vst [vmem:[#allocation52_spill] sm:$0xff] %v7629_v12  ;;  %4234 = vperm.xlu0 %5470, %v4176_v7   ;;  %v2054_v12 = vld [vmem:[%s9104_s3 + $0x408] sm:$0xff] }
 0x211   : > { %v7639_v33 = vpop.permute.xlu1 %1044  ;;  %v839_v38 = vadd.f32 %v6810_v20, %v799_v48  ;;  %v3204_v48 = vld [vmem:[%s9107_s6 + $0x168] sm:$0xff] }
 0x212   : > { %2627 = vmatmul.mubr.f32.gmra.mrb[114].mxu1 %v2048_v19  ;;  %v800_v19 = vmul.f32 %v7320_v50, %v7637_v55 }
 0x213   : > { %3404 = vperm.xlu1 %5469, %v3198_v21   ;;  %v7647_v7 = vpop.permute.xlu0 %2329  ;;  %2631 = vmatprep.mubr.f32.mxu1 %v2052_v45  ;;  %v2055_v45 = vld [vmem:[%s9104_s3 + $0x410] sm:$0xff]  ;;  %v7700_v28 = vadd.f32 %v839_v38, %v7373_v63  ;;  %v2060_v38 = vld [vmem:[%s9104_s3 + $0x438] sm:$0xff] }
 0x214   : > { %9197 = vst [vmem:[#allocation53_spill] sm:$0xff] %v7647_v7  ;;  %4244 = vperm.xlu0 %5470, %v4178_v62   ;;  %v4180_v62 = vld [vmem:[%s9112_s11 + $0x30] sm:$0xff] }
 0x215   : > { %v7659_v21 = vpop.permute.xlu1 %1052 }
 0x216   : > { %9198 = vst [vmem:[#allocation54_spill] sm:$0xff] %v7659_v21  ;;  %2632 = vmatmul.mubr.f32.gmra.mrb[116].mxu1 %v2051_v47  ;;  %v801_v47 = vmul.f32 %v7677_v43, %v7637_v55 }
 0x217   : > { %3414 = vperm.xlu1 %5469, %v3200_v22   ;;  %v7667_v7 = vpop.permute.xlu0 %2339  ;;  %2636 = vmatprep.mubr.f32.mxu1 %v2055_v45  ;;  %v840_v22 = vadd.f32 %v6742_v25, %v800_v19  ;;  %v2058_v45 = vld [vmem:[%s9104_s3 + $0x428] sm:$0xff]  ;;  %v2057_v25 = vld [vmem:[%s9104_s3 + $0x420] sm:$0xff] }
 0x218   : > { %9199 = vst [vmem:[#allocation55_spill] sm:$0xff] %v7667_v7  ;;  %4254 = vperm.xlu0 %5470, %v4180_v62   ;;  %v4182_v62 = vld [vmem:[%s9112_s11 + $0x40] sm:$0xff]  ;;  %v841_v19 = vadd.f32 %v6835_v30, %v801_v47  ;;  %v3206_v47 = vld [vmem:[%s9107_s6 + $0x178] sm:$0xff] }
 0x219   : > { %v7682_v7 = vpop.permute.xlu1 %1060 }
 0x21a   : > { %9200 = vst [vmem:[#allocation56_spill] sm:$0xff] %v7682_v7  ;;  %2637 = vmatmul.mubr.f32.gmra.mrb[118].mxu1 %v2054_v12  ;;  %v7703_v12 = vadd.f32 %v840_v22, %v7370_v2  ;;  %v887_v22 = vmul.f32 %v6917_v41, %v7700_v28 }
 0x21b   : > { %3424 = vperm.xlu1 %5469, %v3202_v29   ;;  %v7690_v20 = vpop.permute.xlu0 %2349  ;;  %2641 = vmatprep.mubr.f32.mxu1 %v2058_v45  ;;  %v2061_v45 = vld [vmem:[%s9104_s3 + $0x440] sm:$0xff] }
 0x21c   : > { %9201 = vst [vmem:[#allocation57_spill] sm:$0xff] %v7690_v20  ;;  %4264 = vperm.xlu0 %5470, %v4182_v62   ;;  %v4184_v62 = vld [vmem:[%s9112_s11 + $0x50] sm:$0xff]  ;;  %v7714_v20 = vld [vmem:[%s5804_s16 + $0x18] sm:$0xff]  ;;  %v888_v2 = vmul.f32 %v7228_v14, %v7703_v12 }
 0x21d   : > { %v7705_v29 = vpop.permute.xlu1 %1068  ;;  %v802_v30 = vmul.f32 %v7714_v20, %v7637_v55  ;;  %v4186_v14 = vld [vmem:[%s9112_s11 + $0x60] sm:$0xff] }
 0x21e   : > { %9202 = vst [vmem:[#allocation58_spill] sm:$0xff] %v7705_v29  ;;  %2642 = vmatmul.mubr.f32.gmra.mrb[120].mxu1 %v2057_v25  ;;  %v7731_v29 = vadd.f32 %v841_v19, %v7388_v31  ;;  %v2064_v25 = vld [vmem:[%s9104_s3 + $0x458] sm:$0xff]  ;;  %v895_v19 = vadd.f32 %v888_v2, %v887_v22  ;;  %v7764_v2 = vld [vmem:[%s5804_s16 + $0x28] sm:$0xff] }
 0x21f   : > { %3434 = vperm.xlu1 %5469, %v3204_v48   ;;  %v7720_v63 = vpop.permute.xlu0 %3209  ;;  %2646 = vmatprep.mubr.f32.mxu1 %v2061_v45  ;;  %v842_v31 = vadd.f32 %v6759_v3, %v802_v30  ;;  %v4188_v3 = vld [vmem:[%s9112_s11 + $0x70] sm:$0xff] }
 0x220   : > { %9203 = vst [vmem:[#allocation59_spill] sm:$0xff] %v7720_v63  ;;  %4274 = vperm.xlu0 %5470, %v4184_v62   ;;  %v7742_v62 = vld [vmem:[%s5804_s16 + $0x20] sm:$0xff]  ;;  %v2063_v63 = vld [vmem:[%s9104_s3 + $0x450] sm:$0xff]  ;;  %v889_v5 = vmul.f32 %v6948_v61, %v7731_v29 }
 0x221   : > { %9205 = vst [vmem:[#allocation61_spill] sm:$0xff] %v7742_v62  ;;  %v803_v41 = vmul.f32 %v7742_v62, %v7637_v55  ;;  %v2067_v30 = vld [vmem:[%s9104_s3 + $0x470] sm:$0xff]  ;;  %v7772_v61 = vadd.f32 %v842_v31, %v7406_v0  ;;  %v4190_v0 = vld [vmem:[%s9112_s11 + $0x80] sm:$0xff] }
 0x222   : > { %v7739_v48 = vpop.permute.xlu1 %2279  ;;  %2647 = vmatmul.mubr.f32.gmra.mrb[122].mxu1 %v2060_v38  ;;  %v804_v38 = vmul.f32 %v7764_v2, %v7637_v55 }
 0x223   : > { %9204 = vst [vmem:[#allocation60_spill] sm:$0xff] %v7739_v48  ;;  %3444 = vperm.xlu1 %5469, %v3206_v47   ;;  %v7747_v45 = vpop.permute.xlu0 %3219  ;;  %2651 = vmatprep.mubr.f32.mxu1 %v2064_v25  ;;  %v4106_v48 = vld [vmem:[%s9111_s10 + $0x8] sm:$0xff]  ;;  %v843_v22 = vadd.f32 %v6859_v37, %v803_v41  ;;  %v890_v37 = vmul.f32 %v6978_v49, %v7772_v61 }
 0x224   : > { %9206 = vst [vmem:[#allocation62_spill] sm:$0xff] %v7747_v45  ;;  %4284 = vperm.xlu0 %5470, %v4186_v14   ;;  %v896_v14 = vadd.f32 %v895_v19, %v889_v5  ;;  %v2066_v45 = vld [vmem:[%s9104_s3 + $0x468] sm:$0xff]  ;;  %v7788_v5 = vld [vmem:[%s5804_s16 + $0x30] sm:$0xff]  ;;  %v844_v41 = vadd.f32 %v6780_v58, %v804_v38 }
 0x225   : > { %v7796_v31 = vadd.f32 %v843_v22, %v7428_v36  ;;  %v4192_v58 = vld [vmem:[%s9112_s11 + $0x90] sm:$0xff]  ;;  %v7811_v36 = vld [vmem:[%s5804_s16 + $0x38] sm:$0xff] }
 0x226   : > { %v7768_v47 = vpop.permute.xlu1 %2289  ;;  %2652 = vmatmul.mubr.f32.gmra.mrb[124].mxu1 %v2063_v63  ;;  %v805_v63 = vmul.f32 %v7788_v5, %v7637_v55  ;;  %v897_v19 = vadd.f32 %v896_v14, %v890_v37  ;;  %v7817_v22 = vadd.f32 %v844_v41, %v7454_v44 }
 0x227   : > { %9207 = vst [vmem:[#allocation63_spill] sm:$0xff] %v7768_v47  ;;  %4120 = vperm.xlu1 %5469, %v4106_v48   ;;  %v7774_v25 = vpop.permute.xlu0 %3229  ;;  %2656 = vmatprep.mubr.f32.mxu1 %v2067_v30  ;;  %v4108_v47 = vld [vmem:[%s9111_s10 + $0x18] sm:$0xff]  ;;  %v891_v30 = vmul.f32 %v7250_v1, %v7796_v31  ;;  %v4175_v1 = vld [vmem:[%s9112_s11 + $0x8] sm:$0xff] }
 0x228   : > { %9208 = vst [vmem:[#allocation64_spill] sm:$0xff] %v7774_v25  ;;  %4294 = vperm.xlu0 %5470, %v4188_v3   ;;  %v4110_v3 = vld [vmem:[%s9111_s10 + $0x28] sm:$0xff] }
 0x229   : > { %v898_v14 = vadd.f32 %v897_v19, %v891_v30  ;;  %v4196_v30 = vld [vmem:[%s9112_s11 + $0xb0] sm:$0xff] }
 0x22a   : > { %v7792_v48 = vpop.permute.xlu1 %2294  ;;  %2657 = vmatmul.mubr.f32.gmra.mrb[126].mxu1 %v2066_v45  ;;  %v806_v45 = vmul.f32 %v7811_v36, %v7637_v55  ;;  %v4194_v55 = vld [vmem:[%s9112_s11 + $0xa0] sm:$0xff] }
 0x22b   : > { %9209 = vst [vmem:[#allocation65_spill] sm:$0xff] %v7792_v48  ;;  %4130 = vperm.xlu1 %5469, %v4108_v47   ;;  %v7798_v49 = vpop.permute.xlu0 %3239  ;;  %v845_v47 = vadd.f32 %v6885_v27, %v805_v63 }
 0x22c   : > { %9210 = vst [vmem:[#allocation66_spill] sm:$0xff] %v7798_v49  ;;  %4304 = vperm.xlu0 %5470, %v4190_v0   ;;  %v892_v0 = vmul.f32 %v7007_v6, %v7817_v22  ;;  %v846_v44 = vadd.f32 %v6800_v39, %v806_v45  ;;  %v4177_v6 = vld [vmem:[%s9112_s11 + $0x18] sm:$0xff] }
 0x22d   : > { %v7833_v63 = vadd.f32 %v845_v47, %v7476_v8  ;;  %v4179_v47 = vld [vmem:[%s9112_s11 + $0x28] sm:$0xff] }
 0x22e   : > { %v7808_v38 = vpop.permute.xlu1 %2304  ;;  %v899_v41 = vadd.f32 %v898_v14, %v892_v0  ;;  %v7848_v8 = vadd.f32 %v846_v44, %v7497_v42  ;;  %v4198_v14 = vld [vmem:[%s9112_s11 + $0xc0] sm:$0xff]  ;;  %v4200_v44 = vld [vmem:[%s9112_s11 + $0xd0] sm:$0xff] }
 0x22f   : > { %9211 = vst [vmem:[#allocation67_spill] sm:$0xff] %v7808_v38  ;;  %4140 = vperm.xlu1 %5469, %v4110_v3   ;;  %v7819_v37 = vpop.permute.xlu0 %3249  ;;  %v893_v3 = vmul.f32 %v7272_v40, %v7833_v63 }
 0x230   : > { %9212 = vst [vmem:[#allocation68_spill] sm:$0xff] %v7819_v37  ;;  %4314 = vperm.xlu0 %5470, %v4192_v58   ;;  %v894_v40 = vmul.f32 %v7034_v52, %v7848_v8 }
 0x231   : > { %v900_v58 = vadd.f32 %v899_v41, %v893_v3  ;;  %v4183_v3 = vld [vmem:[%s9112_s11 + $0x48] sm:$0xff] }
 0x232   : > { %v7829_v27 = vpop.permute.xlu1 %2314 }
 0x233   : > { %9213 = vst [vmem:[#allocation69_spill] sm:$0xff] %v7829_v27  ;;  %4229 = vperm.xlu1 %5469, %v4175_v1   ;;  %v7835_v19 = vpop.permute.xlu0 %3259  ;;  %v901_v42 = vadd.f32 %v900_v58, %v894_v40  ;;  %v4202_v58 = vld [vmem:[%s9112_s11 + $0xe0] sm:$0xff] }
 0x234   : > { %9214 = vst [vmem:[#allocation70_spill] sm:$0xff] %v7835_v19  ;;  %4324 = vperm.xlu0 %5470, %v4194_v55   ;;  %v4181_v55 = vld [vmem:[%s9112_s11 + $0x38] sm:$0xff] }
 0x235   : > { %v902_v41 = vrot.slane %v901_v42, 4 }
 0x236   : > { %v7845_v39 = vpop.permute.xlu1 %2324 }
 0x237   : > { %9215 = vst [vmem:[#allocation71_spill] sm:$0xff] %v7845_v39  ;;  %4239 = vperm.xlu1 %5469, %v4177_v6   ;;  %v7850_v45 = vpop.permute.xlu0 %3269  ;;  %v903_v49 = vadd.f32 %v902_v41, %v901_v42 }
 0x238   : > { %9216 = vst [vmem:[#allocation72_spill] sm:$0xff] %v7850_v45  ;;  %4334 = vperm.xlu0 %5470, %v4196_v30  }
 0x239   : > { %v904_v41 = vrot.slane %v903_v49, 2 }
 0x23a   : > { %v7860_v1 = vpop.permute.xlu1 %2334 }
 0x23b   : > { %9217 = vst [vmem:[#allocation73_spill] sm:$0xff] %v7860_v1  ;;  %4249 = vperm.xlu1 %5469, %v4179_v47   ;;  %v7862_v0 = vpop.permute.xlu0 %3279 }
 0x23c   : > { %9218 = vst [vmem:[#allocation74_spill] sm:$0xff] %v7862_v0  ;;  %4344 = vperm.xlu0 %5470, %v4198_v14  }
 0x23e   : > { %v7870_v52 = vpop.permute.xlu1 %2344 }
 0x23f   : > { %9219 = vst [vmem:[#allocation75_spill] sm:$0xff] %v7870_v52  ;;  %4259 = vperm.xlu1 %5469, %v4181_v55   ;;  %v7872_v6 = vpop.permute.xlu0 %3289 }
 0x240   : > { %9220 = vst [vmem:[#allocation76_spill] sm:$0xff] %v7872_v6  ;;  %4354 = vperm.xlu0 %5470, %v4200_v44   ;;  %v4185_v6 = vld [vmem:[%s9112_s11 + $0x58] sm:$0xff] }
 0x241   : > { %v2423_v30 = vpop.f32.mrb[32].mxu1 }
 0x242   : > { %v2424_v47 = vadd.f32 %v2423_v30, %v7151_v34  ;;  %v7881_v40 = vpop.permute.xlu1 %2354  ;;  %v2425_v14 = vpop.f32.mrb[33].mxu1  ;;  %v4204_v34 = vld [vmem:[%s9112_s11 + $0xf0] sm:$0xff]  ;;  %v9223_v30 = vld [vmem:[#allocation19_spill] sm:$0xff] }
 0x243   : > { %9221 = vst [vmem:[#allocation77_spill] sm:$0xff] %v7881_v40  ;;  %v5025_v25 = vpop.f32.mrb[16].mxu0  ;;  %4269 = vperm.xlu1 %5469, %v4183_v3   ;;  %v7883_v55 = vpop.permute.xlu0 %3299 }
 0x244   : > { %9222 = vst [vmem:[#allocation78_spill] sm:$0xff] %v7883_v55  ;;  %v2728_v44 = vpop.f32.mrb[17].mxu0  ;;  %4364 = vperm.xlu0 %5470, %v4202_v58   ;;  %v4187_v58 = vld [vmem:[%s9112_s11 + $0x68] sm:$0xff] }
 0x245   : > { %v2729_v0 = vadd.f32 %v2728_v44, %v2424_v47  ;;  %v2428_v45 = vpop.f32.mrb[34].mxu1 }
 0x246   : > { %v2429_v19 = vadd.f32 %v2428_v45, %v9223_v30  ;;  %v7892_v14 = vpop.permute.xlu1 %3214  ;;  %v2430_v42 = vpop.f32.mrb[35].mxu1  ;;  %v4206_v45 = vld [vmem:[%s9112_s11 + $0x100] sm:$0xff] }
 0x247   : > { %9224 = vst [vmem:[#allocation19_spill] sm:$0xff] %v7892_v14  ;;  %4279 = vperm.xlu1 %5469, %v4185_v6   ;;  %v5028_v3 = vpop.f32.mrb[18].mxu0  ;;  %v7897_v44 = vpop.permute.xlu0 %3309  ;;  %v2967_v30 = vmax.f32 %v2729_v0, 0.0  ;;  %v9226_v42 = vld [vmem:[#allocation30_spill] sm:$0xff]  ;;  %v3016_v0 = vld [vmem:[%s9106_s5 + $0x8] sm:$0xff] }
 0x248   : > { %v2734_v55 = vadd.f32 %v5025_v25, %v2429_v19  ;;  %4374 = vperm.xlu0 %5470, %v4204_v34   ;;  %v2738_v47 = vpop.f32.mrb[19].mxu0  ;;  %9225 = vst [vmem:[#allocation79_spill] sm:$0xff] %v7897_v44  ;;  %v905_v19 = vadd.f32 %v904_v41, %v903_v49  ;;  %v4189_v44 = vld [vmem:[%s9112_s11 + $0x78] sm:$0xff]  ;;  %3511 = vmatprep.mubr.f32.mxu0 %v3016_v0  ;;  %v9228_v49 = vld [vmem:[#allocation32_spill] sm:$0xff] }
 0x249   : > { %v2433_v37 = vpop.f32.mrb[36].mxu1 }
 0x24a   : > { %v2968_v14 = vmax.f32 %v2734_v55, 0.0  ;;  %v2434_v40 = vadd.f32 %v2433_v37, %v9226_v42  ;;  %v7903_v6 = vpop.permute.xlu1 %3224  ;;  %v2435_v25 = vpop.f32.mrb[37].mxu1  ;;  %v4208_v37 = vld [vmem:[%s9112_s11 + $0x110] sm:$0xff] }
 0x24b   : > { %9227 = vst [vmem:[#allocation30_spill] sm:$0xff] %v7903_v6  ;;  %4289 = vperm.xlu1 %5469, %v4187_v58   ;;  %v5031_v34 = vpop.f32.mrb[20].mxu0  ;;  %v906_v58 = vrot.slane %v905_v19, 1  ;;  %v4191_v25 = vld [vmem:[%s9112_s11 + $0x88] sm:$0xff] }
 0x24c   : > { %v5296_v52 = vpack.c.bf16 %v2968_v14, %v2967_v30  ;;  %v2739_v1 = vadd.f32 %v2738_v47, %v2434_v40  ;;  %4384 = vperm.xlu0 %5470, %v4206_v45   ;;  %v2748_v39 = vpop.f32.mrb[21].mxu0  ;;  %v7917_v47 = vpop.permute.xlu0 %3319  ;;  %v9231_v45 = vmov 0.0|0.0  }
 0x24d   : > { %v2438_v55 = vpop.f32.mrb[38].mxu1  ;;  %9230 = vst [vmem:[#allocation80_spill] sm:$0xff] %v7917_v47  ;;  %v907_v27 = vadd.f32 %v906_v58, %v905_v19  ;;  %v4212_v19 = vld [vmem:[%s9112_s11 + $0x130] sm:$0xff] }
 0x24e   : > { %v2439_v41 = vadd.f32 %v2438_v55, %v9228_v49  ;;  %v7915_v14 = vpop.permute.xlu1 %3234  ;;  %v2440_v40 = vpop.f32.mrb[39].mxu1  ;;  %5297 = vmatpush1.bf16.msra.mxu0 %v5296_v52  ;;  %v4210_v52 = vld [vmem:[%s9112_s11 + $0x120] sm:$0xff]  ;;  %v2969_v49 = vmax.f32 %v2739_v1, 0.0  ;;  %v4193_v1 = vld [vmem:[%s9112_s11 + $0x98] sm:$0xff] }
 0x24f   : > { %9229 = vst [vmem:[#allocation32_spill] sm:$0xff] %v7915_v14  ;;  %4299 = vperm.xlu1 %5469, %v4189_v44   ;;  %5298 = vmatprep.subr.bf16.mxu0 %v9231_v45  ;;  %v7920_v30 = vpop.f32.mrb[22].mxu0  ;;  %v9232_v14 = vld [vmem:[#allocation20_spill] sm:$0xff]  ;;  %v9236_v58 = vld [vmem:[#allocation34_spill] sm:$0xff] }
 0x250   : > { %v2744_v42 = vadd.f32 %v5028_v3, %v2439_v41  ;;  %4394 = vperm.xlu0 %5470, %v4208_v37   ;;  %v2758_v0 = vpop.f32.mrb[23].mxu0  ;;  %v9234_v3 = vld [vmem:[#allocation38_spill] sm:$0xff] }
 0x251   : > { %v2443_v55 = vpop.f32.mrb[40].mxu1  ;;  %v915_v37 = vrot.slane %v9234_v3, %v6808_v57 }
 0x252   : > { %v2970_v40 = vmax.f32 %v2744_v42, 0.0  ;;  %v2444_v44 = vadd.f32 %v2443_v55, %v9232_v14  ;;  %v7929_v6 = vpop.permute.xlu1 %3244  ;;  %v2445_v47 = vpop.f32.mrb[41].mxu1 }
 0x253   : > { %9233 = vst [vmem:[#allocation20_spill] sm:$0xff] %v7929_v6  ;;  %4309 = vperm.xlu1 %5469, %v4191_v25   ;;  %v7933_v41 = vpop.f32.mrb[24].mxu0  ;;  %v7940_v14 = vpop.permute.xlu0 %3329 }
 0x254   : > { %v5299_v38 = vpack.c.bf16 %v2970_v40, %v2969_v49  ;;  %v2749_v48 = vadd.f32 %v2748_v39, %v2444_v44  ;;  %4404 = vperm.xlu0 %5470, %v4210_v52   ;;  %v7938_v42 = vpop.f32.mrb[25].mxu0  ;;  %9235 = vst [vmem:[#allocation38_spill] sm:$0xff] %v7940_v14  ;;  %v7948_v39 = vadd.f32 %v915_v37, %v907_v27  ;;  %v4195_v44 = vld [vmem:[%s9112_s11 + $0xa8] sm:$0xff] }
 0x255   : > { %v2448_v55 = vpop.f32.mrb[42].mxu1 }
 0x256   : > { %v2449_v47 = vadd.f32 %v2448_v55, %v9236_v58  ;;  %v7946_v25 = vpop.permute.xlu1 %3254  ;;  %v2450_v49 = vpop.f32.mrb[43].mxu1  ;;  %5300 = vmatpush1.bf16.msra.mxu0 %v5299_v38  ;;  %v4214_v38 = vld [vmem:[%s9112_s11 + $0x140] sm:$0xff]  ;;  %v2971_v27 = vmax.f32 %v2749_v48, 0.0  ;;  %v4197_v48 = vld [vmem:[%s9112_s11 + $0xb8] sm:$0xff] }
 0x257   : > { %9237 = vst [vmem:[#allocation34_spill] sm:$0xff] %v7946_v25  ;;  %4319 = vperm.xlu1 %5469, %v4193_v1   ;;  %5301 = vmatprep.subr.bf16.mxu0 %v9231_v45  ;;  %v7951_v52 = vpop.f32.mrb[26].mxu0  ;;  %v9238_v1 = vld [vmem:[#allocation21_spill] sm:$0xff] }
 0x258   : > { %v2754_v40 = vadd.f32 %v5031_v34, %v2449_v47  ;;  %4414 = vperm.xlu0 %5470, %v4212_v19   ;;  %v7956_v3 = vpop.f32.mrb[27].mxu0  ;;  %v918_v34 = vmul.f32 %v7320_v50, %v7948_v39  ;;  %v917_v19 = vmul.f32 %v7325_v11, %v7948_v39  ;;  %v7968_v47 = vpop.permute.xlu0 %3339  ;;  %v919_v50 = vmul.f32 %v7677_v43, %v7948_v39  ;;  %v4216_v11 = vld [vmem:[%s9112_s11 + $0x150] sm:$0xff] }
 0x259   : > { %v2453_v55 = vpop.f32.mrb[44].mxu1  ;;  %9240 = vst [vmem:[#allocation81_spill] sm:$0xff] %v7968_v47 }
 0x25a   : > { %v2972_v37 = vmax.f32 %v2754_v40, 0.0  ;;  %v2454_v58 = vadd.f32 %v2453_v55, %v9238_v1  ;;  %v7962_v49 = vpop.permute.xlu1 %3264  ;;  %v2455_v6 = vpop.f32.mrb[45].mxu1  ;;  %v9241_v55 = vld [vmem:[#allocation35_spill] sm:$0xff] }
 0x25b   : > { %9239 = vst [vmem:[#allocation21_spill] sm:$0xff] %v7962_v49  ;;  %4329 = vperm.xlu1 %5469, %v4195_v44   ;;  %v7970_v14 = vpop.f32.mrb[28].mxu0  ;;  %v920_v44 = vmul.f32 %v7714_v20, %v7948_v39 }
 0x25c   : > { %v5302_v25 = vpack.c.bf16 %v2972_v37, %v2971_v27  ;;  %v2759_v15 = vadd.f32 %v2758_v0, %v2454_v58  ;;  %4424 = vperm.xlu0 %5470, %v4214_v38   ;;  %v7975_v40 = vpop.f32.mrb[29].mxu0  ;;  %v9243_v37 = vld [vmem:[#allocation40_spill] sm:$0xff]  ;;  %v9244_v58 = vld [vmem:[#allocation27_spill] sm:$0xff] }
 0x25d   : > { %v2458_v6 = vpop.f32.mrb[46].mxu1  ;;  %v958_v1 = vadd.f32 %v9243_v37, %v918_v34  ;;  %v957_v47 = vadd.f32 %v9244_v58, %v917_v19  ;;  %v9245_v34 = vld [vmem:[#allocation13_spill] sm:$0xff]  ;;  %v8001_v19 = vpop.permute.xlu0 %3349  ;;  %v4218_v37 = vld [vmem:[%s9112_s11 + $0x160] sm:$0xff] }
 0x25e   : > { %v2459_v0 = vadd.f32 %v2458_v6, %v9241_v55  ;;  %v7985_v38 = vpop.permute.xlu1 %3274  ;;  %v2460_v27 = vpop.f32.mrb[47].mxu1  ;;  %5303 = vmatpush1.bf16.msra.mxu0 %v5302_v25  ;;  %v4199_v6 = vld [vmem:[%s9112_s11 + $0xc8] sm:$0xff]  ;;  %v921_v25 = vmul.f32 %v7742_v62, %v7948_v39  ;;  %9246 = vst [vmem:[#allocation40_spill] sm:$0xff] %v8001_v19 }
 0x25f   : > { %9242 = vst [vmem:[#allocation35_spill] sm:$0xff] %v7985_v38  ;;  %4339 = vperm.xlu1 %5469, %v4197_v48   ;;  %5304 = vmatprep.subr.bf16.mxu0 %v9231_v45  ;;  %v7990_v49 = vpop.f32.mrb[30].mxu0  ;;  %v959_v27 = vadd.f32 %v9245_v34, %v919_v50  ;;  %v9248_v38 = vld [vmem:[#allocation22_spill] sm:$0xff]  ;;  %v8011_v62 = vadd.f32 %v958_v1, %v7703_v12 }
 0x260   : > { %v2764_v4 = vadd.f32 %v7920_v30, %v2459_v0  ;;  %4434 = vperm.xlu0 %5470, %v4216_v11   ;;  %v7996_v55 = vpop.f32.mrb[31].mxu0  ;;  %v9247_v30 = vld [vmem:[#allocation42_spill] sm:$0xff]  ;;  %v2973_v0 = vmax.f32 %v2759_v15, 0.0  ;;  %v8014_v50 = vadd.f32 %v957_v47, %v7700_v28 }
 0x261   : > { %v2463_v48 = vpop.f32.mrb[48].mxu1  ;;  %v960_v11 = vadd.f32 %v9247_v30, %v920_v44  ;;  %v8025_v12 = vadd.f32 %v959_v27, %v7731_v29  ;;  %v4111_v28 = vld [vmem:[%s9111_s10 + $0x30] sm:$0xff]  ;;  %v8044_v27 = vpop.permute.xlu0 %3359 }
 0x262   : > { %v2974_v58 = vmax.f32 %v2764_v4, 0.0  ;;  %v2464_v7 = vadd.f32 %v2463_v48, %v9248_v38  ;;  %v8008_v10 = vpop.permute.xlu1 %3284  ;;  %v2465_v21 = vpop.f32.mrb[49].mxu1  ;;  %v4201_v4 = vld [vmem:[%s9112_s11 + $0xd8] sm:$0xff]  ;;  %9250 = vst [vmem:[#allocation27_spill] sm:$0xff] %v8044_v27  ;;  %v9251_v48 = vld [vmem:[#allocation36_spill] sm:$0xff] }
 0x263   : > { %4349 = vperm.xlu1 %5469, %v4199_v6   ;;  %v8020_v15 = vpop.f32.mrb[32].mxu0  ;;  %v1005_v21 = vmul.f32 %v7555_v17, %v8014_v50  ;;  %v8036_v38 = vadd.f32 %v960_v11, %v7772_v61  ;;  %v1006_v17 = vmul.f32 %v7424_v24, %v8011_v62  ;;  %v1007_v29 = vmul.f32 %v7571_v32, %v8025_v12  ;;  %v4203_v61 = vld [vmem:[%s9112_s11 + $0xe8] sm:$0xff] }
 0x264   : > { %v5305_v34 = vpack.c.bf16 %v2974_v58, %v2973_v0  ;;  %v2769_v19 = vadd.f32 %v7938_v42, %v2464_v7  ;;  %4444 = vperm.xlu0 %5470, %v4218_v37   ;;  %v8030_v47 = vpop.f32.mrb[33].mxu0  ;;  %v922_v7 = vmul.f32 %v7764_v2, %v7948_v39  ;;  %v9249_v42 = vld [vmem:[#allocation28_spill] sm:$0xff]  ;;  %v4112_v0 = vld [vmem:[%s9111_s10 + $0x38] sm:$0xff] }
 0x265   : > { %v961_v44 = vadd.f32 %v9249_v42, %v921_v25  ;;  %v2468_v1 = vpop.f32.mrb[50].mxu1  ;;  %v1013_v11 = vadd.f32 %v1006_v17, %v1005_v21  ;;  %v1008_v24 = vmul.f32 %v7587_v46, %v8036_v38  ;;  %v9252_v46 = vld [vmem:[#allocation23_spill] sm:$0xff] }
 0x266   : > { %v8038_v6 = vpop.permute.xlu1 %3294  ;;  %5306 = vmatpush1.bf16.msra.mxu0 %v5305_v34  ;;  %v2469_v37 = vadd.f32 %v2468_v1, %v9251_v48  ;;  %v2470_v30 = vpop.f32.mrb[51].mxu1  ;;  %v962_v34 = vadd.f32 %v7360_v26, %v922_v7  ;;  %v2975_v1 = vmax.f32 %v2769_v19, 0.0  ;;  %v923_v26 = vmul.f32 %v7788_v5, %v7948_v39 }
 0x267   : > { %4359 = vperm.xlu1 %5469, %v4201_v4   ;;  %5307 = vmatprep.subr.bf16.mxu0 %v9231_v45  ;;  %v8051_v25 = vpop.f32.mrb[34].mxu0  ;;  %v8063_v4 = vadd.f32 %v961_v44, %v7796_v31  ;;  %v1014_v21 = vadd.f32 %v1013_v11, %v1007_v29  ;;  %v8075_v7 = vpop.permute.xlu0 %3369  ;;  %v4564_v29 = vld [vmem:[#allocation2] sm:$0x1] }
 0x268   : > { %4145 = vperm.xlu0 %5470, %v4111_v28   ;;  %v2774_v32 = vadd.f32 %v7933_v41, %v2469_v37  ;;  %v8059_v58 = vpop.f32.mrb[35].mxu0  ;;  %v4205_v37 = vld [vmem:[%s9112_s11 + $0xf8] sm:$0xff]  ;;  %9253 = vst [vmem:[#allocation13_spill] sm:$0xff] %v8075_v7 }
 0x269   : > { %v2473_v28 = vpop.f32.mrb[52].mxu1  ;;  %v1015_v31 = vadd.f32 %v1014_v21, %v1008_v24  ;;  %v4207_v21 = vld [vmem:[%s9112_s11 + $0x108] sm:$0xff] }
 0x26a   : > { %v8065_v42 = vpop.permute.xlu1 %3304  ;;  %v2976_v17 = vmax.f32 %v2774_v32, 0.0  ;;  %v2474_v48 = vadd.f32 %v2473_v28, %v9252_v46  ;;  %v2475_v41 = vpop.f32.mrb[53].mxu1  ;;  %v8085_v28 = vadd.f32 %v962_v34, %v7817_v22  ;;  %v9254_v46 = vld [vmem:[#allocation37_spill] sm:$0xff] }
 0x26b   : > { %4369 = vperm.xlu1 %5469, %v4203_v61   ;;  %v8071_v30 = vpop.f32.mrb[36].mxu0 }
 0x26c   : > { %4150 = vperm.xlu0 %5470, %v4112_v0   ;;  %v5308_v44 = vpack.c.bf16 %v2976_v17, %v2975_v1  ;;  %v2779_v19 = vadd.f32 %v7956_v3, %v2474_v48  ;;  %v8078_v11 = vpop.f32.mrb[37].mxu0  ;;  %v1009_v0 = vmul.f32 %v7448_v51, %v8063_v4  ;;  %v924_v3 = vmul.f32 %v7811_v36, %v7948_v39 }
 0x26d   : > { %v2478_v61 = vpop.f32.mrb[54].mxu1  ;;  %v963_v51 = vadd.f32 %v7390_v54, %v923_v26  ;;  %v1010_v22 = vmul.f32 %v7603_v35, %v8085_v28  ;;  %v4209_v35 = vld [vmem:[%s9112_s11 + $0x118] sm:$0xff] }
 0x26e   : > { %v8080_v32 = vpop.permute.xlu1 %3314  ;;  %v2479_v5 = vadd.f32 %v2478_v61, %v9254_v46  ;;  %v2480_v24 = vpop.f32.mrb[55].mxu1  ;;  %5309 = vmatpush1.bf16.msra.mxu0 %v5308_v44  ;;  %v1016_v34 = vadd.f32 %v1015_v31, %v1009_v0  ;;  %v964_v41 = vadd.f32 %v7533_v60, %v924_v3  ;;  %v2977_v44 = vmax.f32 %v2779_v19, 0.0  ;;  %v9256_v61 = vld [vmem:[#allocation24_spill] sm:$0xff] }
 0x26f   : > { %4379 = vperm.xlu1 %5469, %v4205_v37   ;;  %5310 = vmatprep.subr.bf16.mxu0 %v9231_v45  ;;  %v8094_v1 = vpop.f32.mrb[38].mxu0  ;;  %v8105_v37 = vpop.permute.xlu0 %3379  ;;  %v8114_v26 = vadd.f32 %v963_v51, %v7833_v63  ;;  %v4211_v63 = vld [vmem:[%s9112_s11 + $0x128] sm:$0xff] }
 0x270   : > { %4567 = vperm.xlu0 %5470, %v4564_v29   ;;  %v2784_v17 = vadd.f32 %v7951_v52, %v2479_v5  ;;  %v8100_v48 = vpop.f32.mrb[39].mxu0  ;;  %9255 = vst [vmem:[#allocation42_spill] sm:$0xff] %v8105_v37  ;;  %v1017_v31 = vadd.f32 %v1016_v34, %v1010_v22 }
 0x271   : > { %v2483_v36 = vpop.f32.mrb[56].mxu1  ;;  %9257 = vst [vmem:[#allocation22_spill] sm:$0xff] %v8114_v26  ;;  %v1011_v3 = vmul.f32 %v7472_v18, %v8114_v26 }
 0x272   : > { %v8102_v39 = vpop.permute.xlu1 %3324  ;;  %v2978_v29 = vmax.f32 %v2784_v17, 0.0  ;;  %v2484_v46 = vadd.f32 %v2483_v36, %v9256_v61  ;;  %v2485_v54 = vpop.f32.mrb[57].mxu1  ;;  %v9259_v17 = vld [vmem:[#allocation39_spill] sm:$0xff] }
 0x273   : > { %4389 = vperm.xlu1 %5469, %v4207_v21   ;;  %v8111_v52 = vpop.f32.mrb[40].mxu0  ;;  %v8124_v21 = vadd.f32 %v964_v41, %v7848_v8  ;;  %v1018_v18 = vadd.f32 %v1017_v31, %v1011_v3  ;;  %v8135_v22 = vpop.permute.xlu0 %3389  ;;  %v9262_v54 = vld [vmem:[#allocation25_spill] sm:$0xff] }
 0x274   : > { %v5311_v0 = vpack.c.bf16 %v2978_v29, %v2977_v44  ;;  %v2789_v60 = vadd.f32 %v7975_v40, %v2484_v46  ;;  %v8117_v5 = vpop.f32.mrb[41].mxu0  ;;  %9260 = vst [vmem:[#allocation36_spill] sm:$0xff] %v8135_v22 }
 0x275   : > { %v2488_v19 = vpop.f32.mrb[58].mxu1  ;;  %9258 = vst [vmem:[#allocation28_spill] sm:$0xff] %v8124_v21  ;;  %v1012_v51 = vmul.f32 %v7621_v59, %v8124_v21  ;;  %v4213_v59 = vld [vmem:[%s9112_s11 + $0x138] sm:$0xff] }
 0x276   : > { %v8119_v24 = vpop.permute.xlu1 %3334  ;;  %v2489_v36 = vadd.f32 %v2488_v19, %v9259_v17  ;;  %v2490_v61 = vpop.f32.mrb[59].mxu1  ;;  %5312 = vmatpush1.bf16.msra.mxu0 %v5311_v0  ;;  %v2979_v29 = vmax.f32 %v2789_v60, 0.0 }
 0x277   : > { %4399 = vperm.xlu1 %5469, %v4209_v35   ;;  %5313 = vmatprep.subr.bf16.mxu0 %v9231_v45  ;;  %v8131_v40 = vpop.f32.mrb[42].mxu0  ;;  %v1019_v19 = vadd.f32 %v1018_v18, %v1012_v51  ;;  %v8153_v60 = vpop.permute.xlu0 %3399 }
 0x278   : > { %v2794_v8 = vadd.f32 %v7970_v14, %v2489_v36  ;;  %v8138_v34 = vpop.f32.mrb[43].mxu0  ;;  %9264 = vst [vmem:[#allocation24_spill] sm:$0xff] %v8153_v60 }
 0x279   : > { %v2493_v41 = vpop.f32.mrb[60].mxu1 }
 0x27a   : > { %v8140_v44 = vpop.permute.xlu1 %3344  ;;  %v2980_v46 = vmax.f32 %v2794_v8, 0.0  ;;  %v2494_v35 = vadd.f32 %v2493_v41, %v9262_v54  ;;  %v2495_v0 = vpop.f32.mrb[61].mxu1  ;;  %v9265_v8 = vld [vmem:[#allocation41_spill] sm:$0xff] }
 0x27b   : > { %9261 = vst [vmem:[#allocation23_spill] sm:$0xff] %v8140_v44  ;;  %4409 = vperm.xlu1 %5469, %v4211_v63   ;;  %v8146_v31 = vpop.f32.mrb[44].mxu0  ;;  %v4215_v54 = vld [vmem:[%s9112_s11 + $0x148] sm:$0xff]  ;;  %v8173_v60 = vpop.permute.xlu0 %3409 }
 0x27c   : > { %v5314_v3 = vpack.c.bf16 %v2980_v46, %v2979_v29  ;;  %v2799_v14 = vadd.f32 %v7996_v55, %v2494_v35  ;;  %v8149_v17 = vpop.f32.mrb[45].mxu0  ;;  %v1020_v55 = vrot.slane %v1019_v19, 4  ;;  %9268 = vst [vmem:[#allocation25_spill] sm:$0xff] %v8173_v60  ;;  %v9288_v44 = vld [vmem:[#allocation56_spill] sm:$0xff] }
 0x27d   : > { %v2498_v36 = vpop.f32.mrb[62].mxu1 }
 0x27e   : > { %v8151_v61 = vpop.permute.xlu1 %3354  ;;  %v2499_v41 = vadd.f32 %v2498_v36, %v9265_v8  ;;  %v2500_v63 = vpop.f32.mrb[63].mxu1  ;;  %5315 = vmatpush1.bf16.msra.mxu0 %v5314_v3  ;;  %v2981_v0 = vmax.f32 %v2799_v14, 0.0  ;;  %v9267_v3 = vld [vmem:[#allocation26_spill] sm:$0xff]  ;;  %v1021_v26 = vadd.f32 %v1020_v55, %v1019_v19 }
 0x27f   : > { %9263 = vst [vmem:[#allocation37_spill] sm:$0xff] %v8151_v61  ;;  %4419 = vperm.xlu1 %5469, %v4213_v59   ;;  %5316 = vmatprep.subr.bf16.mxu0 %v9231_v45  ;;  %v8160_v51 = vpop.f32.mrb[46].mxu0  ;;  %v4217_v63 = vld [vmem:[%s9112_s11 + $0x158] sm:$0xff] }
 0x280   : > { %v2804_v18 = vadd.f32 %v7990_v49, %v2499_v41  ;;  %v8163_v29 = vpop.f32.mrb[47].mxu0  ;;  %v1022_v55 = vrot.slane %v1021_v26, 2 }
 0x281   : > { %v2503_v46 = vpop.f32.mrb[64].mxu1 }
 0x282   : > { %v8165_v35 = vpop.permute.xlu1 %3364  ;;  %v2982_v36 = vmax.f32 %v2804_v18, 0.0  ;;  %v2504_v59 = vadd.f32 %v2503_v46, %v9267_v3  ;;  %v2505_v8 = vpop.f32.mrb[65].mxu1  ;;  %v4219_v3 = vld [vmem:[%s9112_s11 + $0x168] sm:$0xff] }
 0x283   : > { %9266 = vst [vmem:[#allocation39_spill] sm:$0xff] %v8165_v35  ;;  %4429 = vperm.xlu1 %5469, %v4215_v54   ;;  %v8171_v21 = vpop.f32.mrb[48].mxu0  ;;  %v8195_v8 = vpop.permute.xlu0 %3419 }
 0x284   : > { %v5317_v49 = vpack.c.bf16 %v2982_v36, %v2981_v0  ;;  %v2809_v41 = vadd.f32 %v8030_v47, %v2504_v59  ;;  %v8176_v22 = vpop.f32.mrb[49].mxu0  ;;  %9271 = vst [vmem:[#allocation82_spill] sm:$0xff] %v8195_v8 }
 0x285   : > { %v2508_v14 = vpop.f32.mrb[66].mxu1 }
 0x286   : > { %v8178_v18 = vpop.permute.xlu1 %3374  ;;  %v2509_v46 = vadd.f32 %v2508_v14, %v7351_v16  ;;  %v2510_v54 = vpop.f32.mrb[67].mxu1  ;;  %5318 = vmatpush1.bf16.msra.mxu0 %v5317_v49  ;;  %v3041_v16 = vld [vmem:[%s9106_s5 + $0xd0] sm:$0xff] }
 0x287   : > { %9269 = vst [vmem:[#allocation41_spill] sm:$0xff] %v8178_v18  ;;  %4439 = vperm.xlu1 %5469, %v4217_v63   ;;  %5319 = vmatprep.subr.bf16.mxu0 %v9231_v45  ;;  %v8185_v19 = vpop.f32.mrb[50].mxu0  ;;  %v2983_v63 = vmax.f32 %v2809_v41, 0.0  ;;  %v9272_v14 = vld [vmem:[#allocation14_spill] sm:$0xff] }
 0x288   : > { %v2814_v47 = vadd.f32 %v8020_v15, %v2509_v46  ;;  %v8188_v0 = vpop.f32.mrb[51].mxu0  ;;  %5139 = vmatprep.mubr.f32.mxu1 %v3041_v16  ;;  %v4220_v15 = vld [vmem:[%s9112_s11 + $0x170] sm:$0xff] }
 0x289   : > { %v2513_v36 = vpop.f32.mrb[68].mxu1 }
 0x28a   : > { %v8190_v59 = vpop.permute.xlu1 %3384  ;;  %v2984_v49 = vmax.f32 %v2814_v47, 0.0  ;;  %v2514_v54 = vadd.f32 %v2513_v36, %v9272_v14  ;;  %v2515_v60 = vpop.f32.mrb[69].mxu1 }
 0x28b   : > { %9270 = vst [vmem:[#allocation26_spill] sm:$0xff] %v8190_v59  ;;  %4449 = vperm.xlu1 %5469, %v4219_v3   ;;  %v8201_v46 = vpop.f32.mrb[52].mxu0  ;;  %v1023_v59 = vadd.f32 %v1022_v55, %v1021_v26  ;;  %v4221_v3 = vld [vmem:[%s9112_s11 + $0x178] sm:$0xff] }
 0x28c   : > { %v5320_v37 = vpack.c.bf16 %v2984_v49, %v2983_v63  ;;  %v2819_v18 = vadd.f32 %v8059_v58, %v2514_v54  ;;  %v8204_v7 = vpop.f32.mrb[53].mxu0  ;;  %v8215_v58 = vpop.permute.xlu0 %3429  ;;  %v9276_v49 = vld [vmem:[#allocation12_spill] sm:$0xff] }
 0x28d   : > { %v2518_v8 = vpop.f32.mrb[70].mxu1  ;;  %v1024_v55 = vrot.slane %v1023_v59, 1  ;;  %9274 = vst [vmem:[#allocation83_spill] sm:$0xff] %v8215_v58 }
 0x28e   : > { %v8206_v41 = vpop.permute.xlu1 %3394  ;;  %v2519_v47 = vadd.f32 %v2518_v8, %v7375_v23  ;;  %v2520_v60 = vpop.f32.mrb[71].mxu1  ;;  %5321 = vmatpush1.bf16.msra.mxu0 %v5320_v37  ;;  %v2985_v37 = vmax.f32 %v2819_v18, 0.0 }
 0x28f   : > { %9273 = vst [vmem:[#allocation14_spill] sm:$0xff] %v8206_v41  ;;  %4454 = vperm.xlu1 %5469, %v4220_v15   ;;  %5322 = vmatprep.subr.bf16.mxu0 %v9231_v45  ;;  %v8213_v26 = vpop.f32.mrb[54].mxu0  ;;  %v1033_v60 = vrot.slane %v7492_v56, %v6808_v57  ;;  %v1025_v41 = vadd.f32 %v1024_v55, %v1023_v59 }
 0x290   : > { %v2824_v36 = vadd.f32 %v8051_v25, %v2519_v47  ;;  %v8218_v16 = vpop.f32.mrb[55].mxu0  ;;  %v8232_v18 = vpop.permute.xlu0 %3439 }
 0x291   : > { %v2523_v63 = vpop.f32.mrb[72].mxu1  ;;  %9278 = vst [vmem:[#allocation85_spill] sm:$0xff] %v8232_v18  ;;  %v8238_v56 = vadd.f32 %v1033_v60, %v1025_v41 }
 0x292   : > { %v8220_v23 = vpop.permute.xlu1 %3404  ;;  %v2986_v8 = vmax.f32 %v2824_v36, 0.0  ;;  %v2524_v14 = vadd.f32 %v2523_v63, %v9276_v49  ;;  %v2525_v54 = vpop.f32.mrb[73].mxu1 }
 0x293   : > { %9275 = vst [vmem:[#allocation84_spill] sm:$0xff] %v8220_v23  ;;  %4459 = vperm.xlu1 %5469, %v4221_v3   ;;  %v8223_v15 = vpop.f32.mrb[56].mxu0  ;;  %9279 = vst [vmem:[#allocation86_spill] sm:$0xff] %v8238_v56  ;;  %v5508_v54 = vld [vmem:[%s5804_s16] sm:$0xff]  ;;  %v9286_v23 = vld [vmem:[#allocation29_spill] sm:$0xff] }
 0x294   : > { %v5323_v58 = vpack.c.bf16 %v2986_v8, %v2985_v37  ;;  %v2829_v25 = vadd.f32 %v8078_v11, %v2524_v14  ;;  %v8228_v47 = vpop.f32.mrb[57].mxu0  ;;  %v9281_v14 = vld [vmem:[#allocation15_spill] sm:$0xff]  ;;  %v4116_v57 = vpop.permute.xlu0 %4115 }
 0x295   : > { %v2528_v35 = vpop.f32.mrb[74].mxu1 }
 0x296   : > { %v8230_v27 = vpop.permute.xlu1 %3414  ;;  %v2529_v36 = vadd.f32 %v2528_v35, %v7408_v9  ;;  %v2530_v3 = vpop.f32.mrb[75].mxu1  ;;  %5324 = vmatpush1.bf16.msra.mxu0 %v5323_v58  ;;  %v2987_v8 = vmax.f32 %v2829_v25, 0.0 }
 0x297   : > { %9277 = vst [vmem:[#allocation12_spill] sm:$0xff] %v8230_v27  ;;  %5325 = vmatprep.subr.bf16.mxu0 %v9231_v45  ;;  %v8236_v63 = vpop.f32.mrb[58].mxu0  ;;  %v1035_v3 = vmul.f32 %v5508_v54, %v8238_v56 }
 0x298   : > { %v2834_v11 = vadd.f32 %v8071_v30, %v2529_v36  ;;  %v8241_v59 = vpop.f32.mrb[59].mxu0  ;;  %v5509_v30 = vld [vmem:[%s5804_s16 + $0x8] sm:$0xff] }
 0x299   : > { %v2533_v55 = vpop.f32.mrb[76].mxu1  ;;  %v1036_v36 = vmul.f32 %v5509_v30, %v8238_v56  ;;  %v9285_v30 = vld [vmem:[#allocation54_spill] sm:$0xff] }
 0x29a   : > { %v8243_v37 = vpop.permute.xlu1 %3424  ;;  %v2988_v49 = vmax.f32 %v2834_v11, 0.0  ;;  %v2534_v9 = vadd.f32 %v2533_v55, %v9281_v14  ;;  %v2535_v35 = vpop.f32.mrb[77].mxu1  ;;  %v1037_v11 = vmul.f32 %v7677_v43, %v8238_v56  ;;  %v9283_v43 = vld [vmem:[#allocation61_spill] sm:$0xff] }
 0x29b   : > { %9280 = vst [vmem:[#allocation87_spill] sm:$0xff] %v8243_v37  ;;  %v8246_v58 = vpop.f32.mrb[60].mxu0  ;;  %v1076_v35 = vadd.f32 %v7515_v53, %v1036_v36  ;;  %v1040_v53 = vmul.f32 %v7764_v2, %v8238_v56  ;;  %v9290_v2 = vld [vmem:[#allocation47_spill] sm:$0xff] }
 0x29c   : > { %v5326_v41 = vpack.c.bf16 %v2988_v49, %v2987_v8  ;;  %v2839_v60 = vadd.f32 %v8100_v48, %v2534_v9  ;;  %v8253_v18 = vpop.f32.mrb[61].mxu0  ;;  %v1038_v48 = vmul.f32 %v7714_v20, %v8238_v56  ;;  %v1075_v49 = vadd.f32 %v7639_v33, %v1035_v3  ;;  %v9287_v3 = vld [vmem:[#allocation46_spill] sm:$0xff] }
 0x29d   : > { %v2538_v37 = vpop.f32.mrb[78].mxu1 }
 0x29e   : > { %v8255_v25 = vpop.permute.xlu1 %3434  ;;  %v2539_v55 = vadd.f32 %v2538_v37, %v7430_v13  ;;  %v2540_v14 = vpop.f32.mrb[79].mxu1  ;;  %5327 = vmatpush1.bf16.msra.mxu0 %v5326_v41  ;;  %v1039_v13 = vmul.f32 %v9283_v43, %v8238_v56  ;;  %v2989_v20 = vmax.f32 %v2839_v60, 0.0  ;;  %v1083_v36 = vadd.f32 %v1075_v49, %v8014_v50 }
 0x29f   : > { %9282 = vst [vmem:[#allocation15_spill] sm:$0xff] %v8255_v25  ;;  %5328 = vmatprep.subr.bf16.mxu0 %v9231_v45  ;;  %v8263_v8 = vpop.f32.mrb[62].mxu0  ;;  %v1077_v14 = vadd.f32 %v9285_v30, %v1037_v11  ;;  %v4126_v25 = vpop.permute.xlu0 %4125  ;;  %v1080_v50 = vadd.f32 %v9290_v2, %v1040_v53  ;;  %v9294_v2 = vld [vmem:[#allocation31_spill] sm:$0xff] }
 0x2a0   : > { %v2844_v9 = vadd.f32 %v8094_v1, %v2539_v55  ;;  %v8268_v54 = vpop.f32.mrb[63].mxu0  ;;  %v1078_v1 = vadd.f32 %v9287_v3, %v1038_v48  ;;  %v1079_v11 = vadd.f32 %v9288_v44, %v1039_v13 }
 0x2a1   : > { %v2543_v37 = vpop.f32.mrb[80].mxu1  ;;  %v1088_v53 = vadd.f32 %v1080_v50, %v8085_v28 }
 0x2a2   : > { %v8272_v41 = vpop.permute.xlu1 %3444  ;;  %v2990_v27 = vmax.f32 %v2844_v9, 0.0  ;;  %v2544_v61 = vadd.f32 %v2543_v37, %v9286_v23  ;;  %v2545_v33 = vpop.f32.mrb[81].mxu1  ;;  %v4153_v9 = vmul.f32 %v4116_v57, %v1083_v36  ;;  %v1085_v23 = vadd.f32 %v1077_v14, %v8025_v12  ;;  %v9289_v37 = vld [vmem:[#allocation17_spill] sm:$0xff] }
 0x2a3   : > { %9284 = vst [vmem:[#allocation61_spill] sm:$0xff] %v8272_v41  ;;  %v1084_v41 = vadd.f32 %v1076_v35, %v8011_v62  ;;  %v1086_v44 = vadd.f32 %v1078_v1, %v8036_v38  ;;  %v1087_v57 = vadd.f32 %v1079_v11, %v8063_v4  ;;  %v9292_v1 = vld [vmem:[#allocation43_spill] sm:$0xff] }
 0x2a4   : > { %v5329_v55 = vpack.c.bf16 %v2990_v27, %v2989_v20  ;;  %v2849_v43 = vadd.f32 %v8117_v5, %v2544_v61  ;;  %v4155_v27 = vmul.f32 %v4126_v25, %v1085_v23  ;;  %v4136_v5 = vpop.permute.xlu0 %4135 }
 0x2a5   : > { %v2548_v30 = vpop.f32.mrb[82].mxu1  ;;  %v4157_v25 = vmul.f32 %v4136_v5, %v1087_v57 }
 0x2a6   : > { %v4121_v60 = vpop.permute.xlu1 %4120  ;;  %v2549_v33 = vadd.f32 %v2548_v30, %v9289_v37  ;;  %v2550_v3 = vpop.f32.mrb[83].mxu1  ;;  %5330 = vmatpush1.bf16.msra.mxu0 %v5329_v55  ;;  %v2991_v49 = vmax.f32 %v2849_v43, 0.0 }
 0x2a7   : > { %v4154_v48 = vmul.f32 %v4121_v60, %v1084_v41  ;;  %5331 = vmatprep.subr.bf16.mxu0 %v9231_v45  ;;  %v9291_v41 = vld [vmem:[#allocation16_spill] sm:$0xff] }
 0x2a8   : > { %v2854_v62 = vadd.f32 %v8111_v52, %v2549_v33 }
 0x2a9   : > { %v4161_v61 = vadd.f32 %v4154_v48, %v4153_v9  ;;  %v2553_v12 = vpop.f32.mrb[84].mxu1 }
 0x2aa   : > { %v4131_v35 = vpop.permute.xlu1 %4130  ;;  %v2992_v13 = vmax.f32 %v2854_v62, 0.0  ;;  %v2554_v14 = vadd.f32 %v2553_v12, %v9291_v41  ;;  %v2555_v55 = vpop.f32.mrb[85].mxu1 }
 0x2ab   : > { %v4156_v20 = vmul.f32 %v4131_v35, %v1086_v44  ;;  %v4162_v36 = vadd.f32 %v4161_v61, %v4155_v27  ;;  %v9295_v61 = vld [vmem:[#allocation44_spill] sm:$0xff] }
 0x2ac   : > { %v5332_v30 = vpack.c.bf16 %v2992_v13, %v2991_v49  ;;  %v2859_v52 = vadd.f32 %v8138_v34, %v2554_v14  ;;  %v9296_v13 = vld [vmem:[#allocation33_spill] sm:$0xff] }
 0x2ad   : > { %v4163_v60 = vadd.f32 %v4162_v36, %v4156_v20  ;;  %v2558_v9 = vpop.f32.mrb[86].mxu1 }
 0x2ae   : > { %v4141_v38 = vpop.permute.xlu1 %4140  ;;  %v2559_v4 = vadd.f32 %v2558_v9, %v9292_v1  ;;  %v2560_v23 = vpop.f32.mrb[87].mxu1  ;;  %5333 = vmatpush1.bf16.msra.mxu0 %v5332_v30  ;;  %v2993_v48 = vmax.f32 %v2859_v52, 0.0  ;;  %v9298_v9 = vld [vmem:[#allocation60_spill] sm:$0xff] }
 0x2af   : > { %v4158_v43 = vmul.f32 %v4141_v38, %v1088_v53  ;;  %v4164_v11 = vadd.f32 %v4163_v60, %v4157_v25  ;;  %5334 = vmatprep.subr.bf16.mxu0 %v9231_v45 }
 0x2b0   : > { %v2864_v37 = vadd.f32 %v8131_v40, %v2559_v4 }
 0x2b1   : > { %v8296_v33 = vadd.f32 %v4164_v11, %v4158_v43  ;;  %v2563_v28 = vpop.f32.mrb[88].mxu1 }
 0x2b2   : > { %v2994_v3 = vmax.f32 %v2864_v37, 0.0  ;;  %v2564_v50 = vadd.f32 %v2563_v28, %v9294_v2  ;;  %v2565_v34 = vpop.f32.mrb[89].mxu1 }
 0x2b3   : > { %9293 = vst [vmem:[#allocation54_spill] sm:$0xff] %v8296_v33  ;;  %v9346_v33 = vld [vmem:[#allocation36_spill] sm:$0xff] }
 0x2b4   : > { %v5335_v27 = vpack.c.bf16 %v2994_v3, %v2993_v48  ;;  %v2869_v5 = vadd.f32 %v8149_v17, %v2564_v50  ;;  %v9297_v17 = vld [vmem:[#allocation45_spill] sm:$0xff] }
 0x2b5   : > { %v2568_v62 = vpop.f32.mrb[90].mxu1 }
 0x2b6   : > { %v2569_v44 = vadd.f32 %v2568_v62, %v9295_v61  ;;  %v2570_v57 = vpop.f32.mrb[91].mxu1  ;;  %5336 = vmatpush1.bf16.msra.mxu0 %v5335_v27  ;;  %v2995_v12 = vmax.f32 %v2869_v5, 0.0  ;;  %v3018_v27 = vld [vmem:[%s9106_s5 + $0x18] sm:$0xff] }
 0x2b7   : > { %5337 = vmatprep.subr.bf16.mxu0 %v9231_v45 }
 0x2b8   : > { %v2874_v40 = vadd.f32 %v8146_v31, %v2569_v44  ;;  %v9301_v44 = vld [vmem:[#allocation65_spill] sm:$0xff] }
 0x2b9   : > { %v2573_v49 = vpop.f32.mrb[92].mxu1 }
 0x2ba   : > { %v2996_v35 = vmax.f32 %v2874_v40, 0.0  ;;  %v2574_v41 = vadd.f32 %v2573_v49, %v9296_v13  ;;  %v2575_v14 = vpop.f32.mrb[93].mxu1  ;;  %v3021_v49 = vld [vmem:[%s9106_s5 + $0x30] sm:$0xff] }
 0x2bb   : > { %v9302_v14 = vld [vmem:[#allocation50_spill] sm:$0xff] }
 0x2bc   : > { %v5338_v20 = vpack.c.bf16 %v2996_v35, %v2995_v12  ;;  %v2879_v36 = vadd.f32 %v8163_v29, %v2574_v41  ;;  %v9299_v29 = vld [vmem:[#allocation49_spill] sm:$0xff] }
 0x2bd   : > { %v2578_v55 = vpop.f32.mrb[94].mxu1 }
 0x2be   : > { %v2579_v53 = vadd.f32 %v2578_v55, %v9297_v17  ;;  %v2580_v25 = vpop.f32.mrb[95].mxu1  ;;  %5339 = vmatpush1.bf16.msra.mxu0 %v5338_v20  ;;  %v2997_v31 = vmax.f32 %v2879_v36, 0.0  ;;  %v3024_v55 = vld [vmem:[%s9106_s5 + $0x48] sm:$0xff] }
 0x2bf   : > { %5340 = vmatprep.subr.bf16.mxu0 %v9231_v45  ;;  %v3015_v45 = vld [vmem:[%s9106_s5] sm:$0xff] }
 0x2c0   : > { %v2884_v30 = vadd.f32 %v8160_v51, %v2579_v53  ;;  %v3019_v51 = vld [vmem:[%s9106_s5 + $0x20] sm:$0xff] }
 0x2c1   : > { %v2583_v60 = vpop.f32.mrb[96].mxu1 }
 0x2c2   : > { %v2998_v52 = vmax.f32 %v2884_v30, 0.0  ;;  %v2584_v38 = vadd.f32 %v2583_v60, %v9298_v9  ;;  %v2585_v1 = vpop.f32.mrb[97].mxu1  ;;  %v9303_v30 = vld [vmem:[#allocation67_spill] sm:$0xff] }
 0x2c4   : > { %v5341_v4 = vpack.c.bf16 %v2998_v52, %v2997_v31  ;;  %v2889_v43 = vadd.f32 %v8176_v22, %v2584_v38  ;;  %v9300_v22 = vld [vmem:[#allocation63_spill] sm:$0xff] }
 0x2c5   : > { %v2588_v11 = vpop.f32.mrb[98].mxu1  ;;  %v3027_v52 = vld [vmem:[%s9106_s5 + $0x60] sm:$0xff] }
 0x2c6   : > { %v2589_v23 = vadd.f32 %v2588_v11, %v9299_v29  ;;  %v2590_v37 = vpop.f32.mrb[99].mxu1  ;;  %5342 = vmatpush1.bf16.msra.mxu0 %v5341_v4  ;;  %v2999_v28 = vmax.f32 %v2889_v43, 0.0  ;;  %v9304_v43 = vld [vmem:[#allocation51_spill] sm:$0xff] }
 0x2c8   : > { %v2894_v48 = vadd.f32 %v8171_v21, %v2589_v23  ;;  %v3022_v21 = vld [vmem:[%s9106_s5 + $0x38] sm:$0xff] }
 0x2c9   : > { %v2593_v3 = vpop.f32.mrb[100].mxu1  ;;  %3512 = vmatmul.mubr.f32.vlgmr.msra.gmra.mrb[64].mxu0 %v3015_v45  ;;  %v3030_v23 = vld [vmem:[%s9106_s5 + $0x78] sm:$0xff] }
 0x2ca   : > { %v3000_v2 = vmax.f32 %v2894_v48, 0.0  ;;  %v2594_v50 = vadd.f32 %v2593_v3, %v9300_v22  ;;  %v2595_v34 = vpop.f32.mrb[101].mxu1  ;;  %3516 = vmatprep.mubr.f32.mxu0 %v3019_v51 }
 0x2cc   : > { %v5343_v5 = vpack.c.bf16 %v3000_v2, %v2999_v28  ;;  %v2899_v62 = vadd.f32 %v8188_v0, %v2594_v50  ;;  %v3025_v0 = vld [vmem:[%s9106_s5 + $0x50] sm:$0xff] }
 0x2cd   : > { %v2598_v61 = vpop.f32.mrb[102].mxu1  ;;  %3517 = vmatmul.mubr.f32.gmra.mrb[66].mxu0 %v3018_v27  ;;  %v9305_v28 = vld [vmem:[#allocation69_spill] sm:$0xff] }
 0x2ce   : > { %v2599_v57 = vadd.f32 %v2598_v61, %v9301_v44  ;;  %5344 = vmatprep.subr.bf16.mxu0 %v5343_v5  ;;  %5383 = vmatprep.subr.bf16.mxu1 %v5343_v5  ;;  %v2600_v40 = vpop.f32.mrb[103].mxu1  ;;  %v3001_v12 = vmax.f32 %v2899_v62, 0.0  ;;  %v3033_v2 = vld [vmem:[%s9106_s5 + $0x90] sm:$0xff] }
 0x2cf   : > { %5346 = vmatpush3.bf16.msra.mxu0 %v5343_v5  ;;  %5391 = vmatpush3.bf16.msra.mxu1 %v5343_v5  ;;  %v9306_v5 = vld [vmem:[#allocation52_spill] sm:$0xff] }
 0x2d0   : > { %v2904_v35 = vadd.f32 %v8185_v19, %v2599_v57  ;;  %3521 = vmatprep.mubr.f32.mxu0 %v3022_v21  ;;  %v3028_v19 = vld [vmem:[%s9106_s5 + $0x68] sm:$0xff] }
 0x2d1   : > { %v2603_v13 = vpop.f32.mrb[104].mxu1  ;;  %3522 = vmatmul.mubr.f32.gmra.mrb[68].mxu0 %v3021_v49  ;;  %v3036_v21 = vld [vmem:[%s9106_s5 + $0xa8] sm:$0xff]  ;;  %v9307_v49 = vld [vmem:[#allocation71_spill] sm:$0xff] }
 0x2d2   : > { %v3002_v41 = vmax.f32 %v2904_v35, 0.0  ;;  %v2604_v20 = vadd.f32 %v2603_v13, %v9302_v14  ;;  %v2605_v36 = vpop.f32.mrb[105].mxu1  ;;  %3526 = vmatprep.mubr.f32.mxu0 %v3025_v0  ;;  %v3039_v35 = vld [vmem:[%s9106_s5 + $0xc0] sm:$0xff] }
 0x2d3   : > { %v9308_v36 = vld [vmem:[#allocation53_spill] sm:$0xff] }
 0x2d4   : > { %v5347_v17 = vpack.c.bf16 %v3002_v41, %v3001_v12  ;;  %v2909_v53 = vadd.f32 %v8204_v7, %v2604_v20  ;;  %v3031_v7 = vld [vmem:[%s9106_s5 + $0x80] sm:$0xff] }
 0x2d5   : > { %v2608_v25 = vpop.f32.mrb[106].mxu1  ;;  %3527 = vmatmul.mubr.f32.gmra.mrb[70].mxu0 %v3024_v55 }
 0x2d6   : > { %v2609_v60 = vadd.f32 %v2608_v25, %v9303_v30  ;;  %5348 = vmatprep.subr.bf16.mxu0 %v5347_v17  ;;  %5384 = vmatprep.subr.bf16.mxu1 %v5347_v17  ;;  %v2610_v31 = vpop.f32.mrb[107].mxu1  ;;  %v3003_v9 = vmax.f32 %v2909_v53, 0.0  ;;  %v3042_v53 = vld [vmem:[%s9106_s5 + $0xd8] sm:$0xff] }
 0x2d7   : > { %5350 = vmatpush3.bf16.msra.mxu0 %v5347_v17  ;;  %5392 = vmatpush3.bf16.msra.mxu1 %v5347_v17 }
 0x2d8   : > { %v2914_v38 = vadd.f32 %v8201_v46, %v2609_v60  ;;  %3531 = vmatprep.mubr.f32.mxu0 %v3028_v19  ;;  %v3034_v46 = vld [vmem:[%s9106_s5 + $0x98] sm:$0xff]  ;;  %v9309_v60 = vld [vmem:[#allocation73_spill] sm:$0xff] }
 0x2d9   : > { %v2613_v1 = vpop.f32.mrb[108].mxu1  ;;  %3532 = vmatmul.mubr.f32.gmra.mrb[72].mxu0 %v3027_v52 }
 0x2da   : > { %v3004_v4 = vmax.f32 %v2914_v38, 0.0  ;;  %v2614_v11 = vadd.f32 %v2613_v1, %v9304_v43  ;;  %v2615_v29 = vpop.f32.mrb[109].mxu1  ;;  %3536 = vmatprep.mubr.f32.mxu0 %v3031_v7  ;;  %v3045_v7 = vld [vmem:[%s9106_s5 + $0xf0] sm:$0xff]  ;;  %v9310_v43 = vld [vmem:[#allocation55_spill] sm:$0xff] }
 0x2dc   : > { %v5351_v37 = vpack.c.bf16 %v3004_v4, %v3003_v9  ;;  %v2919_v45 = vadd.f32 %v8218_v16, %v2614_v11  ;;  %v3037_v16 = vld [vmem:[%s9106_s5 + $0xb0] sm:$0xff] }
 0x2dd   : > { %v2618_v51 = vpop.f32.mrb[110].mxu1  ;;  %3537 = vmatmul.mubr.f32.gmra.mrb[74].mxu0 %v3030_v23  ;;  %v3048_v23 = vld [vmem:[%s9106_s5 + $0x108] sm:$0xff] }
 0x2de   : > { %v2619_v48 = vadd.f32 %v2618_v51, %v9305_v28  ;;  %5352 = vmatprep.subr.bf16.mxu0 %v5351_v37  ;;  %5385 = vmatprep.subr.bf16.mxu1 %v5351_v37  ;;  %v2620_v3 = vpop.f32.mrb[111].mxu1  ;;  %v3005_v22 = vmax.f32 %v2919_v45, 0.0 }
 0x2df   : > { %5354 = vmatpush3.bf16.msra.mxu0 %v5351_v37  ;;  %5393 = vmatpush3.bf16.msra.mxu1 %v5351_v37  ;;  %v3051_v3 = vld [vmem:[%s9106_s5 + $0x120] sm:$0xff] }
 0x2e0   : > { %v2924_v50 = vadd.f32 %v8213_v26, %v2619_v48  ;;  %3541 = vmatprep.mubr.f32.mxu0 %v3034_v46  ;;  %v3040_v26 = vld [vmem:[%s9106_s5 + $0xc8] sm:$0xff]  ;;  %v9311_v46 = vld [vmem:[#allocation75_spill] sm:$0xff] }
 0x2e1   : > { %v2623_v34 = vpop.f32.mrb[112].mxu1  ;;  %3542 = vmatmul.mubr.f32.gmra.mrb[76].mxu0 %v3033_v2 }
 0x2e2   : > { %v3006_v27 = vmax.f32 %v2924_v50, 0.0  ;;  %v2624_v62 = vadd.f32 %v2623_v34, %v9306_v5  ;;  %v2625_v61 = vpop.f32.mrb[113].mxu1  ;;  %3546 = vmatprep.mubr.f32.mxu0 %v3037_v16  ;;  %v9312_v34 = vld [vmem:[#allocation57_spill] sm:$0xff] }
 0x2e4   : > { %v5355_v44 = vpack.c.bf16 %v3006_v27, %v3005_v22  ;;  %v2929_v57 = vadd.f32 %v8228_v47, %v2624_v62  ;;  %v3043_v47 = vld [vmem:[%s9106_s5 + $0xe0] sm:$0xff]  ;;  %v3054_v62 = vld [vmem:[%s9106_s5 + $0x138] sm:$0xff] }
 0x2e5   : > { %v2628_v40 = vpop.f32.mrb[114].mxu1  ;;  %3547 = vmatmul.mubr.f32.gmra.mrb[78].mxu0 %v3036_v21 }
 0x2e6   : > { %v2629_v0 = vadd.f32 %v2628_v40, %v9307_v49  ;;  %5356 = vmatprep.subr.bf16.mxu0 %v5355_v44  ;;  %5386 = vmatprep.subr.bf16.mxu1 %v5355_v44  ;;  %v2630_v12 = vpop.f32.mrb[115].mxu1  ;;  %v3007_v13 = vmax.f32 %v2929_v57, 0.0  ;;  %v9313_v57 = vld [vmem:[#allocation77_spill] sm:$0xff] }
 0x2e7   : > { %5358 = vmatpush3.bf16.msra.mxu0 %v5355_v44  ;;  %5394 = vmatpush3.bf16.msra.mxu1 %v5355_v44 }
 0x2e8   : > { %v2934_v41 = vadd.f32 %v8223_v15, %v2629_v0  ;;  %3551 = vmatprep.mubr.f32.mxu0 %v3040_v26  ;;  %v3046_v15 = vld [vmem:[%s9106_s5 + $0xf8] sm:$0xff]  ;;  %v3057_v26 = vld [vmem:[%s9106_s5 + $0x150] sm:$0xff] }
 0x2e9   : > { %v2633_v14 = vpop.f32.mrb[116].mxu1  ;;  %3552 = vmatmul.mubr.f32.gmra.mrb[80].mxu0 %v3039_v35 }
 0x2ea   : > { %v3008_v20 = vmax.f32 %v2934_v41, 0.0  ;;  %v2634_v55 = vadd.f32 %v2633_v14, %v9308_v36  ;;  %v2635_v17 = vpop.f32.mrb[117].mxu1  ;;  %3556 = vmatprep.mubr.f32.mxu0 %v3043_v47  ;;  %v3060_v47 = vld [vmem:[%s9106_s5 + $0x168] sm:$0xff]  ;;  %v3047_v36 = vld [vmem:[%s9106_s5 + $0x100] sm:$0xff] }
 0x2eb   : > { %v3064_v41 = vld [vmem:[%s9106_s5 + $0x188] sm:$0xff]  ;;  %v3050_v17 = vld [vmem:[%s9106_s5 + $0x118] sm:$0xff] }
 0x2ec   : > { %v5359_v25 = vpack.c.bf16 %v3008_v20, %v3007_v13  ;;  %v2939_v19 = vadd.f32 %v8241_v59, %v2634_v55  ;;  %v3049_v59 = vld [vmem:[%s9106_s5 + $0x110] sm:$0xff]  ;;  %v3044_v14 = vld [vmem:[%s9106_s5 + $0xe8] sm:$0xff]  ;;  %v3067_v20 = vld [vmem:[%s9106_s5 + $0x1a0] sm:$0xff] }
 0x2ed   : > { %v2638_v30 = vpop.f32.mrb[118].mxu1  ;;  %3557 = vmatmul.mubr.f32.gmra.mrb[82].mxu0 %v3042_v53  ;;  %v3066_v55 = vld [vmem:[%s9106_s5 + $0x198] sm:$0xff] }
 0x2ee   : > { %v2639_v31 = vadd.f32 %v2638_v30, %v9309_v60  ;;  %5360 = vmatprep.subr.bf16.mxu0 %v5359_v25  ;;  %5387 = vmatprep.subr.bf16.mxu1 %v5359_v25  ;;  %v2640_v52 = vpop.f32.mrb[119].mxu1  ;;  %v3009_v9 = vmax.f32 %v2939_v19, 0.0  ;;  %v3070_v53 = vld [vmem:[%s9106_s5 + $0x1b8] sm:$0xff]  ;;  %v3069_v19 = vld [vmem:[%s9106_s5 + $0x1b0] sm:$0xff]  ;;  %v3056_v30 = vld [vmem:[%s9106_s5 + $0x148] sm:$0xff] }
 0x2ef   : > { %5362 = vmatpush3.bf16.msra.mxu0 %v5359_v25  ;;  %5395 = vmatpush3.bf16.msra.mxu1 %v5359_v25  ;;  %v3053_v25 = vld [vmem:[%s9106_s5 + $0x130] sm:$0xff]  ;;  %v3059_v60 = vld [vmem:[%s9106_s5 + $0x160] sm:$0xff]  ;;  %v3062_v52 = vld [vmem:[%s9106_s5 + $0x178] sm:$0xff] }
 0x2f0   : > { %v2944_v38 = vadd.f32 %v8236_v63, %v2639_v31  ;;  %3561 = vmatprep.mubr.f32.mxu0 %v3046_v15  ;;  %v3052_v63 = vld [vmem:[%s9106_s5 + $0x128] sm:$0xff]  ;;  %v3073_v15 = vld [vmem:[%s9106_s5 + $0x1d0] sm:$0xff] }
 0x2f1   : > { %v2643_v1 = vpop.f32.mrb[120].mxu1  ;;  %3562 = vmatmul.mubr.f32.gmra.mrb[84].mxu0 %v3045_v7  ;;  %v3072_v31 = vld [vmem:[%s9106_s5 + $0x1c8] sm:$0xff] }
 0x2f2   : > { %v3010_v4 = vmax.f32 %v2944_v38, 0.0  ;;  %v2644_v11 = vadd.f32 %v2643_v1, %v9310_v43  ;;  %v2645_v29 = vpop.f32.mrb[121].mxu1  ;;  %3566 = vmatprep.mubr.f32.mxu0 %v3049_v59  ;;  %v3076_v7 = vld [vmem:[%s9106_s5 + $0x1e8] sm:$0xff]  ;;  %v3065_v59 = vld [vmem:[%s9106_s5 + $0x190] sm:$0xff]  ;;  %v3079_v1 = vld [vmem:[%s9106_s5 + $0x200] sm:$0xff] }
 0x2f3   : > { %v3068_v38 = vld [vmem:[%s9106_s5 + $0x1a8] sm:$0xff]  ;;  %v3078_v43 = vld [vmem:[%s9106_s5 + $0x1f8] sm:$0xff] }
 0x2f4   : > { %v5363_v37 = vpack.c.bf16 %v3010_v4, %v3009_v9  ;;  %v2949_v45 = vadd.f32 %v8253_v18, %v2644_v11  ;;  %v3055_v18 = vld [vmem:[%s9106_s5 + $0x140] sm:$0xff]  ;;  %v3074_v11 = vld [vmem:[%s9106_s5 + $0x1d8] sm:$0xff] }
 0x2f5   : > { %v2648_v51 = vpop.f32.mrb[122].mxu1  ;;  %3567 = vmatmul.mubr.f32.gmra.mrb[86].mxu0 %v3048_v23  ;;  %v3075_v9 = vld [vmem:[%s9106_s5 + $0x1e0] sm:$0xff]  ;;  %v3082_v29 = vld [vmem:[%s9106_s5 + $0x218] sm:$0xff]  ;;  %v3077_v23 = vld [vmem:[%s9106_s5 + $0x1f0] sm:$0xff] }
 0x2f6   : > { %v2649_v28 = vadd.f32 %v2648_v51, %v9311_v46  ;;  %5364 = vmatprep.subr.bf16.mxu0 %v5363_v37  ;;  %5388 = vmatprep.subr.bf16.mxu1 %v5363_v37  ;;  %v2650_v48 = vpop.f32.mrb[123].mxu1  ;;  %v3011_v2 = vmax.f32 %v2949_v45, 0.0  ;;  %v3071_v4 = vld [vmem:[%s9106_s5 + $0x1c0] sm:$0xff]  ;;  %v3080_v45 = vld [vmem:[%s9106_s5 + $0x208] sm:$0xff]  ;;  %v3085_v51 = vld [vmem:[%s9106_s5 + $0x230] sm:$0xff] }
 0x2f7   : > { %5366 = vmatpush3.bf16.msra.mxu0 %v5363_v37  ;;  %5396 = vmatpush3.bf16.msra.mxu1 %v5363_v37  ;;  %v3081_v37 = vld [vmem:[%s9106_s5 + $0x210] sm:$0xff]  ;;  %v3084_v46 = vld [vmem:[%s9106_s5 + $0x228] sm:$0xff] }
 0x2f8   : > { %v2954_v16 = vadd.f32 %v8246_v58, %v2649_v28  ;;  %3571 = vmatprep.mubr.f32.mxu0 %v3052_v63  ;;  %v3058_v58 = vld [vmem:[%s9106_s5 + $0x158] sm:$0xff]  ;;  %v3083_v63 = vld [vmem:[%s9106_s5 + $0x220] sm:$0xff]  ;;  %v3088_v48 = vld [vmem:[%s9106_s5 + $0x248] sm:$0xff] }
 0x2f9   : > { %v2653_v22 = vpop.f32.mrb[124].mxu1  ;;  %3572 = vmatmul.mubr.f32.gmra.mrb[88].mxu0 %v3051_v3  ;;  %v3086_v28 = vld [vmem:[%s9106_s5 + $0x238] sm:$0xff]  ;;  %v3089_v3 = vld [vmem:[%s9106_s5 + $0x250] sm:$0xff] }
 0x2fa   : > { %v3012_v50 = vmax.f32 %v2954_v16, 0.0  ;;  %v2654_v27 = vadd.f32 %v2653_v22, %v9312_v34  ;;  %v2655_v5 = vpop.f32.mrb[125].mxu1  ;;  %3576 = vmatprep.mubr.f32.mxu0 %v3055_v18  ;;  %v3087_v18 = vld [vmem:[%s9106_s5 + $0x240] sm:$0xff]  ;;  %v3094_v34 = vld [vmem:[%s9106_s5 + $0x278] sm:$0xff] }
 0x2fb   : > { %v3091_v16 = vld [vmem:[%s9106_s5 + $0x260] sm:$0xff]  ;;  %v3101_v5 = vld [vmem:[%s9106_s5 + $0x2b0] sm:$0xff] }
 0x2fc   : > { %v5367_v61 = vpack.c.bf16 %v3012_v50, %v3011_v2  ;;  %v2959_v21 = vadd.f32 %v8268_v54, %v2654_v27  ;;  %v3061_v54 = vld [vmem:[%s9106_s5 + $0x170] sm:$0xff]  ;;  %v3092_v2 = vld [vmem:[%s9106_s5 + $0x268] sm:$0xff]  ;;  %v3095_v22 = vld [vmem:[%s9106_s5 + $0x280] sm:$0xff] }
 0x2fd   : > { %v2658_v44 = vpop.f32.mrb[126].mxu1  ;;  %3577 = vmatmul.mubr.f32.gmra.mrb[90].mxu0 %v3054_v62  ;;  %v3090_v50 = vld [vmem:[%s9106_s5 + $0x258] sm:$0xff]  ;;  %v3093_v62 = vld [vmem:[%s9106_s5 + $0x270] sm:$0xff] }
 0x2fe   : > { %v2659_v40 = vadd.f32 %v2658_v44, %v9313_v57  ;;  %5368 = vmatprep.subr.bf16.mxu0 %v5367_v61  ;;  %5389 = vmatprep.subr.bf16.mxu1 %v5367_v61  ;;  %v2660_v49 = vpop.f32.mrb[127].mxu1  ;;  %v3013_v0 = vmax.f32 %v2959_v21, 0.0  ;;  %v3098_v27 = vld [vmem:[%s9106_s5 + $0x298] sm:$0xff]  ;;  %v3104_v21 = vld [vmem:[%s9106_s5 + $0x2c8] sm:$0xff]  ;;  %v3107_v44 = vld [vmem:[%s9106_s5 + $0x2e0] sm:$0xff] }
 0x2ff   : > { %5370 = vmatpush3.bf16.msra.mxu0 %v5367_v61  ;;  %5397 = vmatpush3.bf16.msra.mxu1 %v5367_v61  ;;  %v3097_v61 = vld [vmem:[%s9106_s5 + $0x290] sm:$0xff]  ;;  %v3100_v57 = vld [vmem:[%s9106_s5 + $0x2a8] sm:$0xff]  ;;  %v3099_v49 = vld [vmem:[%s9106_s5 + $0x2a0] sm:$0xff] }
 0x300   : > { %v2964_v12 = vadd.f32 %v8263_v8, %v2659_v40  ;;  %3581 = vmatprep.mubr.f32.mxu0 %v3058_v58  ;;  %v3063_v8 = vld [vmem:[%s9106_s5 + $0x180] sm:$0xff]  ;;  %v3096_v58 = vld [vmem:[%s9106_s5 + $0x288] sm:$0xff]  ;;  %v3110_v40 = vld [vmem:[%s9106_s5 + $0x2f8] sm:$0xff] }
 0x301   : > { %3582 = vmatmul.mubr.f32.gmra.mrb[92].mxu0 %v3057_v26  ;;  %v3113_v26 = vld [vmem:[%s9106_s5 + $0x310] sm:$0xff] }
 0x302   : > { %v3014_v35 = vmax.f32 %v2964_v12, 0.0  ;;  %3586 = vmatprep.mubr.f32.mxu0 %v3061_v54  ;;  %v3103_v54 = vld [vmem:[%s9106_s5 + $0x2c0] sm:$0xff] }
 0x303   : > { %v3119_v12 = vld [vmem:[%s9106_s5 + $0x340] sm:$0xff] }
 0x304   : > { %v5371_v13 = vpack.c.bf16 %v3014_v35, %v3013_v0  ;;  %v3116_v0 = vld [vmem:[%s9106_s5 + $0x328] sm:$0xff]  ;;  %v3102_v35 = vld [vmem:[%s9106_s5 + $0x2b8] sm:$0xff] }
 0x305   : > { %3587 = vmatmul.mubr.f32.gmra.mrb[94].mxu0 %v3060_v47  ;;  %v3106_v47 = vld [vmem:[%s9106_s5 + $0x2d8] sm:$0xff] }
 0x306   : > { %5372 = vmatprep.subr.bf16.mxu0 %v5371_v13  ;;  %5390 = vmatprep.subr.bf16.mxu1 %v5371_v13 }
 0x307   : > { %5374 = vmatpush3.bf16.msra.mxu0 %v5371_v13  ;;  %5398 = vmatpush3.bf16.msra.mxu1 %v5371_v13  ;;  %v3122_v13 = vld [vmem:[%s9106_s5 + $0x358] sm:$0xff] }
 0x308   : > { %3591 = vmatprep.mubr.f32.mxu0 %v3064_v41  ;;  %v3125_v41 = vld [vmem:[%s9106_s5 + $0x370] sm:$0xff] }
 0x309   : > { %3592 = vmatmul.mubr.f32.gmra.mrb[96].mxu0 %v3063_v8  ;;  %v3105_v8 = vld [vmem:[%s9106_s5 + $0x2d0] sm:$0xff] }
 0x30a   : > { %5140 = vmatmul.mubr.f32.vlgmr.msra.gmra.mrb[128].mxu1 %v3044_v14  ;;  %3596 = vmatprep.mubr.f32.mxu0 %v3067_v20  ;;  %v3109_v14 = vld [vmem:[%s9106_s5 + $0x2f0] sm:$0xff]  ;;  %v3128_v20 = vld [vmem:[%s9106_s5 + $0x388] sm:$0xff] }
 0x30b   : > { %5142 = vmatprep.mubr.f32.mxu1 %v3047_v36  ;;  %v3131_v36 = vld [vmem:[%s9106_s5 + $0x3a0] sm:$0xff] }
 0x30d   : > { %3597 = vmatmul.mubr.f32.gmra.mrb[98].mxu0 %v3066_v55  ;;  %v3108_v55 = vld [vmem:[%s9106_s5 + $0x2e8] sm:$0xff] }
 0x30e   : > { %5143 = vmatmul.mubr.f32.gmra.mrb[130].mxu1 %v3050_v17  ;;  %3601 = vmatprep.mubr.f32.mxu0 %v3070_v53  ;;  %v3112_v17 = vld [vmem:[%s9106_s5 + $0x308] sm:$0xff]  ;;  %v3134_v53 = vld [vmem:[%s9106_s5 + $0x3b8] sm:$0xff] }
 0x30f   : > { %5145 = vmatprep.mubr.f32.mxu1 %v3053_v25  ;;  %v3137_v25 = vld [vmem:[%s9106_s5 + $0x3d0] sm:$0xff] }
 0x311   : > { %3602 = vmatmul.mubr.f32.gmra.mrb[100].mxu0 %v3069_v19  ;;  %v3111_v19 = vld [vmem:[%s9106_s5 + $0x300] sm:$0xff] }
 0x312   : > { %5146 = vmatmul.mubr.f32.gmra.mrb[132].mxu1 %v3056_v30  ;;  %3606 = vmatprep.mubr.f32.mxu0 %v3073_v15  ;;  %v3115_v30 = vld [vmem:[%s9106_s5 + $0x320] sm:$0xff]  ;;  %v3140_v15 = vld [vmem:[%s9106_s5 + $0x3e8] sm:$0xff] }
 0x313   : > { %5148 = vmatprep.mubr.f32.mxu1 %v3059_v60  ;;  %v3143_v60 = vld [vmem:[%s9106_s5 + $0x400] sm:$0xff] }
 0x315   : > { %3607 = vmatmul.mubr.f32.gmra.mrb[102].mxu0 %v3072_v31  ;;  %v3114_v31 = vld [vmem:[%s9106_s5 + $0x318] sm:$0xff] }
 0x316   : > { %5149 = vmatmul.mubr.f32.gmra.mrb[134].mxu1 %v3062_v52  ;;  %3611 = vmatprep.mubr.f32.mxu0 %v3076_v7  ;;  %v3118_v52 = vld [vmem:[%s9106_s5 + $0x338] sm:$0xff] }
 0x317   : > { %5151 = vmatprep.mubr.f32.mxu1 %v3065_v59  ;;  %v3146_v7 = vld [vmem:[%s9106_s5 + $0x418] sm:$0xff]  ;;  %v3149_v59 = vld [vmem:[%s9106_s5 + $0x430] sm:$0xff] }
 0x319   : > { %3612 = vmatmul.mubr.f32.gmra.mrb[104].mxu0 %v3075_v9  ;;  %v3117_v9 = vld [vmem:[%s9106_s5 + $0x330] sm:$0xff] }
 0x31a   : > { %5152 = vmatmul.mubr.f32.gmra.mrb[136].mxu1 %v3068_v38  ;;  %3616 = vmatprep.mubr.f32.mxu0 %v3079_v1  ;;  %v3121_v38 = vld [vmem:[%s9106_s5 + $0x350] sm:$0xff]  ;;  %v3152_v1 = vld [vmem:[%s9106_s5 + $0x448] sm:$0xff] }
 0x31b   : > { %5154 = vmatprep.mubr.f32.mxu1 %v3071_v4  ;;  %v3155_v4 = vld [vmem:[%s9106_s5 + $0x460] sm:$0xff] }
 0x31d   : > { %3617 = vmatmul.mubr.f32.gmra.mrb[106].mxu0 %v3078_v43  ;;  %v3120_v43 = vld [vmem:[%s9106_s5 + $0x348] sm:$0xff] }
 0x31e   : > { %5155 = vmatmul.mubr.f32.gmra.mrb[138].mxu1 %v3074_v11  ;;  %3621 = vmatprep.mubr.f32.mxu0 %v3082_v29  ;;  %v3124_v11 = vld [vmem:[%s9106_s5 + $0x368] sm:$0xff]  ;;  %v3158_v29 = vld [vmem:[%s9106_s5 + $0x478] sm:$0xff] }
 0x31f   : > { %5157 = vmatprep.mubr.f32.mxu1 %v3077_v23  ;;  %v3123_v23 = vld [vmem:[%s9106_s5 + $0x360] sm:$0xff] }
 0x321   : > { %3622 = vmatmul.mubr.f32.gmra.mrb[108].mxu0 %v3081_v37  ;;  %v3127_v37 = vld [vmem:[%s9106_s5 + $0x380] sm:$0xff] }
 0x322   : > { %5158 = vmatmul.mubr.f32.gmra.mrb[140].mxu1 %v3080_v45  ;;  %3626 = vmatprep.mubr.f32.mxu0 %v3085_v51  ;;  %v3126_v45 = vld [vmem:[%s9106_s5 + $0x378] sm:$0xff] }
 0x323   : > { %5160 = vmatprep.mubr.f32.mxu1 %v3083_v63  ;;  %v3130_v51 = vld [vmem:[%s9106_s5 + $0x398] sm:$0xff]  ;;  %v3129_v63 = vld [vmem:[%s9106_s5 + $0x390] sm:$0xff] }
 0x325   : > { %3627 = vmatmul.mubr.f32.gmra.mrb[110].mxu0 %v3084_v46  ;;  %v3133_v46 = vld [vmem:[%s9106_s5 + $0x3b0] sm:$0xff] }
 0x326   : > { %5161 = vmatmul.mubr.f32.gmra.mrb[142].mxu1 %v3086_v28  ;;  %3631 = vmatprep.mubr.f32.mxu0 %v3088_v48  ;;  %v3132_v28 = vld [vmem:[%s9106_s5 + $0x3a8] sm:$0xff] }
 0x327   : > { %5163 = vmatprep.mubr.f32.mxu1 %v3089_v3  ;;  %v3136_v48 = vld [vmem:[%s9106_s5 + $0x3c8] sm:$0xff]  ;;  %v3135_v3 = vld [vmem:[%s9106_s5 + $0x3c0] sm:$0xff] }
 0x329   : > { %3632 = vmatmul.mubr.f32.gmra.mrb[112].mxu0 %v3087_v18  ;;  %v3139_v18 = vld [vmem:[%s9106_s5 + $0x3e0] sm:$0xff] }
 0x32a   : > { %5164 = vmatmul.mubr.f32.gmra.mrb[144].mxu1 %v3092_v2  ;;  %3636 = vmatprep.mubr.f32.mxu0 %v3091_v16  ;;  %v3138_v2 = vld [vmem:[%s9106_s5 + $0x3d8] sm:$0xff] }
 0x32b   : > { %5166 = vmatprep.mubr.f32.mxu1 %v3095_v22  ;;  %v3142_v16 = vld [vmem:[%s9106_s5 + $0x3f8] sm:$0xff]  ;;  %v3141_v22 = vld [vmem:[%s9106_s5 + $0x3f0] sm:$0xff] }
 0x32d   : > { %3637 = vmatmul.mubr.f32.gmra.mrb[114].mxu0 %v3090_v50  ;;  %v3145_v50 = vld [vmem:[%s9106_s5 + $0x410] sm:$0xff] }
 0x32e   : > { %3641 = vmatprep.mubr.f32.mxu0 %v3094_v34  ;;  %5167 = vmatmul.mubr.f32.gmra.mrb[146].mxu1 %v3098_v27  ;;  %v3144_v34 = vld [vmem:[%s9106_s5 + $0x408] sm:$0xff] }
 0x32f   : > { %5169 = vmatprep.mubr.f32.mxu1 %v3101_v5  ;;  %v3148_v27 = vld [vmem:[%s9106_s5 + $0x428] sm:$0xff]  ;;  %v3147_v5 = vld [vmem:[%s9106_s5 + $0x420] sm:$0xff] }
 0x331   : > { %3642 = vmatmul.mubr.f32.gmra.mrb[116].mxu0 %v3093_v62  ;;  %v3151_v62 = vld [vmem:[%s9106_s5 + $0x440] sm:$0xff] }
 0x332   : > { %3646 = vmatprep.mubr.f32.mxu0 %v3097_v61  ;;  %5170 = vmatmul.mubr.f32.gmra.mrb[148].mxu1 %v3104_v21  ;;  %v3150_v61 = vld [vmem:[%s9106_s5 + $0x438] sm:$0xff] }
 0x333   : > { %5172 = vmatprep.mubr.f32.mxu1 %v3107_v44  ;;  %v3154_v21 = vld [vmem:[%s9106_s5 + $0x458] sm:$0xff]  ;;  %v3153_v44 = vld [vmem:[%s9106_s5 + $0x450] sm:$0xff] }
 0x335   : > { %3647 = vmatmul.mubr.f32.gmra.mrb[118].mxu0 %v3096_v58  ;;  %v3157_v58 = vld [vmem:[%s9106_s5 + $0x470] sm:$0xff] }
 0x336   : > { %3651 = vmatprep.mubr.f32.mxu0 %v3100_v57  ;;  %5173 = vmatmul.mubr.f32.gmra.mrb[150].mxu1 %v3110_v40  ;;  %v3156_v57 = vld [vmem:[%s9106_s5 + $0x468] sm:$0xff]  ;;  %v3017_v40 = vld [vmem:[%s9106_s5 + $0x10] sm:$0xff] }
 0x337   : > { %5175 = vmatprep.mubr.f32.mxu1 %v3113_v26  ;;  %v3020_v26 = vld [vmem:[%s9106_s5 + $0x28] sm:$0xff] }
 0x339   : > { %3652 = vmatmul.mubr.f32.gmra.mrb[120].mxu0 %v3099_v49  ;;  %v3023_v49 = vld [vmem:[%s9106_s5 + $0x40] sm:$0xff] }
 0x33a   : > { %3656 = vmatprep.mubr.f32.mxu0 %v3103_v54  ;;  %5176 = vmatmul.mubr.f32.gmra.mrb[152].mxu1 %v3116_v0  ;;  %v3026_v54 = vld [vmem:[%s9106_s5 + $0x58] sm:$0xff]  ;;  %v3029_v0 = vld [vmem:[%s9106_s5 + $0x70] sm:$0xff] }
 0x33b   : > { %5178 = vmatprep.mubr.f32.mxu1 %v3119_v12  ;;  %v3032_v12 = vld [vmem:[%s9106_s5 + $0x88] sm:$0xff] }
 0x33d   : > { %3657 = vmatmul.mubr.f32.gmra.mrb[122].mxu0 %v3102_v35  ;;  %v3035_v35 = vld [vmem:[%s9106_s5 + $0xa0] sm:$0xff] }
 0x33e   : > { %3661 = vmatprep.mubr.f32.mxu0 %v3106_v47  ;;  %5179 = vmatmul.mubr.f32.gmra.mrb[154].mxu1 %v3122_v13  ;;  %v3038_v47 = vld [vmem:[%s9106_s5 + $0xb8] sm:$0xff] }
 0x33f   : > { %5181 = vmatprep.mubr.f32.mxu1 %v3125_v41 }
 0x341   : > { %3662 = vmatmul.mubr.f32.gmra.mrb[124].mxu0 %v3105_v8 }
 0x342   : > { %3666 = vmatprep.mubr.f32.mxu0 %v3109_v14  ;;  %5182 = vmatmul.mubr.f32.gmra.mrb[156].mxu1 %v3128_v20 }
 0x343   : > { %5184 = vmatprep.mubr.f32.mxu1 %v3131_v36 }
 0x345   : > { %3667 = vmatmul.mubr.f32.gmra.mrb[126].mxu0 %v3108_v55 }
 0x346   : > { %3671 = vmatprep.mubr.f32.mxu0 %v3112_v17  ;;  %5185 = vmatmul.mubr.f32.gmra.mrb[158].mxu1 %v3134_v53 }
 0x347   : > { %5187 = vmatprep.mubr.f32.mxu1 %v3137_v25 }
 0x349   : > { %3672 = vmatmul.mubr.f32.gmra.mrb[128].mxu0 %v3111_v19 }
 0x34a   : > { %3676 = vmatprep.mubr.f32.mxu0 %v3115_v30  ;;  %5188 = vmatmul.mubr.f32.gmra.mrb[160].mxu1 %v3140_v15 }
 0x34b   : > { %5190 = vmatprep.mubr.f32.mxu1 %v3143_v60 }
 0x34d   : > { %3677 = vmatmul.mubr.f32.gmra.mrb[130].mxu0 %v3114_v31 }
 0x34e   : > { %3681 = vmatprep.mubr.f32.mxu0 %v3118_v52  ;;  %5191 = vmatmul.mubr.f32.gmra.mrb[162].mxu1 %v3146_v7 }
 0x34f   : > { %5193 = vmatprep.mubr.f32.mxu1 %v3149_v59 }
 0x351   : > { %3682 = vmatmul.mubr.f32.gmra.mrb[132].mxu0 %v3117_v9 }
 0x352   : > { %3686 = vmatprep.mubr.f32.mxu0 %v3121_v38  ;;  %5194 = vmatmul.mubr.f32.gmra.mrb[164].mxu1 %v3152_v1 }
 0x353   : > { %5196 = vmatprep.mubr.f32.mxu1 %v3155_v4 }
 0x355   : > { %3687 = vmatmul.mubr.f32.gmra.mrb[134].mxu0 %v3120_v43 }
 0x356   : > { %3691 = vmatprep.mubr.f32.mxu0 %v3124_v11  ;;  %5197 = vmatmul.mubr.f32.gmra.mrb[166].mxu1 %v3158_v29 }
 0x359   : > { %3692 = vmatmul.mubr.f32.gmra.mrb[136].mxu0 %v3123_v23 }
 0x35a   : > { %3696 = vmatprep.mubr.f32.mxu0 %v3127_v37 }
 0x35d   : > { %3697 = vmatmul.mubr.f32.gmra.mrb[138].mxu0 %v3126_v45 }
 0x35e   : > { %3701 = vmatprep.mubr.f32.mxu0 %v3130_v51 }
 0x361   : > { %3702 = vmatmul.mubr.f32.gmra.mrb[140].mxu0 %v3129_v63 }
 0x362   : > { %3706 = vmatprep.mubr.f32.mxu0 %v3133_v46 }
 0x365   : > { %3707 = vmatmul.mubr.f32.gmra.mrb[142].mxu0 %v3132_v28 }
 0x366   : > { %3711 = vmatprep.mubr.f32.mxu0 %v3136_v48  ;;  %v9314_v48 = vld [vmem:[#allocation34_spill] sm:$0xff] }
 0x369   : > { %3712 = vmatmul.mubr.f32.gmra.mrb[144].mxu0 %v3135_v3 }
 0x36a   : > { %3716 = vmatprep.mubr.f32.mxu0 %v3139_v18 }
 0x36d   : > { %3717 = vmatmul.mubr.f32.gmra.mrb[146].mxu0 %v3138_v2  ;;  %v9315_v2 = vld [vmem:[#allocation68_spill] sm:$0xff] }
 0x36e   : > { %3721 = vmatprep.mubr.f32.mxu0 %v3142_v16 }
 0x371   : > { %3722 = vmatmul.mubr.f32.gmra.mrb[148].mxu0 %v3141_v22 }
 0x372   : > { %3726 = vmatprep.mubr.f32.mxu0 %v3145_v50 }
 0x375   : > { %3727 = vmatmul.mubr.f32.gmra.mrb[150].mxu0 %v3144_v34 }
 0x376   : > { %3731 = vmatprep.mubr.f32.mxu0 %v3148_v27 }
 0x379   : > { %3732 = vmatmul.mubr.f32.gmra.mrb[152].mxu0 %v3147_v5 }
 0x37a   : > { %3736 = vmatprep.mubr.f32.mxu0 %v3151_v62  ;;  %v9316_v62 = vld [vmem:[#allocation21_spill] sm:$0xff] }
 0x37d   : > { %3737 = vmatmul.mubr.f32.gmra.mrb[154].mxu0 %v3150_v61 }
 0x37e   : > { %3741 = vmatprep.mubr.f32.mxu0 %v3154_v21 }
 0x381   : > { %3742 = vmatmul.mubr.f32.gmra.mrb[156].mxu0 %v3153_v44  ;;  %v9317_v44 = vld [vmem:[#allocation70_spill] sm:$0xff] }
 0x382   : > { %3746 = vmatprep.mubr.f32.mxu0 %v3157_v58 }
 0x385   : > { %3747 = vmatmul.mubr.f32.gmra.mrb[158].mxu0 %v3156_v57 }
 0x386   : > { %5127 = vmatprep.mubr.f32.mxu0 %v3017_v40 }
 0x389   : > { %5128 = vmatmul.mubr.f32.vlgmr.msra.gmra.mrb[160].mxu0 %v3020_v26 }
 0x38a   : > { %5130 = vmatprep.mubr.f32.mxu0 %v3023_v49 }
 0x38d   : > { %5131 = vmatmul.mubr.f32.gmra.mrb[162].mxu0 %v3026_v54 }
 0x38e   : > { %5133 = vmatprep.mubr.f32.mxu0 %v3029_v0  ;;  %v9318_v0 = vld [vmem:[#allocation35_spill] sm:$0xff] }
 0x391   : > { %5134 = vmatmul.mubr.f32.gmra.mrb[164].mxu0 %v3032_v12 }
 0x392   : > { %5136 = vmatprep.mubr.f32.mxu0 %v3035_v35 }
 0x395   : > { %5137 = vmatmul.mubr.f32.gmra.mrb[166].mxu0 %v3038_v47  ;;  %v9319_v47 = vld [vmem:[#allocation72_spill] sm:$0xff] }
 0x39c   : > { %v8766_v13 = vpop.f32.mrb[64].mxu0 }
 0x39d   : > { %v3515_v41 = vpop.f32.mrb[65].mxu0 }
 0x3a0   : > { %v8768_v8 = vpop.f32.mrb[66].mxu0 }
 0x3a1   : > { %v3520_v14 = vpop.f32.mrb[67].mxu0 }
 0x3a4   : > { %v8770_v20 = vpop.f32.mrb[68].mxu0 }
 0x3a5   : > { %v3525_v36 = vpop.f32.mrb[69].mxu0 }
 0x3a8   : > { %v8772_v55 = vpop.f32.mrb[70].mxu0 }
 0x3a9   : > { %v3530_v17 = vpop.f32.mrb[71].mxu0 }
 0x3ac   : > { %v8774_v53 = vpop.f32.mrb[72].mxu0 }
 0x3ad   : > { %v3535_v25 = vpop.f32.mrb[73].mxu0 }
 0x3b0   : > { %v8776_v19 = vpop.f32.mrb[74].mxu0 }
 0x3b1   : > { %v3540_v30 = vpop.f32.mrb[75].mxu0 }
 0x3b4   : > { %v8778_v15 = vpop.f32.mrb[76].mxu0 }
 0x3b5   : > { %v3545_v60 = vpop.f32.mrb[77].mxu0 }
 0x3b8   : > { %v8780_v31 = vpop.f32.mrb[78].mxu0 }
 0x3b9   : > { %v3550_v52 = vpop.f32.mrb[79].mxu0 }
 0x3bc   : > { %v3553_v7 = vpop.f32.mrb[80].mxu0 }
 0x3bd   : > { %v3555_v59 = vpop.f32.mrb[81].mxu0  ;;  %v3554_v16 = vadd.f32 %v3553_v7, %v9315_v2  ;;  %v9320_v7 = vld [vmem:[#allocation74_spill] sm:$0xff] }
 0x3c0   : > { %v3558_v9 = vpop.f32.mrb[82].mxu0 }
 0x3c1   : > { %v3560_v38 = vpop.f32.mrb[83].mxu0  ;;  %v3559_v3 = vadd.f32 %v3558_v9, %v9314_v48 }
 0x3c4   : > { %v3563_v1 = vpop.f32.mrb[84].mxu0 }
 0x3c5   : > { %v3565_v4 = vpop.f32.mrb[85].mxu0  ;;  %v3564_v58 = vadd.f32 %v3563_v1, %v9317_v44 }
 0x3c8   : > { %v3568_v43 = vpop.f32.mrb[86].mxu0 }
 0x3c9   : > { %v3570_v11 = vpop.f32.mrb[87].mxu0  ;;  %v3569_v61 = vadd.f32 %v3568_v43, %v9316_v62 }
 0x3cc   : > { %v3573_v29 = vpop.f32.mrb[88].mxu0 }
 0x3cd   : > { %v3575_v23 = vpop.f32.mrb[89].mxu0  ;;  %v3574_v41 = vadd.f32 %v3573_v29, %v9319_v47 }
 0x3ce   : > { %v9321_v23 = vld [vmem:[#allocation76_spill] sm:$0xff] }
 0x3d0   : > { %v3578_v37 = vpop.f32.mrb[90].mxu0 }
 0x3d1   : > { %v3580_v45 = vpop.f32.mrb[91].mxu0  ;;  %v3579_v12 = vadd.f32 %v3578_v37, %v9318_v0  ;;  %v9324_v0 = vld [vmem:[#allocation80_spill] sm:$0xff] }
 0x3d4   : > { %v3583_v51 = vpop.f32.mrb[92].mxu0 }
 0x3d5   : > { %v3585_v63 = vpop.f32.mrb[93].mxu0  ;;  %v3584_v59 = vadd.f32 %v3583_v51, %v9320_v7 }
 0x3d8   : > { %v3588_v46 = vpop.f32.mrb[94].mxu0 }
 0x3d9   : > { %v3590_v28 = vpop.f32.mrb[95].mxu0  ;;  %v3589_v60 = vadd.f32 %v3588_v46, %v8008_v10 }
 0x3dc   : > { %v3593_v18 = vpop.f32.mrb[96].mxu0 }
 0x3dd   : > { %v5141_v22 = vpop.f32.mrb[128].mxu1  ;;  %v3595_v50 = vpop.f32.mrb[97].mxu0  ;;  %v3594_v37 = vadd.f32 %v3593_v18, %v9321_v23 }
 0x3de   : > { %v8784_v34 = vadd.f32 %v5141_v22, %v3559_v3  ;;  %v3858_v27 = vpop.f32.mrb[129].mxu1  ;;  %v9322_v3 = vld [vmem:[#allocation78_spill] sm:$0xff] }
 0x3df   : > { %v8786_v5 = vadd.f32 %v3858_v27, %v3554_v16 }
 0x3e0   : > { %v3598_v21 = vpop.f32.mrb[98].mxu0 }
 0x3e1   : > { %v5144_v57 = vpop.f32.mrb[130].mxu1  ;;  %v3600_v40 = vpop.f32.mrb[99].mxu0  ;;  %v3599_v11 = vadd.f32 %v3598_v21, %v8038_v6 }
 0x3e2   : > { %v8790_v26 = vadd.f32 %v5144_v57, %v3569_v61  ;;  %v3868_v49 = vpop.f32.mrb[131].mxu1  ;;  %v9323_v61 = vld [vmem:[#allocation79_spill] sm:$0xff] }
 0x3e3   : > { %v8792_v54 = vadd.f32 %v3868_v49, %v3564_v58 }
 0x3e4   : > { %v3603_v35 = vpop.f32.mrb[100].mxu0 }
 0x3e5   : > { %v5147_v14 = vpop.f32.mrb[132].mxu1  ;;  %v3605_v36 = vpop.f32.mrb[101].mxu0  ;;  %v3604_v2 = vadd.f32 %v3603_v35, %v9322_v3 }
 0x3e6   : > { %v8796_v17 = vadd.f32 %v5147_v14, %v3579_v12  ;;  %v3878_v25 = vpop.f32.mrb[133].mxu1 }
 0x3e7   : > { %v8798_v30 = vadd.f32 %v3878_v25, %v3574_v41 }
 0x3e8   : > { %v3608_v52 = vpop.f32.mrb[102].mxu0 }
 0x3e9   : > { %v5150_v9 = vpop.f32.mrb[134].mxu1  ;;  %v3610_v38 = vpop.f32.mrb[103].mxu0  ;;  %v3609_v51 = vadd.f32 %v3608_v52, %v8065_v42 }
 0x3ea   : > { %v8802_v1 = vadd.f32 %v5150_v9, %v3589_v60  ;;  %v3888_v4 = vpop.f32.mrb[135].mxu1  ;;  %v9325_v60 = vld [vmem:[#allocation38_spill] sm:$0xff] }
 0x3eb   : > { %v8804_v43 = vadd.f32 %v3888_v4, %v3584_v59 }
 0x3ec   : > { %v3613_v29 = vpop.f32.mrb[104].mxu0 }
 0x3ed   : > { %v5153_v45 = vpop.f32.mrb[136].mxu1  ;;  %v3615_v63 = vpop.f32.mrb[105].mxu0  ;;  %v3614_v21 = vadd.f32 %v3613_v29, %v9323_v61 }
 0x3ee   : > { %v8808_v28 = vadd.f32 %v5153_v45, %v3599_v11  ;;  %v3898_v10 = vpop.f32.mrb[137].mxu1  ;;  %v9326_v63 = vld [vmem:[#allocation81_spill] sm:$0xff] }
 0x3ef   : > { %v8810_v46 = vadd.f32 %v3898_v10, %v3594_v37 }
 0x3f0   : > { %v3618_v48 = vpop.f32.mrb[106].mxu0 }
 0x3f1   : > { %v5156_v16 = vpop.f32.mrb[138].mxu1  ;;  %v3620_v22 = vpop.f32.mrb[107].mxu0  ;;  %v3619_v18 = vadd.f32 %v3618_v48, %v8080_v32 }
 0x3f2   : > { %v8814_v50 = vadd.f32 %v5156_v16, %v3609_v51  ;;  %v3908_v6 = vpop.f32.mrb[139].mxu1  ;;  %v9328_v22 = vld [vmem:[#allocation23_spill] sm:$0xff] }
 0x3f3   : > { %v8816_v27 = vadd.f32 %v3908_v6, %v3604_v2 }
 0x3f4   : > { %v3623_v62 = vpop.f32.mrb[108].mxu0 }
 0x3f5   : > { %v5159_v44 = vpop.f32.mrb[140].mxu1  ;;  %v3625_v58 = vpop.f32.mrb[109].mxu0  ;;  %v3624_v12 = vadd.f32 %v3623_v62, %v9324_v0 }
 0x3f6   : > { %v8820_v57 = vadd.f32 %v5159_v44, %v3619_v18  ;;  %v3918_v42 = vpop.f32.mrb[141].mxu1  ;;  %v9330_v44 = vld [vmem:[#allocation40_spill] sm:$0xff] }
 0x3f7   : > { %v8822_v40 = vadd.f32 %v3918_v42, %v3614_v21 }
 0x3f8   : > { %v3628_v49 = vpop.f32.mrb[110].mxu0 }
 0x3f9   : > { %v3629_v35 = vadd.f32 %v3628_v49, %v8102_v39  ;;  %v5162_v47 = vpop.f32.mrb[142].mxu1  ;;  %v3630_v41 = vpop.f32.mrb[111].mxu0 }
 0x3fa   : > { %v3928_v14 = vpop.f32.mrb[143].mxu1 }
 0x3fb   : > { %v8826_v36 = vadd.f32 %v5162_v47, %v3629_v35  ;;  %v8828_v32 = vadd.f32 %v3928_v14, %v3624_v12  ;;  %v9332_v47 = vld [vmem:[#allocation37_spill] sm:$0xff] }
 0x3fc   : > { %v3633_v25 = vpop.f32.mrb[112].mxu0 }
 0x3fd   : > { %v3634_v52 = vadd.f32 %v3633_v25, %v9325_v60  ;;  %v5165_v7 = vpop.f32.mrb[144].mxu1  ;;  %v3635_v59 = vpop.f32.mrb[113].mxu0 }
 0x3fe   : > { %v3938_v9 = vpop.f32.mrb[145].mxu1  ;;  %v9334_v59 = vld [vmem:[#allocation27_spill] sm:$0xff] }
 0x3ff   : > { %v8831_v38 = vadd.f32 %v3938_v9, %v3634_v52 }
 0x400   : > { %v3638_v4 = vpop.f32.mrb[114].mxu0 }
 0x401   : > { %v3639_v11 = vadd.f32 %v3638_v4, %v8119_v24  ;;  %v3640_v29 = vpop.f32.mrb[115].mxu0  ;;  %v5168_v39 = vpop.f32.mrb[146].mxu1 }
 0x402   : > { %v3948_v23 = vpop.f32.mrb[147].mxu1 }
 0x403   : > { %v8834_v37 = vadd.f32 %v5165_v7, %v3639_v11 }
 0x404   : > { %v3643_v45 = vpop.f32.mrb[116].mxu0 }
 0x405   : > { %v3644_v10 = vadd.f32 %v3643_v45, %v9326_v63  ;;  %v3645_v51 = vpop.f32.mrb[117].mxu0  ;;  %v5171_v48 = vpop.f32.mrb[148].mxu1  ;;  %v9336_v45 = vld [vmem:[#allocation39_spill] sm:$0xff] }
 0x406   : > { %v3958_v3 = vpop.f32.mrb[149].mxu1 }
 0x407   : > { %v8837_v2 = vadd.f32 %v3948_v23, %v3644_v10 }
 0x408   : > { %v3648_v16 = vpop.f32.mrb[118].mxu0 }
 0x409   : > { %9327 = vst [vmem:[#allocation29_spill] sm:$0xff] %v8837_v2  ;;  %v3649_v6 = vadd.f32 %v3648_v16, %v9328_v22  ;;  %v3650_v18 = vpop.f32.mrb[119].mxu0  ;;  %v5174_v62 = vpop.f32.mrb[150].mxu1 }
 0x40a   : > { %v3968_v61 = vpop.f32.mrb[151].mxu1 }
 0x40b   : > { %v8840_v24 = vadd.f32 %v5168_v39, %v3649_v6  ;;  %v9338_v6 = vld [vmem:[#allocation13_spill] sm:$0xff] }
 0x40c   : > { %v3653_v21 = vpop.f32.mrb[120].mxu0 }
 0x40d   : > { %9329 = vst [vmem:[#allocation46_spill] sm:$0xff] %v8840_v24  ;;  %v3654_v58 = vadd.f32 %v3653_v21, %v9330_v44  ;;  %v3655_v42 = vpop.f32.mrb[121].mxu0  ;;  %v5177_v49 = vpop.f32.mrb[152].mxu1 }
 0x40e   : > { %v3978_v0 = vpop.f32.mrb[153].mxu1  ;;  %v8855_v44 = vpop.permute.xlu0 %4224 }
 0x40f   : > { %v8843_v12 = vadd.f32 %v3958_v3, %v3654_v58 }
 0x410   : > { %v3658_v35 = vpop.f32.mrb[122].mxu0 }
 0x411   : > { %9331 = vst [vmem:[#allocation56_spill] sm:$0xff] %v8843_v12  ;;  %v3659_v41 = vadd.f32 %v3658_v35, %v9332_v47  ;;  %v3660_v14 = vpop.f32.mrb[123].mxu0  ;;  %v5180_v25 = vpop.f32.mrb[154].mxu1  ;;  %v9340_v35 = vld [vmem:[#allocation41_spill] sm:$0xff] }
 0x412   : > { %v3988_v60 = vpop.f32.mrb[155].mxu1 }
 0x413   : > { %v8846_v52 = vadd.f32 %v5171_v48, %v3659_v41 }
 0x414   : > { %v3663_v7 = vpop.f32.mrb[124].mxu0 }
 0x415   : > { %9333 = vst [vmem:[#allocation17_spill] sm:$0xff] %v8846_v52  ;;  %v3664_v9 = vadd.f32 %v3663_v7, %v9334_v59  ;;  %v3665_v4 = vpop.f32.mrb[125].mxu0  ;;  %v5183_v11 = vpop.f32.mrb[156].mxu1 }
 0x416   : > { %v3998_v29 = vpop.f32.mrb[157].mxu1  ;;  %v9342_v4 = vld [vmem:[#allocation42_spill] sm:$0xff] }
 0x417   : > { %v8849_v39 = vadd.f32 %v3968_v61, %v3664_v9 }
 0x418   : > { %v3668_v23 = vpop.f32.mrb[126].mxu0 }
 0x419   : > { %9335 = vst [vmem:[#allocation47_spill] sm:$0xff] %v8849_v39  ;;  %v3669_v63 = vadd.f32 %v3668_v23, %v9336_v45  ;;  %v3670_v10 = vpop.f32.mrb[127].mxu0  ;;  %v5186_v51 = vpop.f32.mrb[158].mxu1 }
 0x41a   : > { %v4008_v3 = vpop.f32.mrb[159].mxu1 }
 0x41b   : > { %v8852_v16 = vadd.f32 %v5174_v62, %v3669_v63  ;;  %v8862_v62 = vpop.permute.xlu0 %4234 }
 0x41c   : > { %v3673_v22 = vpop.f32.mrb[128].mxu0 }
 0x41d   : > { %9337 = vst [vmem:[#allocation16_spill] sm:$0xff] %v8852_v16  ;;  %v3674_v48 = vadd.f32 %v3673_v22, %v9338_v6  ;;  %v3675_v18 = vpop.f32.mrb[129].mxu0  ;;  %v5189_v21 = vpop.f32.mrb[160].mxu1  ;;  %v9344_v6 = vld [vmem:[#allocation26_spill] sm:$0xff] }
 0x41e   : > { %v4018_v58 = vpop.f32.mrb[161].mxu1 }
 0x41f   : > { %v8857_v42 = vadd.f32 %v3978_v0, %v3674_v48 }
 0x420   : > { %v3678_v61 = vpop.f32.mrb[130].mxu0 }
 0x421   : > { %9339 = vst [vmem:[#allocation43_spill] sm:$0xff] %v8857_v42  ;;  %v3679_v47 = vadd.f32 %v3678_v61, %v9340_v35  ;;  %v3680_v41 = vpop.f32.mrb[131].mxu0  ;;  %v5192_v14 = vpop.f32.mrb[162].mxu1 }
 0x422   : > { %v4028_v7 = vpop.f32.mrb[163].mxu1  ;;  %v8870_v41 = vpop.permute.xlu0 %4244 }
 0x423   : > { %v8860_v59 = vadd.f32 %v5177_v49, %v3679_v47 }
 0x424   : > { %v3683_v9 = vpop.f32.mrb[132].mxu0 }
 0x425   : > { %9341 = vst [vmem:[#allocation31_spill] sm:$0xff] %v8860_v59  ;;  %v3684_v23 = vadd.f32 %v3683_v9, %v9342_v4  ;;  %v3685_v45 = vpop.f32.mrb[133].mxu0  ;;  %v5195_v63 = vpop.f32.mrb[164].mxu1 }
 0x426   : > { %v4038_v10 = vpop.f32.mrb[165].mxu1  ;;  %v8875_v4 = vpop.permute.xlu1 %4229 }
 0x427   : > { %v8865_v22 = vadd.f32 %v3988_v60, %v3684_v23  ;;  %v8879_v23 = vpop.permute.xlu0 %4254 }
 0x428   : > { %v3688_v0 = vpop.f32.mrb[134].mxu0 }
 0x429   : > { %9343 = vst [vmem:[#allocation44_spill] sm:$0xff] %v8865_v22  ;;  %v3689_v48 = vadd.f32 %v3688_v0, %v9344_v6  ;;  %v3690_v18 = vpop.f32.mrb[135].mxu0  ;;  %v8868_v61 = vpop.f32.mrb[166].mxu1  ;;  %v9348_v0 = vld [vmem:[#allocation14_spill] sm:$0xff] }
 0x42a   : > { %v4048_v35 = vpop.f32.mrb[167].mxu1  ;;  %v8884_v42 = vpop.permute.xlu1 %4239 }
 0x42b   : > { %v8872_v49 = vadd.f32 %v5180_v25, %v3689_v48  ;;  %v9350_v25 = vld [vmem:[#allocation24_spill] sm:$0xff] }
 0x42c   : > { %v3693_v47 = vpop.f32.mrb[136].mxu0 }
 0x42d   : > { %9345 = vst [vmem:[#allocation33_spill] sm:$0xff] %v8872_v49  ;;  %v3694_v56 = vadd.f32 %v3693_v47, %v9346_v33  ;;  %v3695_v9 = vpop.f32.mrb[137].mxu0  ;;  %v8887_v33 = vpop.permute.xlu0 %4264 }
 0x42e   : > { %v8892_v16 = vpop.permute.xlu1 %4249 }
 0x42f   : > { %v8877_v45 = vadd.f32 %v3998_v29, %v3694_v56  ;;  %v9352_v29 = vld [vmem:[#allocation84_spill] sm:$0xff] }
 0x430   : > { %v3698_v60 = vpop.f32.mrb[138].mxu0 }
 0x431   : > { %9347 = vst [vmem:[#allocation45_spill] sm:$0xff] %v8877_v45  ;;  %v3699_v6 = vadd.f32 %v3698_v60, %v9348_v0  ;;  %v3700_v18 = vpop.f32.mrb[139].mxu0  ;;  %v8896_v0 = vpop.permute.xlu0 %4274 }
 0x433   : > { %v8882_v22 = vadd.f32 %v5183_v11, %v3699_v6  ;;  %v9354_v6 = vld [vmem:[#allocation25_spill] sm:$0xff] }
 0x434   : > { %v3703_v59 = vpop.f32.mrb[140].mxu0 }
 0x435   : > { %9349 = vst [vmem:[#allocation60_spill] sm:$0xff] %v8882_v22  ;;  %v3704_v48 = vadd.f32 %v3703_v59, %v9350_v25  ;;  %v3705_v49 = vpop.f32.mrb[141].mxu0  ;;  %v8901_v25 = vpop.permute.xlu1 %4259 }
 0x437   : > { %v8889_v47 = vadd.f32 %v4008_v3, %v3704_v48  ;;  %v9356_v3 = vld [vmem:[#allocation12_spill] sm:$0xff] }
 0x438   : > { %v3708_v56 = vpop.f32.mrb[142].mxu0 }
 0x439   : > { %9351 = vst [vmem:[#allocation49_spill] sm:$0xff] %v8889_v47  ;;  %v3709_v9 = vadd.f32 %v3708_v56, %v9352_v29  ;;  %v3710_v45 = vpop.f32.mrb[143].mxu0  ;;  %v8904_v56 = vpop.permute.xlu0 %4284  ;;  %v9358_v29 = vld [vmem:[#allocation82_spill] sm:$0xff] }
 0x43a   : > { %v8909_v39 = vpop.permute.xlu1 %4269 }
 0x43b   : > { %v8894_v60 = vadd.f32 %v5186_v51, %v3709_v9 }
 0x43c   : > { %v3713_v11 = vpop.f32.mrb[144].mxu0 }
 0x43d   : > { %9353 = vst [vmem:[#allocation63_spill] sm:$0xff] %v8894_v60  ;;  %v3714_v18 = vadd.f32 %v3713_v11, %v9354_v6  ;;  %v3715_v22 = vpop.f32.mrb[145].mxu0  ;;  %v9360_v6 = vld [vmem:[#allocation87_spill] sm:$0xff] }
 0x43e   : > { %v8913_v22 = vpop.permute.xlu0 %4294 }
 0x43f   : > { %v8899_v59 = vadd.f32 %v4018_v58, %v3714_v18 }
 0x440   : > { %v3718_v49 = vpop.f32.mrb[146].mxu0 }
 0x441   : > { %9355 = vst [vmem:[#allocation65_spill] sm:$0xff] %v8899_v59  ;;  %v3719_v48 = vadd.f32 %v3718_v49, %v9356_v3  ;;  %v3720_v47 = vpop.f32.mrb[147].mxu0  ;;  %v8918_v3 = vpop.permute.xlu1 %4279 }
 0x443   : > { %v8906_v45 = vadd.f32 %v5189_v21, %v3719_v48  ;;  %v9362_v21 = vld [vmem:[#allocation83_spill] sm:$0xff] }
 0x444   : > { %v3723_v51 = vpop.f32.mrb[148].mxu0 }
 0x445   : > { %9357 = vst [vmem:[#allocation50_spill] sm:$0xff] %v8906_v45  ;;  %v3724_v9 = vadd.f32 %v3723_v51, %v9358_v29  ;;  %v3725_v60 = vpop.f32.mrb[149].mxu0  ;;  %v8921_v51 = vpop.permute.xlu0 %4304  ;;  %v9364_v29 = vld [vmem:[#allocation15_spill] sm:$0xff] }
 0x446   : > { %v8926_v52 = vpop.permute.xlu1 %4289 }
 0x447   : > { %v8911_v11 = vadd.f32 %v4028_v7, %v3724_v9 }
 0x448   : > { %v3728_v58 = vpop.f32.mrb[150].mxu0 }
 0x449   : > { %9359 = vst [vmem:[#allocation67_spill] sm:$0xff] %v8911_v11  ;;  %v3729_v18 = vadd.f32 %v3728_v58, %v9360_v6  ;;  %v3730_v59 = vpop.f32.mrb[151].mxu0  ;;  %v9366_v6 = vld [vmem:[#allocation85_spill] sm:$0xff] }
 0x44a   : > { %v8930_v59 = vpop.permute.xlu0 %4314 }
 0x44b   : > { %v8916_v49 = vadd.f32 %v5192_v14, %v3729_v18 }
 0x44c   : > { %v3733_v47 = vpop.f32.mrb[152].mxu0 }
 0x44d   : > { %9361 = vst [vmem:[#allocation51_spill] sm:$0xff] %v8916_v49  ;;  %v3734_v48 = vadd.f32 %v3733_v47, %v9362_v21  ;;  %v3735_v45 = vpop.f32.mrb[153].mxu0  ;;  %v8935_v21 = vpop.permute.xlu1 %4299 }
 0x44f   : > { %v8923_v60 = vadd.f32 %v4038_v10, %v3734_v48  ;;  %v9368_v10 = vld [vmem:[#allocation61_spill] sm:$0xff] }
 0x450   : > { %v3738_v7 = vpop.f32.mrb[154].mxu0 }
 0x451   : > { %9363 = vst [vmem:[#allocation69_spill] sm:$0xff] %v8923_v60  ;;  %v3739_v9 = vadd.f32 %v3738_v7, %v9364_v29  ;;  %v3740_v11 = vpop.f32.mrb[155].mxu0  ;;  %v8938_v7 = vpop.permute.xlu0 %4324 }
 0x452   : > { %v9369_v11 = vld [vmem:[#allocation19_spill] sm:$0xff] }
 0x453   : > { %v8928_v58 = vadd.f32 %v5195_v63, %v3739_v9  ;;  %v3519_v63 = vadd.f32 %v8768_v8, %v9369_v11  ;;  %v9371_v9 = vld [vmem:[#allocation59_spill] sm:$0xff] }
 0x454   : > { %v3743_v14 = vpop.f32.mrb[156].mxu0 }
 0x455   : > { %9365 = vst [vmem:[#allocation52_spill] sm:$0xff] %v8928_v58  ;;  %v3744_v18 = vadd.f32 %v3743_v14, %v9366_v6  ;;  %v3745_v49 = vpop.f32.mrb[157].mxu0  ;;  %v3514_v14 = vadd.f32 %v8766_v13, %v9371_v9  ;;  %v9372_v58 = vld [vmem:[#allocation30_spill] sm:$0xff] }
 0x457   : > { %v8933_v47 = vadd.f32 %v4048_v35, %v3744_v18 }
 0x458   : > { %v3748_v45 = vpop.f32.mrb[158].mxu0 }
 0x459   : > { %9367 = vst [vmem:[#allocation71_spill] sm:$0xff] %v8933_v47  ;;  %v3749_v48 = vadd.f32 %v3748_v45, %v9368_v10  ;;  %v3750_v60 = vpop.f32.mrb[159].mxu0  ;;  %v8947_v47 = vpop.permute.xlu1 %4309  ;;  %v9373_v10 = vld [vmem:[#allocation62_spill] sm:$0xff] }
 0x45a   : > { %v3529_v60 = vadd.f32 %v8772_v55, %v9372_v58  ;;  %v3524_v12 = vadd.f32 %v8770_v20, %v9373_v10 }
 0x45b   : > { %v8943_v29 = vadd.f32 %v8868_v61, %v3749_v48  ;;  %v8953_v61 = vpop.permute.xlu0 %4334 }
 0x45c   : > { %v5129_v49 = vpop.f32.mrb[160].mxu0 }
 0x45d   : > { %9370 = vst [vmem:[#allocation53_spill] sm:$0xff] %v8943_v29  ;;  %v3824_v35 = vadd.f32 %v5129_v49, %v3519_v63  ;;  %v3818_v6 = vpop.f32.mrb[161].mxu0  ;;  %v9374_v49 = vld [vmem:[#allocation32_spill] sm:$0xff]  ;;  %v8961_v10 = vpop.permute.xlu1 %4319 }
 0x45e   : > { %v3819_v18 = vadd.f32 %v3818_v6, %v3514_v14  ;;  %v3539_v6 = vadd.f32 %v8776_v19, %v9374_v49  ;;  %v9375_v29 = vld [vmem:[#allocation64_spill] sm:$0xff] }
 0x45f   : > { %v4058_v45 = vmax.f32 %v3824_v35, 0.0  ;;  %v3534_v55 = vadd.f32 %v8774_v53, %v9375_v29  ;;  %v9377_v19 = vld [vmem:[#allocation20_spill] sm:$0xff] }
 0x460   : > { %v4057_v8 = vmax.f32 %v3819_v18, 0.0  ;;  %v5132_v11 = vpop.f32.mrb[162].mxu0 }
 0x461   : > { %v4463_v48 = vmul.f32 %v8875_v4, %v4058_v45  ;;  %v3834_v13 = vadd.f32 %v5132_v11, %v3529_v60  ;;  %v3828_v9 = vpop.f32.mrb[163].mxu0  ;;  %v8964_v45 = vpop.permute.xlu0 %4344 }
 0x462   : > { %v4462_v63 = vmul.f32 %v8855_v44, %v4057_v8  ;;  %v3829_v14 = vadd.f32 %v3828_v9, %v3524_v12  ;;  %v9376_v12 = vld [vmem:[#allocation66_spill] sm:$0xff]  ;;  %v3549_v8 = vadd.f32 %v8780_v31, %v9377_v19  ;;  %v4330_v49 = vpop.permute.xlu1 %4329  ;;  %v4065_v31 = vmax.f32 %v8786_v5, 0.0 }
 0x463   : > { %v4060_v35 = vmax.f32 %v3834_v13, 0.0  ;;  %v3544_v44 = vadd.f32 %v8778_v15, %v9376_v12  ;;  %v4068_v5 = vmax.f32 %v8790_v26, 0.0 }
 0x464   : > { %v4510_v58 = vadd.f32 %v4463_v48, %v4462_v63  ;;  %v4059_v20 = vmax.f32 %v3829_v14, 0.0  ;;  %v5135_v18 = vpop.f32.mrb[164].mxu0 }
 0x465   : > { %v3844_v24 = vadd.f32 %v5135_v18, %v3539_v6  ;;  %v3838_v2 = vpop.f32.mrb[165].mxu0  ;;  %v4465_v53 = vmul.f32 %v8884_v42, %v4060_v35  ;;  %v8973_v18 = vpop.permute.xlu0 %4354 }
 0x466   : > { %v4464_v4 = vmul.f32 %v8862_v62, %v4059_v20  ;;  %v3839_v60 = vadd.f32 %v3838_v2, %v3534_v55 }
 0x467   : > { %v4062_v11 = vmax.f32 %v3844_v24, 0.0 }
 0x468   : > { %v4511_v29 = vadd.f32 %v4510_v58, %v4464_v4  ;;  %v4061_v48 = vmax.f32 %v3839_v60, 0.0  ;;  %v5138_v13 = vpop.f32.mrb[166].mxu0  ;;  %v4066_v58 = vmax.f32 %v8784_v34, 0.0  ;;  %v4340_v4 = vpop.permute.xlu1 %4339  ;;  %v4470_v60 = vmul.f32 %v8887_v33, %v4065_v31 }
 0x469   : > { %v3854_v9 = vadd.f32 %v5138_v13, %v3549_v8  ;;  %v3848_v63 = vpop.f32.mrb[167].mxu0  ;;  %v4467_v6 = vmul.f32 %v8892_v16, %v4062_v11  ;;  %v4067_v16 = vmax.f32 %v8792_v54, 0.0  ;;  %v4069_v34 = vmax.f32 %v8798_v30, 0.0 }
 0x46a   : > { %v4466_v14 = vmul.f32 %v8870_v41, %v4061_v48  ;;  %v4512_v62 = vadd.f32 %v4511_v29, %v4465_v53  ;;  %v3849_v2 = vadd.f32 %v3848_v63, %v3544_v44  ;;  %v8981_v44 = vpop.permute.xlu0 %4364  ;;  %v4471_v19 = vmul.f32 %v8909_v39, %v4066_v58 }
 0x46b   : > { %v4064_v15 = vmax.f32 %v3854_v9, 0.0  ;;  %v4473_v29 = vmul.f32 %v8918_v3, %v4068_v5  ;;  %v4070_v33 = vmax.f32 %v8796_v17, 0.0  ;;  %v4474_v48 = vmul.f32 %v8904_v56, %v4069_v34  ;;  %v9379_v34 = vld [vmem:[#allocation46_spill] sm:$0xff] }
 0x46c   : > { %v4513_v55 = vadd.f32 %v4512_v62, %v4466_v14  ;;  %v4063_v20 = vmax.f32 %v3849_v2, 0.0  ;;  %v4071_v39 = vmax.f32 %v8804_v43, 0.0  ;;  %v4073_v3 = vmax.f32 %v8810_v46, 0.0 }
 0x46d   : > { %v4469_v35 = vmul.f32 %v8901_v25, %v4064_v15  ;;  %v4350_v25 = vpop.permute.xlu1 %4349  ;;  %v4475_v26 = vmul.f32 %v8926_v52, %v4070_v33  ;;  %v4074_v56 = vmax.f32 %v8808_v28, 0.0  ;;  %v4075_v52 = vmax.f32 %v8816_v27, 0.0 }
 0x46e   : > { %v4468_v24 = vmul.f32 %v8879_v23, %v4063_v20  ;;  %v4514_v42 = vadd.f32 %v4513_v55, %v4467_v6  ;;  %v4472_v23 = vmul.f32 %v8896_v0, %v4067_v16  ;;  %v8989_v54 = vpop.permute.xlu0 %4374  ;;  %v4072_v0 = vmax.f32 %v8802_v1, 0.0 }
 0x46f   : > { %v4476_v63 = vmul.f32 %v8913_v22, %v4071_v39  ;;  %v4478_v43 = vmul.f32 %v8921_v51, %v4073_v3  ;;  %v4479_v55 = vmul.f32 %v8947_v47, %v4074_v56  ;;  %v4076_v22 = vmax.f32 %v8814_v50, 0.0  ;;  %v9383_v3 = vld [vmem:[#allocation16_spill] sm:$0xff] }
 0x470   : > { %v4515_v41 = vadd.f32 %v4514_v42, %v4468_v24  ;;  %v4477_v62 = vmul.f32 %v8935_v21, %v4072_v0  ;;  %v4480_v20 = vmul.f32 %v8930_v59, %v4075_v52  ;;  %v4077_v31 = vmax.f32 %v8822_v40, 0.0 }
 0x471   : > { %v4360_v30 = vpop.permute.xlu1 %4359  ;;  %v4481_v28 = vmul.f32 %v8961_v10, %v4076_v22  ;;  %v4078_v24 = vmax.f32 %v8820_v57, 0.0  ;;  %v4079_v58 = vmax.f32 %v8828_v32, 0.0  ;;  %v4081_v40 = vmax.f32 %v8831_v38, 0.0  ;;  %v9378_v32 = vld [vmem:[#allocation29_spill] sm:$0xff]  ;;  %v9380_v38 = vld [vmem:[#allocation56_spill] sm:$0xff] }
 0x472   : > { %v4516_v12 = vadd.f32 %v4515_v41, %v4469_v35  ;;  %v8997_v17 = vpop.permute.xlu0 %4384  ;;  %v4482_v27 = vmul.f32 %v8938_v7, %v4077_v31  ;;  %v4080_v41 = vmax.f32 %v8826_v36, 0.0  ;;  %v4082_v57 = vmax.f32 %v8834_v37, 0.0  ;;  %v9381_v37 = vld [vmem:[#allocation17_spill] sm:$0xff] }
 0x473   : > { %v4483_v50 = vmul.f32 %v4330_v49, %v4078_v24  ;;  %v4484_v59 = vmul.f32 %v8953_v61, %v4079_v58  ;;  %v4486_v7 = vmul.f32 %v8964_v45, %v4081_v40  ;;  %v4084_v36 = vmax.f32 %v9379_v34, 0.0  ;;  %v9387_v24 = vld [vmem:[#allocation33_spill] sm:$0xff]  ;;  %v9388_v58 = vld [vmem:[#allocation86_spill] sm:$0xff] }
 0x474   : > { %v4517_v8 = vadd.f32 %v4516_v12, %v4470_v60  ;;  %v4485_v12 = vmul.f32 %v4340_v4, %v4080_v41  ;;  %v4487_v49 = vmul.f32 %v4350_v25, %v4082_v57  ;;  %v4085_v33 = vmax.f32 %v9380_v38, 0.0 }
 0x475   : > { %v4370_v1 = vpop.permute.xlu1 %4369  ;;  %v4086_v39 = vmax.f32 %v9381_v37, 0.0 }
 0x476   : > { %v4518_v53 = vadd.f32 %v4517_v8, %v4471_v19  ;;  %v4395_v46 = vpop.permute.xlu0 %4394  ;;  %v4083_v8 = vmax.f32 %v9378_v32, 0.0  ;;  %v4490_v45 = vmul.f32 %v8981_v44, %v4085_v33 }
 0x478   : > { %v4519_v11 = vadd.f32 %v4518_v53, %v4472_v23  ;;  %v4488_v61 = vmul.f32 %v8973_v18, %v4083_v8 }
 0x479   : > { %v4380_v42 = vpop.permute.xlu1 %4379 }
 0x47a   : > { %v4520_v13 = vadd.f32 %v4519_v11, %v4473_v29  ;;  %v4405_v35 = vpop.permute.xlu0 %4404 }
 0x47c   : > { %v4521_v9 = vadd.f32 %v4520_v13, %v4474_v48  ;;  %v4489_v48 = vmul.f32 %v4360_v30, %v4084_v36  ;;  %v9393_v36 = vld [vmem:[#allocation48_spill] sm:$0xff] }
 0x47d   : > { %v4390_v10 = vpop.permute.xlu1 %4389 }
 0x47e   : > { %v4522_v14 = vadd.f32 %v4521_v9, %v4475_v26  ;;  %v4415_v5 = vpop.permute.xlu0 %4414  ;;  %v9382_v26 = vld [vmem:[#allocation47_spill] sm:$0xff] }
 0x47f   : > { %v4087_v0 = vmax.f32 %v9382_v26, 0.0 }
 0x480   : > { %v4523_v2 = vadd.f32 %v4522_v14, %v4476_v63  ;;  %v4491_v63 = vmul.f32 %v4370_v1, %v4086_v39  ;;  %v4088_v14 = vmax.f32 %v9383_v3, 0.0  ;;  %v9396_v39 = vld [vmem:[#allocation65_spill] sm:$0xff]  ;;  %v9398_v3 = vld [vmem:[#allocation50_spill] sm:$0xff] }
 0x481   : > { %v4400_v29 = vpop.permute.xlu1 %4399  ;;  %v4492_v56 = vmul.f32 %v8989_v54, %v4087_v0  ;;  %v5510_v54 = vld [vmem:[%s5804_s16 + $0x30] sm:$0xff]  ;;  %v9397_v0 = vld [vmem:[#allocation28_spill] sm:$0xff] }
 0x482   : > { %v4524_v6 = vadd.f32 %v4523_v2, %v4477_v62  ;;  %v4425_v4 = vpop.permute.xlu0 %4424  ;;  %v9384_v2 = vld [vmem:[#allocation43_spill] sm:$0xff]  ;;  %v4493_v52 = vmul.f32 %v4380_v42, %v4088_v14  ;;  %v9389_v42 = vld [vmem:[#allocation45_spill] sm:$0xff]  ;;  %v4098_v14 = vmax.f32 %v9398_v3, 0.0 }
 0x483   : > { %v4093_v41 = vmax.f32 %v9389_v42, 0.0  ;;  %v9404_v42 = vld [vmem:[#allocation71_spill] sm:$0xff] }
 0x484   : > { %v4525_v15 = vadd.f32 %v4524_v6, %v4478_v43  ;;  %v4089_v43 = vmax.f32 %v9384_v2, 0.0  ;;  %v9385_v6 = vld [vmem:[#allocation31_spill] sm:$0xff] }
 0x485   : > { %v4410_v25 = vpop.permute.xlu1 %4409  ;;  %v4498_v8 = vmul.f32 %v4405_v35, %v4093_v41  ;;  %v9399_v2 = vld [vmem:[#allocation67_spill] sm:$0xff]  ;;  %v4103_v41 = vmax.f32 %v9404_v42, 0.0 }
 0x486   : > { %v4526_v21 = vadd.f32 %v4525_v15, %v4479_v55  ;;  %v4435_v18 = vpop.permute.xlu0 %4434  ;;  %v4090_v55 = vmax.f32 %v9385_v6, 0.0  ;;  %v4494_v15 = vmul.f32 %v8997_v17, %v4089_v43  ;;  %v4099_v43 = vmax.f32 %v9399_v2, 0.0  ;;  %v9400_v6 = vld [vmem:[#allocation54_spill] sm:$0xff] }
 0x488   : > { %v4527_v51 = vadd.f32 %v4526_v21, %v4480_v20  ;;  %v9386_v20 = vld [vmem:[#allocation44_spill] sm:$0xff] }
 0x489   : > { %v4420_v22 = vpop.permute.xlu1 %4419  ;;  %v4091_v1 = vmax.f32 %v9386_v20, 0.0 }
 0x48a   : > { %v4528_v47 = vadd.f32 %v4527_v51, %v4481_v28  ;;  %v4445_v21 = vpop.permute.xlu0 %4444  ;;  %v4495_v28 = vmul.f32 %v4390_v10, %v4090_v55  ;;  %v4092_v51 = vmax.f32 %v9387_v24, 0.0  ;;  %v9391_v10 = vld [vmem:[#allocation58_spill] sm:$0xff] }
 0x48c   : > { %v4529_v60 = vadd.f32 %v4528_v47, %v4482_v27  ;;  %v1041_v47 = vmul.f32 %v5510_v54, %v9388_v58  ;;  %v4497_v17 = vmul.f32 %v4400_v29, %v4092_v51 }
 0x48e   : > { %v4530_v16 = vadd.f32 %v4529_v60, %v4483_v50  ;;  %v4496_v50 = vmul.f32 %v4395_v46, %v4091_v1  ;;  %v1081_v32 = vadd.f32 %v9391_v10, %v1041_v47 }
 0x490   : > { %v4531_v19 = vadd.f32 %v4530_v16, %v4484_v59  ;;  %v5511_v59 = vld [vmem:[%s5804_s16 + $0x38] sm:$0xff]  ;;  %v4430_v16 = vpop.permute.xlu1 %4429  ;;  %s4716_s16 = sshll.u32 %s5715_s12, 4  ;;  %s5620_s12 = smov [#allocation6]  }
 0x491   : > { %v1042_v40 = vmul.f32 %v5511_v59, %v9388_v58  ;;  %s9057_s20 = scalar_lea.hbm %s9114_s13, %s4716_s16  ;;  %s5546_s14 = sshll.u32 %s5620_s12, 4  ;;  %s5547_s14 = int_to_ptr.vmem [resolvable:$false] %s5546_s14 }
 0x492   : > { %v4532_v23 = vadd.f32 %v4531_v19, %v4485_v12  ;;  %v9390_v12 = vld [vmem:[#allocation60_spill] sm:$0xff]  ;;  %s5548_s19 = scalar_lea.vmem %s5547_s14, 32  ;;  %p5549_p4 = scmp.lt.s32.totalorder %s9059_s15, %s5547_s14 }
 0x493   : > { %v4094_v57 = vmax.f32 %v9390_v12, 0.0  ;;  %v1082_v46 = vadd.f32 %v9393_v36, %v1042_v40  ;;  %v9405_v40 = vld [vmem:[#allocation53_spill] sm:$0xff]  ;;  %p5550_p10 = scmp.lt.s32.totalorder %s5548_s19, %s5542_s26 }
 0x494   : > { %v4533_v53 = vadd.f32 %v4532_v23, %v4486_v7  ;;  %v4146_v7 = vpop.permute.xlu0 %4145  ;;  %v9392_v23 = vld [vmem:[#allocation49_spill] sm:$0xff] }
 0x495   : > { %p5551_p1 = por %p5550_p10, %p5549_p4 }
 0x496   : > { %v4534_v11 = vadd.f32 %v4533_v53, %v4487_v49  ;;  %v4095_v49 = vmax.f32 %v9392_v23, 0.0  ;;  %v4499_v53 = vmul.f32 %v4410_v25, %v4094_v57 }
 0x497   : > { %p5552_p3 = pnand %p5551_p1, %p5545_p13 }
 0x498   : > { %v4535_v13 = vadd.f32 %v4534_v11, %v4488_v61  ;;  %v9394_v61 = vld [vmem:[#allocation63_spill] sm:$0xff]  ;;  %v4440_v11 = vpop.permute.xlu1 %4439  ;;  %v4500_v29 = vmul.f32 %v4415_v5, %v4095_v49  ;;  %v4151_v26 = vpop.permute.xlu0 %4150  ;;  %v4503_v5 = vmul.f32 %v4430_v16, %v4098_v14  ;;  %v4104_v16 = vmax.f32 %v9405_v40, 0.0 }
 0x499   : > { %v4096_v38 = vmax.f32 %v9394_v61, 0.0 }
 0x49a   : > { %v4536_v9 = vadd.f32 %v4535_v13, %v4489_v48  ;;  %v9395_v48 = vld [vmem:[#allocation22_spill] sm:$0xff]  ;;  %v4097_v13 = vmax.f32 %v9396_v39, 0.0 }
 0x49b   : > { %v1089_v37 = vadd.f32 %v1081_v32, %v9395_v48 }
 0x49c   : > { %v4537_v62 = vadd.f32 %v4536_v9, %v4490_v45  ;;  %v1090_v9 = vadd.f32 %v1082_v46, %v9397_v0  ;;  %v4502_v25 = vmul.f32 %v4425_v4, %v4097_v13  ;;  %v4568_v61 = vpop.permute.xlu0 %4567 }
 0x49d   : > { %v4159_v35 = vmul.f32 %v4146_v7, %v1089_v37 }
 0x49e   : > { %v4538_v30 = vadd.f32 %v4537_v62, %v4491_v63  ;;  %v4501_v63 = vmul.f32 %v4420_v22, %v4096_v38 }
 0x49f   : > { %v4166_v55 = vadd.f32 %v9400_v6, %v4159_v35 }
 0x4a0   : > { %v4539_v44 = vadd.f32 %v4538_v30, %v4492_v56  ;;  %v4160_v56 = vmul.f32 %v4151_v26, %v1090_v9 }
 0x4a2   : > { %v4540_v31 = vadd.f32 %v4539_v44, %v4493_v52  ;;  %v4450_v52 = vpop.permute.xlu1 %4449  ;;  %v9401_v44 = vld [vmem:[#allocation51_spill] sm:$0xff]  ;;  %v4167_v1 = vadd.f32 %v4166_v55, %v4160_v56 }
 0x4a4   : > { %v4541_v27 = vadd.f32 %v4540_v31, %v4494_v15  ;;  %v4100_v15 = vmax.f32 %v9401_v44, 0.0  ;;  %v4504_v31 = vmul.f32 %v4435_v18, %v4099_v43  ;;  %v4168_v47 = vrot.slane %v4167_v1, 4 }
 0x4a6   : > { %v4542_v60 = vadd.f32 %v4541_v27, %v4495_v28  ;;  %v9402_v28 = vld [vmem:[#allocation69_spill] sm:$0xff]  ;;  %v4505_v51 = vmul.f32 %v4440_v11, %v4100_v15  ;;  %v9403_v27 = vld [vmem:[#allocation52_spill] sm:$0xff]  ;;  %v4455_v4 = vpop.permute.xlu1 %4454  ;;  %v4169_v12 = vadd.f32 %v4168_v47, %v4167_v1  ;;  %v9406_v11 = vld [vmem:[#allocation18_spill] sm:$0xff] }
 0x4a7   : > { %v4101_v24 = vmax.f32 %v9402_v28, 0.0  ;;  %v4102_v54 = vmax.f32 %v9403_v27, 0.0  ;;  %v4508_v57 = vmul.f32 %v4455_v4, %v4103_v41  ;;  %v4573_v48 = vrot.slane %v4568_v61, %v9406_v11 }
 0x4a8   : > { %v4543_v19 = vadd.f32 %v4542_v60, %v4496_v50  ;;  %v4170_v32 = vrot.slane %v4169_v12, 2 }
 0x4a9   : > { %v4506_v50 = vmul.f32 %v4445_v21, %v4101_v24  ;;  %v4507_v59 = vmul.f32 %v4450_v52, %v4102_v54 }
 0x4aa   : > { %v4544_v34 = vadd.f32 %v4543_v19, %v4497_v17  ;;  %v4460_v19 = vpop.permute.xlu1 %4459  ;;  %v4171_v49 = vadd.f32 %v4170_v32, %v4169_v12 }
 0x4ab   : > { %v4509_v7 = vmul.f32 %v4460_v19, %v4104_v16 }
 0x4ac   : > { %v4545_v33 = vadd.f32 %v4544_v34, %v4498_v8  ;;  %v4172_v21 = vrot.slane %v4171_v49, 1 }
 0x4ae   : > { %v4546_v45 = vadd.f32 %v4545_v33, %v4499_v53  ;;  %v4173_v38 = vadd.f32 %v4172_v21, %v4171_v49 }
 0x4b0   : > { %v4547_v62 = vadd.f32 %v4546_v45, %v4500_v29 }
 0x4b2   : > { %v4548_v30 = vadd.f32 %v4547_v62, %v4501_v63 }
 0x4b4   : > { %v4549_v20 = vadd.f32 %v4548_v30, %v4502_v25 }
 0x4b6   : > { %v4550_v22 = vadd.f32 %v4549_v20, %v4503_v5 }
 0x4b8   : > { %v4551_v58 = vadd.f32 %v4550_v22, %v4504_v31 }
 0x4ba   : > { %v4552_v60 = vadd.f32 %v4551_v58, %v4505_v51 }
 0x4bc   : > { %v4553_v17 = vadd.f32 %v4552_v60, %v4506_v50 }
 0x4be   : > { %v4554_v18 = vadd.f32 %v4553_v17, %v4507_v59 }
 0x4c0   : > { %v4555_v10 = vadd.f32 %v4554_v18, %v4508_v57 }
 0x4c2   : > { %v4556_v8 = vadd.f32 %v4555_v10, %v4509_v7 }
 0x4c4   : > { %v4557_v23 = vrot.slane %v4556_v8, 4 }
 0x4c6   : > { %v4558_v34 = vadd.f32 %v4557_v23, %v4556_v8 }
 0x4c8   : > { %v4559_v36 = vrot.slane %v4558_v34, 2 }
 0x4ca   : > { %v4560_v46 = vadd.f32 %v4559_v36, %v4558_v34 }
 0x4cc   : > { %v4561_v53 = vrot.slane %v4560_v46, 1 }
 0x4ce   : > { %v4562_v33 = vadd.f32 %v4561_v53, %v4560_v46 }
 0x4d0   : > { %v4563_v37 = vadd.f32 %v4562_v33, %v4173_v38 }
 0x4d2   : > { %v4574_v29 = vadd.f32 %v4573_v48, %v4563_v37 }
 0x4d4   : > { %v4575_v39 = vsub.f32 0.0, %v4574_v29 }
 0x4d6   : > { %v4576_v13 = vmul.f32 1.442695, %v4575_v39 }
 0x4d8   : > { %5471 = vpow2.f32 %v4576_v13 }
 0x4e2   : > { %v5472_v45 = vpop.eup %5471 }
 0x4e3   : > { %v4578_v26 = vadd.f32 1.0, %v5472_v45 }
 0x4e5   : > { %5473 = vrcp.f32 %v4578_v26 }
 0x4ef   : > { %v5474_v0 = vpop.eup %5473 }
 0x4f0   : > { %4581 = vst [vmem:[%s458_s29] sm:$0x1] %v5474_v0 }
 0x4f1   : > { %5555 = shalt.err (!%p5552_p3)
}
 0x4f2   : > { %s5556_s23 = scalar_lea.hbm %s9057_s20, 16  ;;  %s5560_s29 = scalar_lea.hbm %s9114_s13, 32 }
 0x4f3   : > { %p5557_p5 = scmp.ne.s32.totalorder %s9057_s20, %s5556_s23  ;;  %p5561_p9 = scmp.lt.u32.totalorder %s9057_s20, %s9114_s13 }
 0x4f4   : > { %p5562_p0 = scmp.lt.u32.totalorder %s5560_s29, %s5556_s23  ;;  %p5564_p6 = scmp.lt.u32.totalorder %s5556_s23, %s9057_s20 }
 0x4f5   : > { %p5558_p7 = pnand %p5557_p5, %p9407_p11 }
 0x4f6   : > { %p5563_p2 = por %p5562_p0, %p5561_p9 }
 0x4f7   : > { %p5559_p8 = pneg %p5558_p7 }
 0x4f8   : > { %p5565_p12 = por %p5564_p6, %p5563_p2 }
 0x4fa   : > { %p5566_p13 = pnand %p5565_p12, %p5559_p8 }
 0x4fc   : > { %5569 = shalt.err (!%p5566_p13)
}
 0x4fd   : > { %5401 = dma.vmem_to_hbm [thread:$0]  (%p9407_p11), %s9059_s15, 16, %s9057_s20, %s4583_s24  }
 0x4fe PF: > { %s4607_s26 = sand.u32 1, %s5596_s27   ;;  %p9408_p4 = scmp.ne.s32.totalorder %s9138_s22, 0 }
 0x4ff   : > { %p9409_p10 = scmp.ge.s32.totalorder %s5608_s30, 2  ;;  %s4608_s12 = scalar_lea.sflag [#allocation5], %s4607_s26 }
 0x501   : > { %p5408_p1 = pnand %p9409_p10, %p9408_p4 }
 0x503   : > { %5591 = dma.done.wait (!%p5408_p1), %s4608_s12, 16  }
 0x504   : > { %5593 = vsyncadd (!%p5408_p1), %s4608_s12, 4294967280  ;;  %s9410_s30 = sld [smem:[#allocation10_spill]]  ;;  %s9411_s14 = sld [smem:[#allocation9_spill]] }
 0x505   : > { %s9412_s29 = sld [smem:[#allocation11_spill]]  ;;  %s9413_s27 = smov %s5600_s28 }
 0x50a   : > { %p28_p3 = scmp.ge.s32.totalorder %s9410_s30, 4   ;;  %s9414_s28 = smov %s9411_s14 }
 0x50c   :  { %30 = sbr.rel (!%p28_p3) target bundleno = 8 (0x8), region = 117 }
 0x513   :  { %4612 = vsyncpa [#allocation4], 1 }
 0x514   :  { %4614 = vsyncpa [#allocation4 + $0x1], 1 }
 0x515   :  { %4615 = vsyncpa [#allocation5], 1 }
 0x516   :  { %4617 = vsyncpa [#allocation5 + $0x1], 1 }

</bundles_post_ra>
